<compile_context>
chip_gen: v7x
topology: tpu7x:2x2x1
jax: 0.10.0
libtpu: 0.0.40
codegen_flags: <defaults>
</compile_context>

<pallas_src>
import jax
import jax.numpy as jnp
from jax.experimental import pallas as pl
from jax.experimental.pallas import tpu as pltpu


def _double_conv_kernel(x_ref, w1_ref, b1_ref, w2_ref, b2_ref, o_ref,
                        xpad_ref, ypad_ref):
    # x_ref   : (1, Cin,  H, W)         one image, channels-first
    # w1_ref  : (Cmid, 9*Cin)           conv1 weights, im2col-flattened
    # b1_ref  : (Cmid, 1)
    # w2_ref  : (Cout, 9*Cmid)          conv2 weights, im2col-flattened
    # b2_ref  : (Cout, 1)
    # o_ref   : (1, Cout, H*W)          lane-dense output block
    # xpad_ref: (Cin,  H+2, W+2) VMEM   zero-padded conv1 input
    # ypad_ref: (Cmid, H+2, W+2) VMEM   zero-padded conv1 output (conv2 input)
    H = x_ref.shape[2]
    W = x_ref.shape[3]
    cmid = w1_ref.shape[0]

    # In-kernel zero padding: clear the scratches, then scatter the valid
    # region at offset (1, 1).  The buffers are tiny here; at scale only the
    # halo rows/cols would need zeroing.  (Re-zeroed every grid step so the
    # kernel stays correct when the batch axis is split across TensorCores.)
    xpad_ref[...] = jnp.zeros_like(xpad_ref)
    ypad_ref[...] = jnp.zeros_like(ypad_ref)
    xpad_ref[:, pl.ds(1, H), pl.ds(1, W)] = x_ref[0].astype(jnp.float32)

    def conv3x3_relu(src_pad, w_flat, b_col):
        # src_pad: (C, H+2, W+2); w_flat: (Co, 9*C); b_col: (Co, 1)
        # im2col: stack the 9 shifted taps along the channel axis, then one
        # (Co, 9*C) @ (9*C, H*W) MXU matmul; fused bias + ReLU epilogue.
        taps = [src_pad[:, dy:dy + H, dx:dx + W]
                for dy in range(3) for dx in range(3)]
        cols = jnp.concatenate(taps, axis=0).reshape(-1, H * W)
        y = jnp.dot(w_flat, cols, preferred_element_type=jnp.float32) + b_col
        return jnp.maximum(y, 0.0)          # (Co, H*W), spatial on lanes

    y1 = conv3x3_relu(xpad_ref[...], w1_ref[...], b1_ref[...])
    ypad_ref[:, pl.ds(1, H), pl.ds(1, W)] = y1.reshape(cmid, H, W)
    y2 = conv3x3_relu(ypad_ref[...], w2_ref[...], b2_ref[...])
    o_ref[0] = y2.astype(o_ref.dtype)


def double_conv(x_nchw, params):
    """Fused DoubleConv forward. Input/output in NCHW (PyTorch convention)."""
    w1, b1, w2, b2 = params
    N, Cin, H, W = x_nchw.shape
    Cmid = w1.shape[-1]
    Cout = w2.shape[-1]

    # Pre-flatten weights to lane-dense 2-D im2col tiles; row order matches the
    # (dy, dx, cin) concatenation order used inside the kernel.
    w1f = w1.reshape(9 * Cin, Cmid).T        # (Cmid, 9*Cin)
    w2f = w2.reshape(9 * Cmid, Cout).T       # (Cout, 9*Cmid)
    b1c = b1.reshape(Cmid, 1)
    b2c = b2.reshape(Cout, 1)

    out_flat = pl.pallas_call(
        _double_conv_kernel,
        out_shape=jax.ShapeDtypeStruct((N, Cout, H * W), x_nchw.dtype),
        grid_spec=pltpu.PrefetchScalarGridSpec(
            num_scalar_prefetch=0,
            grid=(N,),
            in_specs=[
                pl.BlockSpec((1, Cin, H, W), lambda n: (n, 0, 0, 0)),
                pl.BlockSpec((Cmid, 9 * Cin), lambda n: (0, 0)),
                pl.BlockSpec((Cmid, 1), lambda n: (0, 0)),
                pl.BlockSpec((Cout, 9 * Cmid), lambda n: (0, 0)),
                pl.BlockSpec((Cout, 1), lambda n: (0, 0)),
            ],
            out_specs=pl.BlockSpec((1, Cout, H * W), lambda n: (n, 0, 0)),
            scratch_shapes=[
                pltpu.VMEM((Cin, H + 2, W + 2), jnp.float32),
                pltpu.VMEM((Cmid, H + 2, W + 2), jnp.float32),
            ],
        ),
        compiler_params=pltpu.CompilerParams(
            dimension_semantics=("parallel",),
            vmem_limit_bytes=48 * 1024 * 1024,
        ),
    )(x_nchw, w1f, b1c, w2f, b2c)

    # Metadata-only reshape back to NCHW.
    return out_flat.reshape(N, Cout, H, W)


def init_params(key, in_channels, out_channels, dtype=jnp.float32):
    """Deterministic synthetic init. Weights stored HWIO (3,3,Cin,Cout)."""
    k1, k2, k3, k4 = jax.random.split(key, 4)
    w1 = jax.random.normal(k1, (3, 3, in_channels, out_channels), dtype) * 0.1
    b1 = jax.random.normal(k2, (out_channels,), dtype) * 0.1
    w2 = jax.random.normal(k3, (3, 3, out_channels, out_channels), dtype) * 0.1
    b2 = jax.random.normal(k4, (out_channels,), dtype) * 0.1
    return (w1, b1, w2, b2)


def reference_double_conv(x_nchw, params):
    """Pure-JAX reference (XLA conv) for correctness check."""
    w1, b1, w2, b2 = params

    def conv(x, w, b):
        y = jax.lax.conv_general_dilated(
            x, w, window_strides=(1, 1), padding=((1, 1), (1, 1)),
            dimension_numbers=("NCHW", "HWIO", "NCHW"))
        return jnp.maximum(y + b[None, :, None, None], 0.0)

    return conv(conv(x_nchw, w1, b1), w2, b2)


if __name__ == "__main__":
    key = jax.random.PRNGKey(0)
    k_x, k_p = jax.random.split(key)

    N, Cin, H, W = 2, 4, 16, 16
    Cout = 8

    x = jax.random.normal(k_x, (N, Cin, H, W), jnp.float32)
    params = init_params(k_p, Cin, Cout)

    out = double_conv(x, params)
    out = jax.block_until_ready(out)

    ref = reference_double_conv(x, params)
    assert out.shape == (N, Cout, H, W), out.shape
    assert jnp.allclose(out, ref, atol=1e-4, rtol=1e-4), (
        float(jnp.max(jnp.abs(out - ref))))

    print("KERNEL_OK")
</pallas_src>

<mosaic_0001>
module attributes {stable_mosaic.version = 11 : i64} {
  func.func @_double_conv_kernel(%arg0: i32, %arg1: memref<1x4x16x16xf32, #tpu.memory_space<vmem>>, %arg2: memref<8x36xf32, #tpu.memory_space<vmem>>, %arg3: memref<8x1xf32, #tpu.memory_space<vmem>>, %arg4: memref<8x72xf32, #tpu.memory_space<vmem>>, %arg5: memref<8x1xf32, #tpu.memory_space<vmem>>, %arg6: memref<1x8x256xf32, #tpu.memory_space<vmem>>, %arg7: memref<4x18x18xf32, #tpu.memory_space<vmem>>, %arg8: memref<8x18x18xf32, #tpu.memory_space<vmem>>) attributes {dimension_semantics = [#tpu.dimension_semantics<parallel>], iteration_bounds = array<i64: 2>, scalar_prefetch = 0 : i64, scratch_operands = 2 : i64, tpu.core_type = #tpu.core_type<tc>, window_params = [{transform_indices = @transform_0, window_bounds = array<i64: 1, 4, 16, 16>}, {pipeline_mode = #tpu.pipeline_mode<synchronous>, transform_indices = @transform_1, window_bounds = array<i64: 8, 36>}, {pipeline_mode = #tpu.pipeline_mode<synchronous>, transform_indices = @transform_2, window_bounds = array<i64: 8, 1>}, {pipeline_mode = #tpu.pipeline_mode<synchronous>, transform_indices = @transform_3, window_bounds = array<i64: 8, 72>}, {pipeline_mode = #tpu.pipeline_mode<synchronous>, transform_indices = @transform_4, window_bounds = array<i64: 8, 1>}, {transform_indices = @transform_5, window_bounds = array<i64: 1, 8, 256>}]} {
    %cst = arith.constant 0.000000e+00 : f32
    %0 = vector.broadcast %cst : f32 to vector<4x18x18xf32>
    %c0 = arith.constant 0 : index
    %c0_0 = arith.constant 0 : index
    %c0_1 = arith.constant 0 : index
    %1 = vector.load %arg7[%c0, %c0_0, %c0_1] : memref<4x18x18xf32, #tpu.memory_space<vmem>>, vector<4x18x18xf32>
    tpu.vector_store %arg7[%c0, %c0_0, %c0_1], %0 {strides = array<i32>} : memref<4x18x18xf32, #tpu.memory_space<vmem>>, vector<4x18x18xf32>,
    %cst_2 = arith.constant 0.000000e+00 : f32
    %2 = vector.broadcast %cst_2 : f32 to vector<8x18x18xf32>
    %c0_3 = arith.constant 0 : index
    %c0_4 = arith.constant 0 : index
    %c0_5 = arith.constant 0 : index
    %3 = vector.load %arg8[%c0_3, %c0_4, %c0_5] : memref<8x18x18xf32, #tpu.memory_space<vmem>>, vector<8x18x18xf32>
    tpu.vector_store %arg8[%c0_3, %c0_4, %c0_5], %2 {strides = array<i32>} : memref<8x18x18xf32, #tpu.memory_space<vmem>>, vector<8x18x18xf32>,
    %c0_6 = arith.constant 0 : index
    %c0_7 = arith.constant 0 : index
    %c0_8 = arith.constant 0 : index
    %c0_9 = arith.constant 0 : index
    %4 = vector.load %arg1[%c0_6, %c0_7, %c0_8, %c0_9] : memref<1x4x16x16xf32, #tpu.memory_space<vmem>>, vector<1x4x16x16xf32>
    %5 = vector.shape_cast %4 : vector<1x4x16x16xf32> to vector<4x16x16xf32>
    %c0_10 = arith.constant 0 : index
    %c1 = arith.constant 1 : index
    %c1_11 = arith.constant 1 : index
    %6 = vector.load %arg7[%c0_10, %c1, %c1_11] : memref<4x18x18xf32, #tpu.memory_space<vmem>>, vector<4x16x16xf32>
    tpu.vector_store %arg7[%c0_10, %c1, %c1_11], %5 {strides = array<i32>} : memref<4x18x18xf32, #tpu.memory_space<vmem>>, vector<4x16x16xf32>,
    %c0_12 = arith.constant 0 : index
    %c0_13 = arith.constant 0 : index
    %c0_14 = arith.constant 0 : index
    %7 = vector.load %arg7[%c0_12, %c0_13, %c0_14] : memref<4x18x18xf32, #tpu.memory_space<vmem>>, vector<4x18x18xf32>
    %c0_15 = arith.constant 0 : index
    %c0_16 = arith.constant 0 : index
    %8 = vector.load %arg2[%c0_15, %c0_16] : memref<8x36xf32, #tpu.memory_space<vmem>>, vector<8x36xf32>
    %c0_17 = arith.constant 0 : index
    %c0_18 = arith.constant 0 : index
    %9 = vector.load %arg3[%c0_17, %c0_18] : memref<8x1xf32, #tpu.memory_space<vmem>>, vector<8x1xf32>
    %10 = vector.extract_strided_slice %7 {offsets = [0, 0, 0], sizes = [4, 16, 16], strides = [1, 1, 1]} : vector<4x18x18xf32> to vector<4x16x16xf32>
    %11 = vector.extract_strided_slice %7 {offsets = [0, 0, 1], sizes = [4, 16, 16], strides = [1, 1, 1]} : vector<4x18x18xf32> to vector<4x16x16xf32>
    %12 = vector.extract_strided_slice %7 {offsets = [0, 0, 2], sizes = [4, 16, 16], strides = [1, 1, 1]} : vector<4x18x18xf32> to vector<4x16x16xf32>
    %13 = vector.extract_strided_slice %7 {offsets = [0, 1, 0], sizes = [4, 16, 16], strides = [1, 1, 1]} : vector<4x18x18xf32> to vector<4x16x16xf32>
    %14 = vector.extract_strided_slice %7 {offsets = [0, 1, 1], sizes = [4, 16, 16], strides = [1, 1, 1]} : vector<4x18x18xf32> to vector<4x16x16xf32>
    %15 = vector.extract_strided_slice %7 {offsets = [0, 1, 2], sizes = [4, 16, 16], strides = [1, 1, 1]} : vector<4x18x18xf32> to vector<4x16x16xf32>
    %16 = vector.extract_strided_slice %7 {offsets = [0, 2, 0], sizes = [4, 16, 16], strides = [1, 1, 1]} : vector<4x18x18xf32> to vector<4x16x16xf32>
    %17 = vector.extract_strided_slice %7 {offsets = [0, 2, 1], sizes = [4, 16, 16], strides = [1, 1, 1]} : vector<4x18x18xf32> to vector<4x16x16xf32>
    %18 = vector.extract_strided_slice %7 {offsets = [0, 2, 2], sizes = [4, 16, 16], strides = [1, 1, 1]} : vector<4x18x18xf32> to vector<4x16x16xf32>
    %19 = tpu.concatenate %10, %11, %12, %13, %14, %15, %16, %17, %18 in 0 : vector<4x16x16xf32>, vector<4x16x16xf32>, vector<4x16x16xf32>, vector<4x16x16xf32>, vector<4x16x16xf32>, vector<4x16x16xf32>, vector<4x16x16xf32>, vector<4x16x16xf32>, vector<4x16x16xf32> -> vector<36x16x16xf32>
    %20 = vector.shape_cast %19 : vector<36x16x16xf32> to vector<36x256xf32>
    %cst_19 = arith.constant dense<0.000000e+00> : vector<8x256xf32>
    %21 = tpu.matmul %8, %20, %cst_19 {dimension_numbers = #tpu.dot_dimension_numbers<[1], [0], [0], [1], [0, 0, 1, 1], [], []>} : vector<8x36xf32>, vector<36x256xf32>, vector<8x256xf32> -> vector<8x256xf32>
    %22 = vector.broadcast %9 : vector<8x1xf32> to vector<8x256xf32>
    %23 = arith.addf %21, %22 : vector<8x256xf32>
    %cst_20 = arith.constant 0.000000e+00 : f32
    %24 = vector.broadcast %cst_20 : f32 to vector<8x256xf32>
    %25 = arith.maximumf %23, %24 : vector<8x256xf32>
    %26 = vector.shape_cast %25 : vector<8x256xf32> to vector<8x16x16xf32>
    %c0_21 = arith.constant 0 : index
    %c1_22 = arith.constant 1 : index
    %c1_23 = arith.constant 1 : index
    %27 = vector.load %arg8[%c0_21, %c1_22, %c1_23] : memref<8x18x18xf32, #tpu.memory_space<vmem>>, vector<8x16x16xf32>
    tpu.vector_store %arg8[%c0_21, %c1_22, %c1_23], %26 {strides = array<i32>} : memref<8x18x18xf32, #tpu.memory_space<vmem>>, vector<8x16x16xf32>,
    %c0_24 = arith.constant 0 : index
    %c0_25 = arith.constant 0 : index
    %c0_26 = arith.constant 0 : index
    %28 = vector.load %arg8[%c0_24, %c0_25, %c0_26] : memref<8x18x18xf32, #tpu.memory_space<vmem>>, vector<8x18x18xf32>
    %c0_27 = arith.constant 0 : index
    %c0_28 = arith.constant 0 : index
    %29 = vector.load %arg4[%c0_27, %c0_28] : memref<8x72xf32, #tpu.memory_space<vmem>>, vector<8x72xf32>
    %c0_29 = arith.constant 0 : index
    %c0_30 = arith.constant 0 : index
    %30 = vector.load %arg5[%c0_29, %c0_30] : memref<8x1xf32, #tpu.memory_space<vmem>>, vector<8x1xf32>
    %31 = vector.extract_strided_slice %28 {offsets = [0, 0, 0], sizes = [8, 16, 16], strides = [1, 1, 1]} : vector<8x18x18xf32> to vector<8x16x16xf32>
    %32 = vector.extract_strided_slice %28 {offsets = [0, 0, 1], sizes = [8, 16, 16], strides = [1, 1, 1]} : vector<8x18x18xf32> to vector<8x16x16xf32>
    %33 = vector.extract_strided_slice %28 {offsets = [0, 0, 2], sizes = [8, 16, 16], strides = [1, 1, 1]} : vector<8x18x18xf32> to vector<8x16x16xf32>
    %34 = vector.extract_strided_slice %28 {offsets = [0, 1, 0], sizes = [8, 16, 16], strides = [1, 1, 1]} : vector<8x18x18xf32> to vector<8x16x16xf32>
    %35 = vector.extract_strided_slice %28 {offsets = [0, 1, 1], sizes = [8, 16, 16], strides = [1, 1, 1]} : vector<8x18x18xf32> to vector<8x16x16xf32>
    %36 = vector.extract_strided_slice %28 {offsets = [0, 1, 2], sizes = [8, 16, 16], strides = [1, 1, 1]} : vector<8x18x18xf32> to vector<8x16x16xf32>
    %37 = vector.extract_strided_slice %28 {offsets = [0, 2, 0], sizes = [8, 16, 16], strides = [1, 1, 1]} : vector<8x18x18xf32> to vector<8x16x16xf32>
    %38 = vector.extract_strided_slice %28 {offsets = [0, 2, 1], sizes = [8, 16, 16], strides = [1, 1, 1]} : vector<8x18x18xf32> to vector<8x16x16xf32>
    %39 = vector.extract_strided_slice %28 {offsets = [0, 2, 2], sizes = [8, 16, 16], strides = [1, 1, 1]} : vector<8x18x18xf32> to vector<8x16x16xf32>
    %40 = tpu.concatenate %31, %32, %33, %34, %35, %36, %37, %38, %39 in 0 : vector<8x16x16xf32>, vector<8x16x16xf32>, vector<8x16x16xf32>, vector<8x16x16xf32>, vector<8x16x16xf32>, vector<8x16x16xf32>, vector<8x16x16xf32>, vector<8x16x16xf32>, vector<8x16x16xf32> -> vector<72x16x16xf32>
    %41 = vector.shape_cast %40 : vector<72x16x16xf32> to vector<72x256xf32>
    %cst_31 = arith.constant dense<0.000000e+00> : vector<8x256xf32>
    %42 = tpu.matmul %29, %41, %cst_31 {dimension_numbers = #tpu.dot_dimension_numbers<[1], [0], [0], [1], [0, 0, 1, 1], [], []>} : vector<8x72xf32>, vector<72x256xf32>, vector<8x256xf32> -> vector<8x256xf32>
    %43 = vector.broadcast %30 : vector<8x1xf32> to vector<8x256xf32>
    %44 = arith.addf %42, %43 : vector<8x256xf32>
    %cst_32 = arith.constant 0.000000e+00 : f32
    %45 = vector.broadcast %cst_32 : f32 to vector<8x256xf32>
    %46 = arith.maximumf %44, %45 : vector<8x256xf32>
    %c0_33 = arith.constant 0 : index
    %c0_34 = arith.constant 0 : index
    %c0_35 = arith.constant 0 : index
    %47 = vector.load %arg6[%c0_33, %c0_34, %c0_35] : memref<1x8x256xf32, #tpu.memory_space<vmem>>, vector<1x8x256xf32>
    %48 = vector.shape_cast %47 : vector<1x8x256xf32> to vector<8x256xf32>
    %49 = vector.shape_cast %46 : vector<8x256xf32> to vector<1x8x256xf32>
    tpu.vector_store %arg6[%c0_33, %c0_34, %c0_35], %49 {strides = array<i32>} : memref<1x8x256xf32, #tpu.memory_space<vmem>>, vector<1x8x256xf32>,
    return
  }
  func.func @transform_0(%arg0: i32) -> (i32, i32, i32, i32) {
    %c0_i32 = arith.constant 0 : i32
    %c0_i32_0 = arith.constant 0 : i32
    %c0_i32_1 = arith.constant 0 : i32
    %c0_i32_2 = arith.constant 0 : i32
    return %arg0, %c0_i32, %c0_i32_0, %c0_i32_1 : i32, i32, i32, i32
  }
  func.func @transform_1(%arg0: i32) -> (i32, i32) {
    %c0_i32 = arith.constant 0 : i32
    %c0_i32_0 = arith.constant 0 : i32
    %c0_i32_1 = arith.constant 0 : i32
    return %c0_i32, %c0_i32_0 : i32, i32
  }
  func.func @transform_2(%arg0: i32) -> (i32, i32) {
    %c0_i32 = arith.constant 0 : i32
    %c0_i32_0 = arith.constant 0 : i32
    %c0_i32_1 = arith.constant 0 : i32
    return %c0_i32, %c0_i32_0 : i32, i32
  }
  func.func @transform_3(%arg0: i32) -> (i32, i32) {
    %c0_i32 = arith.constant 0 : i32
    %c0_i32_0 = arith.constant 0 : i32
    %c0_i32_1 = arith.constant 0 : i32
    return %c0_i32, %c0_i32_0 : i32, i32
  }
  func.func @transform_4(%arg0: i32) -> (i32, i32) {
    %c0_i32 = arith.constant 0 : i32
    %c0_i32_0 = arith.constant 0 : i32
    %c0_i32_1 = arith.constant 0 : i32
    return %c0_i32, %c0_i32_0 : i32, i32
  }
  func.func @transform_5(%arg0: i32) -> (i32, i32, i32) {
    %c0_i32 = arith.constant 0 : i32
    %c0_i32_0 = arith.constant 0 : i32
    %c0_i32_1 = arith.constant 0 : i32
    return %arg0, %c0_i32, %c0_i32_0 : i32, i32, i32
  }
}

</mosaic_0001>

<bundles_post_ra>
// kernel: tpu_custom_call.1
= control target key start
LH: loop header
LB: loop body
LE: loop exit
PB: predicated region body
PF: predicated region fallthrough
CT: control target
= control target key end

     0   :  { %10 = vsyncpa [#allocation5], 0  ;;  %s10875_s0 = inlined_call_operand.hbm [shape: f32[2,4,16,16], index: 0, kind: input, shape index: {}]   ;;  %s10876_s1 = inlined_call_operand.vmem [shape: f32[8,36], index: 1, kind: input, shape index: {}]   ;;  %s10877_s2 = inlined_call_operand.vmem [shape: f32[8,1], index: 2, kind: input, shape index: {}]   ;;  %s10878_s3 = inlined_call_operand.vmem [shape: f32[8,72], index: 3, kind: input, shape index: {}]   ;;  %s10879_s4 = inlined_call_operand.vmem [shape: f32[8,1], index: 4, kind: input, shape index: {}]   ;;  %s10880_s5 = inlined_call_operand.hbm [shape: f32[2,8,256], index: 5, kind: output, shape index: {}]  }
   0x1   :  { %12 = vsyncpa [#allocation5 + $0x1], 0 }
   0x2   :  { %13 = vsyncpa [#allocation6], 0 }
   0x3   :  { %15 = vsyncpa [#allocation6 + $0x1], 0  ;;  %s7004_s18 = smov 0   ;;  %s7006_s19 = smov 0  }
   0x4   :  { %s7008_s20 = smov 0   ;;  %s7010_s21 = smov 0  }
   0x5 LB: > { %s7025_s22 = sadd.s32 4294967295, %s6954_s21   ;;  %s6321_s23 = sadd.s32 4294967294, %s6954_s21   ;;  %s6954_s21 = sphi %s7010_s21, %s11453_s21   ;;  %s6950_s20 = sphi %s7008_s20, %s11452_s20   ;;  %s6946_s19 = sphi %s7006_s19, %s11451_s19   ;;  %s6942_s18 = sphi %s7004_s18, %s11450_s18  }
   0x6   : > { %s7029_s24 = sadd.s32 1, %s6954_s21   ;;  %s28_s25 = sadd.s32 1, %s6950_s20 }
   0x7   : > { %s25_s26 = ssub.s32 %s6954_s21, %s7029_s24  ;;  %p35_p0 = scmp.ne.s32.totalorder %s6950_s20, %s6946_s19 }
   0x8   : > { %p26_p1 = scmp.eq.s32.totalorder %s25_s26, 0  ;;  %p36_p2 = scmp.eq.s32.totalorder %s6954_s21, 0 }
   0x9   : > { %p41_p3 = scmp.ne.s32.totalorder %s6946_s19, %s6942_s18  ;;  %p42_p4 = scmp.eq.s32.totalorder %s7025_s22, 0 }
   0xa   : > { %s7041_s27 = scalar_select %p26_p1, %s6950_s20, %s28_s25  }
   0xb   : > { %p7043_p5 = por %p36_p2, %p35_p0  ;;  %p7047_p6 = por %p42_p4, %p41_p3 }
   0xc   : > { %p149_p7 = scmp.eq.s32.totalorder %s7025_s22, 1  ;;  %p155_p8 = scmp.eq.s32.totalorder %s6321_s23, 1 }
   0xd   : > { %p6377_p10 = scmp.lt.s32.totalorder %s6954_s21, 2  ;;  %s187_s7 = sand.u32 1, %s6950_s20  }
   0xe   : > { %p7054_p11 = por %p149_p7, %p35_p0  ;;  %p7058_p12 = por %p155_p8, %p41_p3 }
   0xf   : > { %s6339_s8 = sshll.u32 %s6954_s21, 10  ;;  %s6324_s9 = sshll.u32 %s187_s7, 6 }
  0x10   : > { %s11079_s30 = scalar_select %p7054_p11, 1, 0 }
  0x11   : > { %s11080_s6 = scalar_select %p7058_p12, 1, 0 }
  0x12   : > { %s7067_s12 = scalar_lea.hbm %s10875_s0, %s6339_s8  ;;  %s191_s13 = scalar_lea.vmem [#allocation4], %s6324_s9 }
  0x13   : > { %s198_s14 = sshll.u32 %s191_s13, 4  ;;  %p7071_p13 = pnand %p6377_p10, %p7043_p5  ;;  %s7075_s14 = int_to_ptr.vmem [resolvable:$true] %s198_s14 }
  0x14   : > { %s7077_s16 = scalar_lea.sflag [#allocation5], %s187_s7  ;;  %s6858_s17 = scalar_lea.hbm %s7067_s12, 1024 }
  0x15   : > { %p6859_p0 = scmp.ne.s32.totalorder %s7067_s12, %s6858_s17  ;;  %p6860_p1 = pneg %p7071_p13 }
  0x16   : > { %s6863_s26 = scalar_lea.hbm %s10875_s0, 2048  ;;  %p6864_p4 = scmp.lt.u32.totalorder %s7067_s12, %s10875_s0 }
  0x17   : > { %p6861_p2 = pnand %p6860_p1, %p6859_p0  ;;  %p6865_p5 = scmp.lt.u32.totalorder %s6863_s26, %s6858_s17 }
  0x18   : > { %p6867_p8 = scmp.lt.u32.totalorder %s6858_s17, %s7067_s12 }
  0x19   : > { %p6862_p3 = pneg %p6861_p2  ;;  %p6866_p7 = por %p6865_p5, %p6864_p4 }
  0x1b   : > { %p6868_p10 = por %p6867_p8, %p6866_p7 }
  0x1d   : > { %p6869_p9 = pnand %p6868_p10, %p6862_p3 }
  0x1f   : > { %6872 = shalt.err (!%p6869_p9)
}
  0x20   : > { %s6873_s7 = scalar_lea.vmem %s7075_s14, 1024  ;;  %s6956_s9 = smov [#allocation4]  }
  0x21   : > { %p6874_p0 = scmp.ne.s32.totalorder %s7075_s14, %s6873_s7  ;;  %s6878_s10 = sshll.u32 %s6956_s9, 4  ;;  %s6879_s10 = int_to_ptr.vmem [resolvable:$false] %s6878_s10 }
  0x22   : > { %s6880_s11 = scalar_lea.vmem %s6879_s10, 2048  ;;  %p6881_p11 = scmp.lt.s32.totalorder %s7075_s14, %s6879_s10 }
  0x23   : > { %p6876_p2 = pnand %p6874_p0, %p6860_p1  ;;  %p6882_p4 = scmp.lt.s32.totalorder %s6880_s11, %s6873_s7 }
  0x25   : > { %p6877_p12 = pneg %p6876_p2  ;;  %p6883_p5 = por %p6882_p4, %p6881_p11 }
  0x27   : > { %p6884_p7 = pnand %p6883_p5, %p6877_p12 }
  0x29   : > { %6887 = shalt.err (!%p6884_p7)
}
  0x2a   : > { %s6957_s13 = smov 128   ;;  %s6958_s17 = smov 8  }
  0x2b   : > { %6372 = dma.hbm_to_vmem [thread:$0]  (!%p7071_p13), %s7067_s12, 1024, %s7075_s14, %s7077_s16, %s6957_s13, %s6957_s13, %s6958_s17  }
  0x2c   : > { %p6327_p9 = scmp.ge.s32.totalorder %s6954_s21, 1  ;;  %p206_p1 = scmp.lt.s32.totalorder %s6954_s21, 3 }
  0x2e   : > { %p207_p3 = pnand %p6327_p9, %p206_p1 }
  0x30   : > { %210 = sbr.rel (%p207_p3) target bundleno = 1770 (0x6ea), region = 40 }
  0x37   : > { %s7108_s23 = sand.u32 1, %s6946_s19  }
  0x38   : > { %s6328_s25 = sshll.u32 %s7108_s23, 6  ;;  %s213_s26 = scalar_lea.sflag [#allocation5], %s7108_s23 }
  0x39   : > { %s7112_s28 = scalar_lea.vmem [#allocation4], %s6328_s25 }
  0x3a   : > { %6933 = dma.done.wait (%p7047_p6), %s213_s26, 1024  }
  0x3b   : > { %6935 = vsyncadd (%p7047_p6), %s213_s26, 4294966272  ;;  %vm243_vm0 = vcmask 146432   ;;  %vm246_vm1 = vcmask 140288   ;;  %v10882_v0 = vmov 0.0   ;;  %v283_v1 = vld [vmem:[%s7112_s28 + $0x10] sm:$0xff]  ;;  %v281_v2 = vld [vmem:[%s7112_s28] sm:$0xff]  ;;  %v563_v22 = vlaneseq }
  0x3c   : > { %248 = vst.msk [vmem:[#allocation2 + $0x18] sm:$0xff] %vm243_vm0, %v10882_v0  ;;  %249 = vst.msk [vmem:[#allocation2 + $0x20] sm:$0xff] %vm243_vm0, %v10882_v0  ;;  %2219 = vmatprep.mubr.f32.mxu0 %v10882_v0  ;;  %6225 = vmatprep.mubr.f32.mxu1 %v10882_v0  ;;  %s6960_s29 = smov 1   ;;  %v284_v3 = vld [vmem:[%s7112_s28 + $0x18] sm:$0xff]  ;;  %v282_v4 = vld [vmem:[%s7112_s28 + $0x8] sm:$0xff]  ;;  %vm321_vm2 = vcmask 138248  }
  0x3d   : > { %244 = vst.msk [vmem:[#allocation2] sm:$0xff] %vm243_vm0, %v10882_v0  ;;  %245 = vst.msk [vmem:[#allocation2 + $0x8] sm:$0xff] %vm243_vm0, %v10882_v0  ;;  %301 = vrot.lane.b32.xlu1 %v283_v1, %s6960_s29  ;;  %297 = vrot.lane.b32.xlu0 %v281_v2, %s6960_s29  ;;  %v286_v5 = vld [vmem:[%s7112_s28 + $0x28] sm:$0xff]  ;;  %v285_v6 = vld [vmem:[%s7112_s28 + $0x20] sm:$0xff]  ;;  %v6961_v20 = vmov 1983009808  }
  0x3e   : > { %251 = vst.msk [vmem:[#allocation2 + $0x30] sm:$0xff] %vm243_vm0, %v10882_v0  ;;  %252 = vst.msk [vmem:[#allocation2 + $0x38] sm:$0xff] %vm243_vm0, %v10882_v0  ;;  %v288_v7 = vld [vmem:[%s7112_s28 + $0x38] sm:$0xff]  ;;  %v287_v8 = vld [vmem:[%s7112_s28 + $0x30] sm:$0xff]  ;;  %v561_v21 = vunpack.c.l.s4 %v6961_v20  ;;  %s6962_s12 = smov 127   ;;  %vm404_vm3 = vcmask 1046528  }
  0x3f   : > { %254 = vst.msk [vmem:[#allocation2 + $0x48] sm:$0xff] %vm243_vm0, %v10882_v0  ;;  %255 = vst.msk [vmem:[#allocation2 + $0x50] sm:$0xff] %vm243_vm0, %v10882_v0  ;;  %v7241_v33 = vshrl.u32 %v563_v22, 7  ;;  %s6963_s14 = smov 126   ;;  %vm481_vm4 = vcmask 1045504   ;;  %s6965_s15 = smov 16  }
  0x40   : > { %257 = vst.msk [vmem:[#allocation3] sm:$0xff] %vm243_vm0, %v10882_v0  ;;  %258 = vst.msk [vmem:[#allocation3 + $0x8] sm:$0xff] %vm243_vm0, %v10882_v0  ;;  %v562_v29 = vunpack.c.0.s8 %v561_v21  ;;  %s6966_s16 = smov 32   ;;  %s6967_s8 = smov 48   ;;  %vm2062_vm5 = vcmask 130048   ;;  %vm2068_vm6 = vcmask 261120  }
  0x41   : > { %260 = vst.msk [vmem:[#allocation3 + $0x18] sm:$0xff] %vm243_vm0, %v10882_v0  ;;  %261 = vst.msk [vmem:[#allocation3 + $0x20] sm:$0xff] %vm243_vm0, %v10882_v0  ;;  %303 = vrot.lane.b32.xlu1 %v284_v3, %s6960_s29  ;;  %299 = vrot.lane.b32.xlu0 %v282_v4, %s6960_s29  ;;  %s6968_s7 = smov 64   ;;  %s6969_s9 = smov 80   ;;  %vm2074_vm7 = vcmask 392192   ;;  %vm2080_vm8 = vcmask 523264  }
  0x42   : > { %263 = vst.msk [vmem:[#allocation3 + $0x30] sm:$0xff] %vm243_vm0, %v10882_v0  ;;  %264 = vst.msk [vmem:[#allocation3 + $0x38] sm:$0xff] %vm243_vm0, %v10882_v0  ;;  %v7280_v51 = vsub.s32 %v562_v29, %v7241_v33  ;;  %s6970_s10 = smov 96   ;;  %s6971_s11 = smov 112   ;;  %vm2086_vm9 = vcmask 654336   ;;  %vm2092_vm10 = vcmask 785408  }
  0x43   : > { %266 = vst.msk [vmem:[#allocation3 + $0x48] sm:$0xff] %vm243_vm0, %v10882_v0  ;;  %267 = vst.msk [vmem:[#allocation3 + $0x50] sm:$0xff] %vm243_vm0, %v10882_v0  ;;  %vm2098_vm11 = vcmask 916480   ;;  %vm2148_vm12 = vcmask 1043456   ;;  %vm2144_vm13 = vcmask 293888   ;;  %vm6157_vm14 = vcmask 588800  }
  0x44   : > { %269 = vst.msk [vmem:[#allocation3 + $0x60] sm:$0xff] %vm243_vm0, %v10882_v0  ;;  %270 = vst.msk [vmem:[#allocation3 + $0x68] sm:$0xff] %vm243_vm0, %v10882_v0  ;;  %s6237_s13 = scalar_lea.sflag [#allocation6], %s7108_s23  ;;  %p11447_p11 = scmp.ne.s32.totalorder %s11079_s30, 0 }
  0x45   : > { %272 = vst.msk [vmem:[#allocation3 + $0x78] sm:$0xff] %vm243_vm0, %v10882_v0  ;;  %273 = vst.msk [vmem:[#allocation3 + $0x80] sm:$0xff] %vm243_vm0, %v10882_v0  ;;  %307 = vrot.lane.b32.xlu1 %v286_v5, %s6960_s29  ;;  %305 = vrot.lane.b32.xlu0 %v285_v6, %s6960_s29 }
  0x46   : > { %275 = vst.msk [vmem:[#allocation3 + $0x90] sm:$0xff] %vm243_vm0, %v10882_v0  ;;  %276 = vst.msk [vmem:[#allocation3 + $0x98] sm:$0xff] %vm243_vm0, %v10882_v0 }
  0x47   : > { %278 = vst.msk [vmem:[#allocation3 + $0xa8] sm:$0xff] %vm243_vm0, %v10882_v0  ;;  %279 = vst.msk [vmem:[#allocation3 + $0xb0] sm:$0xff] %vm243_vm0, %v10882_v0 }
  0x48   : > { %250 = vst.msk [vmem:[#allocation2 + $0x28] sm:$0x3] %vm246_vm1, %v10882_v0  ;;  %247 = vst.msk [vmem:[#allocation2 + $0x10] sm:$0x3] %vm246_vm1, %v10882_v0 }
  0x49   : > { %253 = vst.msk [vmem:[#allocation2 + $0x40] sm:$0x3] %vm246_vm1, %v10882_v0  ;;  %256 = vst.msk [vmem:[#allocation2 + $0x58] sm:$0x3] %vm246_vm1, %v10882_v0  ;;  %311 = vrot.lane.b32.xlu1 %v288_v7, %s6960_s29  ;;  %309 = vrot.lane.b32.xlu0 %v287_v8, %s6960_s29 }
  0x4a   : > { %259 = vst.msk [vmem:[#allocation3 + $0x10] sm:$0x3] %vm246_vm1, %v10882_v0  ;;  %262 = vst.msk [vmem:[#allocation3 + $0x28] sm:$0x3] %vm246_vm1, %v10882_v0 }
  0x4b   : > { %265 = vst.msk [vmem:[#allocation3 + $0x40] sm:$0x3] %vm246_vm1, %v10882_v0  ;;  %268 = vst.msk [vmem:[#allocation3 + $0x58] sm:$0x3] %vm246_vm1, %v10882_v0 }
  0x4c   : > { %271 = vst.msk [vmem:[#allocation3 + $0x70] sm:$0x3] %vm246_vm1, %v10882_v0  ;;  %274 = vst.msk [vmem:[#allocation3 + $0x88] sm:$0x3] %vm246_vm1, %v10882_v0 }
  0x4d   : > { %277 = vst.msk [vmem:[#allocation3 + $0xa0] sm:$0x3] %vm246_vm1, %v10882_v0  ;;  %280 = vst.msk [vmem:[#allocation3 + $0xb8] sm:$0x3] %vm246_vm1, %v10882_v0 }
  0xaf   : > { %v302_v9 = vpop.permute.xlu1 %301  ;;  %v298_v10 = vpop.permute.xlu0 %297 }
  0xb0   : > { %324 = vst.msk [vmem:[#allocation2 + $0x19] sm:$0xff] %vm321_vm2, %v302_v9  ;;  %322 = vst.msk [vmem:[#allocation2 + $0x1] sm:$0xff] %vm321_vm2, %v298_v10 }
  0xb3   : > { %v304_v11 = vpop.permute.xlu1 %303  ;;  %v300_v12 = vpop.permute.xlu0 %299 }
  0xb4   : > { %325 = vst.msk [vmem:[#allocation2 + $0x21] sm:$0xff] %vm321_vm2, %v304_v11  ;;  %323 = vst.msk [vmem:[#allocation2 + $0x9] sm:$0xff] %vm321_vm2, %v300_v12 }
  0xb7   : > { %v308_v13 = vpop.permute.xlu1 %307  ;;  %v306_v14 = vpop.permute.xlu0 %305  ;;  %v7243_v34 = vld [vmem:[#allocation2] sm:$0xff]  ;;  %v7275_v48 = vld [vmem:[#allocation2 + $0x18] sm:$0xff] }
  0xb8   : > { %327 = vst.msk [vmem:[#allocation2 + $0x39] sm:$0xff] %vm321_vm2, %v308_v13  ;;  %326 = vst.msk [vmem:[#allocation2 + $0x31] sm:$0xff] %vm321_vm2, %v306_v14  ;;  %v405_v52 = vrot.slane %v7243_v34, 1  ;;  %v410_v60 = vrot.slane %v7275_v48, 1 }
  0xbb   : > { %v312_v15 = vpop.permute.xlu1 %311  ;;  %v310_v16 = vpop.permute.xlu0 %309  ;;  %v7214_v17 = vld [vmem:[#allocation2 + $0x20] sm:$0xff]  ;;  %v7216_v18 = vld [vmem:[#allocation2 + $0x8] sm:$0xff]  ;;  %v7218_v19 = vld [vmem:[#allocation2 + $0x10] sm:$0x3] }
  0xbc   : > { %329 = vst.msk [vmem:[#allocation2 + $0x51] sm:$0xff] %vm321_vm2, %v312_v15  ;;  %328 = vst.msk [vmem:[#allocation2 + $0x49] sm:$0xff] %vm321_vm2, %v310_v16  ;;  %358 = vrot.lane.b32.xlu1 %v7214_v17, %s6962_s12  ;;  %354 = vrot.lane.b32.xlu0 %v7216_v18, %s6962_s12  ;;  %v406_v23 = vrot.slane %v7216_v18, 1  ;;  %v408_v24 = vrot.slane %v7218_v19, 1  ;;  %v7228_v25 = vld [vmem:[#allocation2 + $0x28] sm:$0x3] }
  0xbd   : > { %v411_v30 = vrot.slane %v7214_v17, 1  ;;  %v413_v36 = vrot.slane %v7228_v25, 1 }
  0xbe   : > { %v7246_v35 = vsel %vm404_vm3, %v406_v23, %v408_v24  ;;  %v7298_v59 = vsel %vm404_vm3, %v405_v52, %v406_v23 }
  0xbf   : > { %v7230_v26 = vld [vmem:[#allocation2 + $0x38] sm:$0xff]  ;;  %v7232_v27 = vld [vmem:[#allocation2 + $0x30] sm:$0xff]  ;;  %v7234_v28 = vld [vmem:[#allocation2 + $0x40] sm:$0x3]  ;;  %v7284_v53 = vsel %vm404_vm3, %v411_v30, %v413_v36  ;;  %v7313_v1 = vsel %vm404_vm3, %v410_v60, %v411_v30  ;;  %v483_v60 = vrot.slane %v7216_v18, 2 }
  0xc0   : > { %362 = vrot.lane.b32.xlu0 %v7230_v26, %s6962_s12  ;;  %v416_v31 = vrot.slane %v7230_v26, 1  ;;  %v418_v32 = vrot.slane %v7234_v28, 1  ;;  %v1170_v37 = vcombine.low %v7216_v18, %v7230_v26  ;;  %v1171_v38 = vcombine.high %v7216_v18, %v7230_v26 }
  0xc1   : > { %v415_v40 = vrot.slane %v7232_v27, 1  ;;  %v558_v41 = vcombine.low %v7243_v34, %v7232_v27  ;;  %v559_v42 = vcombine.high %v7243_v34, %v7232_v27 }
  0xc2   : > { %v7254_v39 = vsel %vm404_vm3, %v416_v31, %v418_v32  ;;  %v7335_v8 = vrot.slane %v1170_v37, %v7280_v51 }
  0xc3   : > { %v7261_v43 = vld [vmem:[#allocation2 + $0x50] sm:$0xff]  ;;  %v7263_v44 = vld [vmem:[#allocation2 + $0x48] sm:$0xff]  ;;  %v1338_v45 = vcombine.low %v7246_v35, %v7254_v39  ;;  %v1339_v46 = vcombine.high %v7246_v35, %v7254_v39  ;;  %v7269_v47 = vld [vmem:[#allocation2 + $0x58] sm:$0x3]  ;;  %v7290_v55 = vsel %vm404_vm3, %v415_v40, %v416_v31  ;;  %v7378_v31 = vrot.slane %v1171_v38, %v7280_v51 }
  0xc4   : > { %366 = vrot.lane.b32.xlu1 %v7261_v43, %s6962_s12  ;;  %378 = vrot.lane.b32.xlu0 %v7216_v18, %s6963_s14  ;;  %v421_v49 = vrot.slane %v7261_v43, 1  ;;  %v423_v50 = vrot.slane %v7269_v47, 1  ;;  %v420_v56 = vrot.slane %v7263_v44, 1  ;;  %v726_v61 = vcombine.low %v7298_v59, %v7290_v55 }
  0xc5   : > { %v727_v62 = vcombine.high %v7298_v59, %v7290_v55  ;;  %v1186_v5 = vcombine.low %v7214_v17, %v7261_v43  ;;  %v7329_v6 = vrot.slane %v1338_v45, %v7280_v51  ;;  %v7348_v13 = vrot.slane %v1339_v46, %v7280_v51 }
  0xc6   : > { %v7287_v54 = vsel %vm404_vm3, %v421_v49, %v423_v50  ;;  %v7310_v63 = vsel %vm404_vm3, %v420_v56, %v421_v49  ;;  %v7357_v15 = vrot.slane %v726_v61, %v7280_v51  ;;  %v1187_v21 = vcombine.high %v7214_v17, %v7261_v43 }
  0xc7   : > { %v1354_v57 = vcombine.low %v7284_v53, %v7287_v54  ;;  %v1355_v58 = vcombine.high %v7284_v53, %v7287_v54  ;;  %v742_v3 = vcombine.low %v7313_v1, %v7310_v63  ;;  %v743_v4 = vcombine.high %v7313_v1, %v7310_v63 }
  0xc8   : > { %382 = vrot.lane.b32.xlu1 %v7214_v17, %s6963_s14  ;;  %386 = vrot.lane.b32.xlu0 %v7230_v26, %s6963_s14  ;;  %v7338_v9 = vrot.slane %v1186_v5, %v7280_v51  ;;  %v574_v23 = vcombine.low %v7275_v48, %v7263_v44  ;;  %v7375_v30 = vrot.slane %v727_v62, %v7280_v51  ;;  %v485_v61 = vrot.slane %v7218_v19, 2 }
  0xc9   : > { %v7316_v2 = vrot.slane %v1354_v57, %v7280_v51  ;;  %v7332_v7 = vrot.slane %v1355_v58, %v7280_v51  ;;  %v7341_v10 = vrot.slane %v742_v3, %v7280_v51  ;;  %v7362_v20 = vrot.slane %v743_v4, %v7280_v51 }
  0xca   : > { %v1234_v14 = vcombine.low %v7335_v8, %v7338_v9  ;;  %v1235_v16 = vcombine.high %v7335_v8, %v7338_v9  ;;  %v7381_v32 = vrot.slane %v1187_v21, %v7280_v51  ;;  %v575_v36 = vcombine.high %v7275_v48, %v7263_v44 }
  0xcb   : > { %v1402_v11 = vcombine.low %v7329_v6, %v7316_v2  ;;  %v1403_v12 = vcombine.high %v7329_v6, %v7316_v2  ;;  %v1418_v22 = vcombine.low %v7348_v13, %v7332_v7  ;;  %v790_v24 = vcombine.low %v7357_v15, %v7341_v10 }
  0xcc   : > { %390 = vrot.lane.b32.xlu1 %v7261_v43, %s6963_s14  ;;  %352 = vrot.lane.b32.xlu0 %v7243_v34, %s6962_s12  ;;  %v791_v29 = vcombine.high %v7357_v15, %v7341_v10  ;;  %v7390_v37 = vrot.slane %v558_v41, %v7280_v51  ;;  %v7393_v40 = vrot.slane %v574_v23, %v7280_v51  ;;  %v488_v62 = vrot.slane %v7214_v17, 2 }
  0xcd   : > { %v7396_v38 = vrot.slane %v559_v42, %v7280_v51  ;;  %v1250_v45 = vcombine.low %v7378_v31, %v7381_v32  ;;  %v7401_v46 = vrot.slane %v575_v36, %v7280_v51  ;;  %v806_v49 = vcombine.low %v7375_v30, %v7362_v20 }
  0xce   : > { %v1251_v50 = vcombine.high %v7378_v31, %v7381_v32  ;;  %v622_v41 = vcombine.low %v7390_v37, %v7393_v40  ;;  %v623_v52 = vcombine.high %v7390_v37, %v7393_v40  ;;  %v1419_v42 = vcombine.high %v7348_v13, %v7332_v7 }
  0xcf   : > { %v638_v57 = vcombine.low %v7396_v38, %v7401_v46  ;;  %v7443_v3 = vsel %vm481_vm4, %v483_v60, %v485_v61  ;;  %v490_v4 = vrot.slane %v7228_v25, 2  ;;  %v495_v18 = vrot.slane %v7234_v28, 2 }
  0xd0   : > { %356 = vrot.lane.b32.xlu1 %v7275_v48, %s6962_s12  ;;  %360 = vrot.lane.b32.xlu0 %v7232_v27, %s6962_s12  ;;  %v500_v25 = vrot.slane %v7269_v47, 2  ;;  %v482_v28 = vrot.slane %v7243_v34, 2  ;;  %v492_v47 = vrot.slane %v7232_v27, 2 }
  0xd1   : > { %v7453_v19 = vsel %vm481_vm4, %v488_v62, %v490_v4 }
  0xd4   : > { %364 = vrot.lane.b32.xlu1 %v7263_v44, %s6962_s12  ;;  %376 = vrot.lane.b32.xlu0 %v7243_v34, %s6963_s14  ;;  %v497_v34 = vrot.slane %v7263_v44, 2 }
  0xd8   : > { %380 = vrot.lane.b32.xlu1 %v7275_v48, %s6963_s14  ;;  %384 = vrot.lane.b32.xlu0 %v7232_v27, %s6963_s14 }
  0xdc   : > { %388 = vrot.lane.b32.xlu1 %v7263_v44, %s6963_s14  ;;  %435 = vrot.lane.b32.xlu0 %v7246_v35, %s6962_s12 }
  0xe0   : > { %439 = vrot.lane.b32.xlu1 %v7284_v53, %s6962_s12  ;;  %443 = vrot.lane.b32.xlu0 %v7254_v39, %s6962_s12 }
  0xe4   : > { %447 = vrot.lane.b32.xlu1 %v7287_v54, %s6962_s12  ;;  %459 = vrot.lane.b32.xlu0 %v7246_v35, %s6963_s14  ;;  %v493_v35 = vrot.slane %v7230_v26, 2 }
  0xe6   : > { %v7456_v17 = vsel %vm481_vm4, %v493_v35, %v495_v18 }
  0xe8   : > { %463 = vrot.lane.b32.xlu1 %v7284_v53, %s6963_s14  ;;  %467 = vrot.lane.b32.xlu0 %v7254_v39, %s6963_s14  ;;  %v498_v39 = vrot.slane %v7261_v43, 2  ;;  %v7485_v43 = vsel %vm481_vm4, %v482_v28, %v483_v60  ;;  %v487_v53 = vrot.slane %v7275_v48, 2  ;;  %v6964_v48 = vmov 1934713408  }
  0xea   : > { %v7465_v26 = vsel %vm481_vm4, %v498_v39, %v500_v25  ;;  %v7505_v27 = vsel %vm481_vm4, %v497_v34, %v498_v39 }
  0xec   : > { %471 = vrot.lane.b32.xlu1 %v7287_v54, %s6963_s14  ;;  %512 = vrot.lane.b32.xlu0 %v7443_v3, %s6962_s12  ;;  %v7494_v54 = vsel %vm481_vm4, %v487_v53, %v488_v62 }
  0xf0   : > { %516 = vrot.lane.b32.xlu1 %v7453_v19, %s6962_s12  ;;  %520 = vrot.lane.b32.xlu0 %v7456_v17, %s6962_s12 }
  0xf4   : > { %524 = vrot.lane.b32.xlu1 %v7465_v26, %s6962_s12  ;;  %433 = vrot.lane.b32.xlu0 %v7298_v59, %s6962_s12 }
  0xf8   : > { %437 = vrot.lane.b32.xlu1 %v7313_v1, %s6962_s12  ;;  %441 = vrot.lane.b32.xlu0 %v7290_v55, %s6962_s12 }
  0xfc   : > { %445 = vrot.lane.b32.xlu1 %v7310_v63, %s6962_s12  ;;  %457 = vrot.lane.b32.xlu0 %v7298_v59, %s6963_s14  ;;  %v625_v59 = vunpack.c.l.s4 %v6964_v48 }
  0xfe   : > { %v626_v21 = vunpack.c.0.s8 %v625_v59 }
 0x100   : > { %461 = vrot.lane.b32.xlu1 %v7313_v1, %s6963_s14  ;;  %465 = vrot.lane.b32.xlu0 %v7290_v55, %s6963_s14  ;;  %v7497_v55 = vsel %vm481_vm4, %v492_v47, %v493_v35  ;;  %v7529_v39 = vsub.s32 %v626_v21, %v7241_v33 }
 0x102   : > { %v1426_v6 = vrot.slane %v1418_v22, %v7529_v39  ;;  %v637_v10 = vrot.slane %v623_v52, %v7529_v39  ;;  %v646_v15 = vrot.slane %v638_v57, %v7529_v39 }
 0x104   : > { %469 = vrot.lane.b32.xlu1 %v7310_v63, %s6963_s14  ;;  %510 = vrot.lane.b32.xlu0 %v7485_v43, %s6962_s12 }
 0x108   : > { %514 = vrot.lane.b32.xlu1 %v7494_v54, %s6962_s12  ;;  %518 = vrot.lane.b32.xlu0 %v7497_v55, %s6962_s12 }
 0x10c   : > { %522 = vrot.lane.b32.xlu1 %v7505_v27, %s6962_s12  ;;  %536 = vrot.lane.b32.xlu0 %v7443_v3, %s6963_s14 }
 0x110   : > { %540 = vrot.lane.b32.xlu1 %v7453_v19, %s6963_s14  ;;  %544 = vrot.lane.b32.xlu0 %v7456_v17, %s6963_s14 }
 0x114   : > { %548 = vrot.lane.b32.xlu1 %v7465_v26, %s6963_s14  ;;  %534 = vrot.lane.b32.xlu0 %v7485_v43, %s6963_s14 }
 0x118   : > { %538 = vrot.lane.b32.xlu1 %v7494_v54, %s6963_s14  ;;  %542 = vrot.lane.b32.xlu0 %v7497_v55, %s6963_s14 }
 0x11c   : > { %546 = vrot.lane.b32.xlu1 %v7505_v27, %s6963_s14 }
 0x12e   : > { %v355_v44 = vpop.permute.xlu0 %354  ;;  %v359_v63 = vpop.permute.xlu1 %358 }
 0x132   : > { %v363_v1 = vpop.permute.xlu0 %362 }
 0x133   : > { %v1202_v5 = vcombine.low %v355_v44, %v363_v1  ;;  %v1203_v23 = vcombine.high %v355_v44, %v363_v1 }
 0x135   : > { %v1210_v4 = vrot.slane %v1202_v5, %v7280_v51  ;;  %v1217_v25 = vrot.slane %v1203_v23, %v7280_v51  ;;  %v7545_v23 = vrot.slane %v1402_v11, %v7529_v39  ;;  %v1258_v11 = vrot.slane %v1250_v45, %v7529_v39 }
 0x136   : > { %v367_v36 = vpop.permute.xlu1 %366  ;;  %v379_v60 = vpop.permute.xlu0 %378 }
 0x137   : > { %v1218_v61 = vcombine.low %v359_v63, %v367_v36  ;;  %v1219_v62 = vcombine.high %v359_v63, %v367_v36  ;;  %v7536_v63 = vrot.slane %v1234_v14, %v7529_v39  ;;  %11084 = vst [vmem:[#allocation12_spill] sm:$0xff] %v7545_v23  ;;  %v1417_v36 = vrot.slane %v1403_v12, %v7529_v39 }
 0x139   : > { %v1226_v35 = vrot.slane %v1218_v61, %v7280_v51  ;;  %v1233_v18 = vrot.slane %v1219_v62, %v7280_v51  ;;  %11082 = vst [vmem:[#allocation10_spill] sm:$0xff] %v7536_v63  ;;  %v1249_v62 = vrot.slane %v1235_v16, %v7529_v39 }
 0x13a   : > { %v383_v28 = vpop.permute.xlu1 %382  ;;  %v387_v47 = vpop.permute.xlu0 %386 }
 0x13b   : > { %v1266_v53 = vcombine.low %v1210_v4, %v1226_v35  ;;  %v1267_v34 = vcombine.high %v1210_v4, %v1226_v35  ;;  %v1282_v44 = vcombine.low %v1217_v25, %v1233_v18  ;;  %v1306_v48 = vcombine.low %v379_v60, %v387_v47 }
 0x13c   : > { %v1307_v59 = vcombine.high %v379_v60, %v387_v47  ;;  %v1283_v33 = vcombine.high %v1217_v25, %v1233_v18  ;;  %v1265_v25 = vrot.slane %v1251_v50, %v7529_v39 }
 0x13d   : > { %v7539_v1 = vrot.slane %v1266_v53, %v7529_v39  ;;  %v1281_v4 = vrot.slane %v1267_v34, %v7529_v39  ;;  %v1290_v2 = vrot.slane %v1282_v44, %v7529_v39  ;;  %v1314_v12 = vrot.slane %v1306_v48, %v7280_v51 }
 0x13e   : > { %v391_v5 = vpop.permute.xlu1 %390  ;;  %v353_v21 = vpop.permute.xlu0 %352  ;;  %v1321_v35 = vrot.slane %v1307_v59, %v7280_v51  ;;  %v1297_v22 = vrot.slane %v1283_v33, %v7529_v39 }
 0x13f   : > { %11083 = vst [vmem:[#allocation11_spill] sm:$0xff] %v7539_v1  ;;  %v1322_v60 = vcombine.low %v383_v28, %v391_v5  ;;  %v1323_v14 = vcombine.high %v383_v28, %v391_v5  ;;  %v1299_v45 = vcombine.high %v7536_v63, %v7539_v1  ;;  %v1433_v28 = vrot.slane %v1419_v42, %v7529_v39 }
 0x140   : > { %v1300_v59 = vcombine.low %v1249_v62, %v1281_v4  ;;  %v1301_v5 = vcombine.high %v1249_v62, %v1281_v4 }
 0x141   : > { %v1330_v8 = vrot.slane %v1322_v60, %v7280_v51  ;;  %v1337_v9 = vrot.slane %v1323_v14, %v7280_v51  ;;  %v1302_v60 = vcombine.low %v1258_v11, %v1290_v2 }
 0x142   : > { %v357_v16 = vpop.permute.xlu1 %356  ;;  %v361_v18 = vpop.permute.xlu0 %360 }
 0x143   : > { %v1370_v47 = vcombine.low %v1314_v12, %v1330_v8  ;;  %v1371_v53 = vcombine.high %v1314_v12, %v1330_v8  ;;  %v1386_v34 = vcombine.low %v1321_v35, %v1337_v9  ;;  %v1387_v44 = vcombine.high %v1321_v35, %v1337_v9 }
 0x144   : > { %v590_v48 = vcombine.low %v353_v21, %v361_v18  ;;  %v591_v33 = vcombine.high %v353_v21, %v361_v18  ;;  %v1303_v12 = vcombine.high %v1258_v11, %v1290_v2  ;;  %v1304_v35 = vcombine.low %v1265_v25, %v1297_v22 }
 0x145   : > { %v7583_v14 = vrot.slane %v1370_v47, %v7529_v39  ;;  %v1385_v31 = vrot.slane %v1371_v53, %v7529_v39  ;;  %v1394_v32 = vrot.slane %v1386_v34, %v7529_v39  ;;  %v1401_v50 = vrot.slane %v1387_v44, %v7529_v39 }
 0x146   : > { %v598_v7 = vrot.slane %v590_v48, %v7280_v51  ;;  %v365_v13 = vpop.permute.xlu1 %364  ;;  %v377_v42 = vpop.permute.xlu0 %376 }
 0x147   : > { %11085 = vst [vmem:[#allocation13_spill] sm:$0xff] %v7583_v14  ;;  %v606_v8 = vcombine.low %v357_v16, %v365_v13  ;;  %v607_v9 = vcombine.high %v357_v16, %v365_v13  ;;  %v1435_v62 = vcombine.high %v7583_v14, %v7545_v23  ;;  %v1436_v47 = vcombine.low %v1385_v31, %v1417_v36 }
 0x148   : > { %v1437_v53 = vcombine.high %v1385_v31, %v1417_v36  ;;  %v1438_v34 = vcombine.low %v1394_v32, %v1426_v6  ;;  %v1439_v61 = vcombine.high %v1394_v32, %v1426_v6  ;;  %v1440_v48 = vcombine.low %v1401_v50, %v1433_v28 }
 0x149   : > { %v614_v21 = vrot.slane %v606_v8, %v7280_v51  ;;  %v621_v18 = vrot.slane %v607_v9, %v7280_v51  ;;  %v6427_v44 = vpack.i.bf16 %v1435_v62, %v1299_v45  ;;  %v6437_v0 = vpack.i.bf16 %v1436_v47, %v1300_v59 }
 0x14a   : > { %v381_v11 = vpop.permute.xlu1 %380  ;;  %v385_v2 = vpop.permute.xlu0 %384  ;;  %v6447_v16 = vpack.i.bf16 %v1437_v53, %v1301_v5  ;;  %v6457_v13 = vpack.i.bf16 %v1438_v34, %v1302_v60  ;;  %v7595_v58 = vpack.i.bf16 %v1439_v61, %v1303_v12  ;;  %v605_v36 = vrot.slane %v591_v33, %v7280_v51 }
 0x14b   : > { %v654_v56 = vcombine.low %v598_v7, %v614_v21  ;;  %6428 = vrot.lane.b32.xlu0 %v6427_v44, %s6965_s15  ;;  %v7599_v6 = vpack.i.bf16 %v1440_v48, %v1304_v35  ;;  %v1305_v31 = vcombine.high %v1265_v25, %v1297_v22  ;;  %v1441_v32 = vcombine.high %v1401_v50, %v1433_v28 }
 0x14c   : > { %v694_v8 = vcombine.low %v377_v42, %v385_v2  ;;  %v695_v45 = vcombine.high %v377_v42, %v385_v2  ;;  %v7605_v59 = vrot.slane %v622_v41, %v7529_v39  ;;  %v655_v5 = vcombine.high %v598_v7, %v614_v21 }
 0x14d   : > { %v7608_v61 = vrot.slane %v654_v56, %v7529_v39  ;;  %v670_v60 = vcombine.low %v605_v36, %v621_v18  ;;  %v7612_v33 = vpack.i.bf16 %v1441_v32, %v1305_v31  ;;  %v671_v41 = vcombine.high %v605_v36, %v621_v18 }
 0x14e   : > { %11086 = vst [vmem:[#allocation14_spill] sm:$0xff] %v7605_v59  ;;  %v389_v12 = vpop.permute.xlu1 %388  ;;  %v7610_v9 = vpop.permute.xlu0 %435  ;;  %v7621_v56 = vrot.slane %v790_v24, %v7529_v39  ;;  %v702_v50 = vrot.slane %v694_v8, %v7280_v51  ;;  %v709_v7 = vrot.slane %v695_v45, %v7280_v51  ;;  %v669_v47 = vrot.slane %v655_v5, %v7529_v39 }
 0x14f   : > { %11087 = vst [vmem:[#allocation15_spill] sm:$0xff] %v7608_v61  ;;  %v710_v25 = vcombine.low %v381_v11, %v389_v12  ;;  %v711_v22 = vcombine.high %v381_v11, %v389_v12  ;;  %6438 = vrot.lane.b32.xlu0 %v6437_v0, %s6966_s16  ;;  %v805_v24 = vrot.slane %v791_v29, %v7529_v39 }
 0x150   : > { %11088 = vst [vmem:[#allocation16_spill] sm:$0xff] %v7621_v56  ;;  %v678_v53 = vrot.slane %v670_v60, %v7529_v39  ;;  %v814_v34 = vrot.slane %v806_v49, %v7529_v39  ;;  %v685_v29 = vrot.slane %v671_v41, %v7529_v39  ;;  %v11089_v49 = vcombine.high %v7375_v30, %v7362_v20 }
 0x151   : > { %v718_v42 = vrot.slane %v710_v25, %v7280_v51  ;;  %v725_v35 = vrot.slane %v711_v22, %v7280_v51  ;;  %v687_v57 = vcombine.high %v7605_v59, %v7608_v61  ;;  %v688_v31 = vcombine.low %v637_v10, %v669_v47 }
 0x152   : > { %v7627_v62 = vpop.permute.xlu1 %439  ;;  %v7629_v0 = vpop.permute.xlu0 %443  ;;  %v821_v11 = vrot.slane %v11089_v49, %v7529_v39  ;;  %v689_v32 = vcombine.high %v637_v10, %v669_v47  ;;  %v11091_v20 = vcombine.high %v7396_v38, %v7401_v46  ;;  %v690_v5 = vcombine.low %v646_v15, %v678_v53 }
 0x153   : > { %v758_v21 = vcombine.low %v702_v50, %v718_v42  ;;  %v759_v18 = vcombine.high %v702_v50, %v718_v42  ;;  %v774_v44 = vcombine.low %v709_v7, %v725_v35  ;;  %v775_v48 = vcombine.high %v709_v7, %v725_v35  ;;  %6448 = vrot.lane.b32.xlu0 %v6447_v16, %s6967_s8 }
 0x154   : > { %v653_v30 = vrot.slane %v11091_v20, %v7529_v39  ;;  %v691_v60 = vcombine.high %v646_v15, %v678_v53  ;;  %v1442_v53 = vcombine.low %v7610_v9, %v7629_v0  ;;  %v983_v14 = vcombine.high %v7494_v54, %v7505_v27 }
 0x155   : > { %v7656_v2 = vrot.slane %v758_v21, %v7529_v39  ;;  %v773_v16 = vrot.slane %v759_v18, %v7529_v39  ;;  %v782_v37 = vrot.slane %v774_v44, %v7529_v39  ;;  %v789_v40 = vrot.slane %v775_v48, %v7529_v39 }
 0x156   : > { %v7661_v52 = vpop.permute.xlu1 %447  ;;  %v7663_v36 = vpop.permute.xlu0 %459  ;;  %v692_v46 = vcombine.low %v653_v30, %v685_v29 }
 0x157   : > { %11090 = vst [vmem:[#allocation17_spill] sm:$0xff] %v7656_v2  ;;  %6458 = vrot.lane.b32.xlu0 %v6457_v13, %s6968_s7  ;;  %v823_v8 = vcombine.high %v7656_v2, %v7621_v56  ;;  %v824_v12 = vcombine.low %v773_v16, %v805_v24  ;;  %v825_v25 = vcombine.high %v773_v16, %v805_v24 }
 0x158   : > { %v826_v22 = vcombine.low %v782_v37, %v814_v34  ;;  %v827_v41 = vcombine.high %v782_v37, %v814_v34  ;;  %v1458_v50 = vcombine.low %v7627_v62, %v7661_v52  ;;  %v828_v7 = vcombine.low %v789_v40, %v821_v11 }
 0x159   : > { %v6432_v38 = vpack.i.bf16 %v823_v8, %v687_v57  ;;  %v6442_v35 = vpack.i.bf16 %v824_v12, %v688_v31  ;;  %v6452_v47 = vpack.i.bf16 %v825_v25, %v689_v32  ;;  %v693_v34 = vcombine.high %v653_v30, %v685_v29 }
 0x15a   : > { %v7678_v42 = vpop.permute.xlu1 %463  ;;  %v7680_v13 = vpop.permute.xlu0 %467  ;;  %v6462_v21 = vpack.i.bf16 %v826_v22, %v690_v5  ;;  %v6472_v18 = vpack.i.bf16 %v827_v41, %v691_v60  ;;  %v6482_v24 = vpack.i.bf16 %v828_v7, %v692_v46  ;;  %v829_v44 = vcombine.high %v789_v40, %v821_v11 }
 0x15b   : > { %6433 = vrot.lane.b32.xlu1 %v6432_v38, %s6965_s15  ;;  %v7686_v48 = vrot.slane %v1458_v50, %v7280_v51  ;;  %v1474_v10 = vcombine.low %v7663_v36, %v7680_v13  ;;  %v7697_v37 = vrot.slane %v1442_v53, %v7280_v51  ;;  %v1594_v29 = vcombine.low %v7453_v19, %v7465_v26 }
 0x15c   : > { %v7694_v16 = vpack.i.bf16 %v829_v44, %v693_v34  ;;  %v1578_v30 = vcombine.low %v7443_v3, %v7456_v17  ;;  %v966_v56 = vcombine.low %v7485_v43, %v7497_v55 }
 0x15d   : > { %v1506_v11 = vcombine.low %v7697_v37, %v7686_v48  ;;  %v7707_v40 = vrot.slane %v1474_v10, %v7280_v51  ;;  %v7722_v5 = vrot.slane %v1594_v29, %v7280_v51 }
 0x15e   : > { %v7690_v15 = vpop.permute.xlu1 %471  ;;  %v7692_v49 = vpop.permute.xlu0 %512  ;;  %v7737_v50 = vrot.slane %v1578_v30, %v7280_v51  ;;  %v974_v63 = vrot.slane %v966_v56, %v7280_v51 }
 0x15f   : > { %11092 = vst [vmem:[#allocation18_spill] sm:$0xff] %v7692_v49  ;;  %v1490_v57 = vcombine.low %v7678_v42, %v7690_v15  ;;  %6443 = vrot.lane.b32.xlu1 %v6442_v35, %s6966_s16  ;;  %v7727_v12 = vrot.slane %v1506_v11, %v7529_v39 }
 0x161   : > { %v7710_v31 = vrot.slane %v1490_v57, %v7280_v51 }
 0x162   : > { %v7712_v32 = vpop.permute.xlu1 %516  ;;  %v7714_v20 = vpop.permute.xlu0 %520 }
 0x163   : > { %v1538_v8 = vcombine.low %v7707_v40, %v7710_v31  ;;  %6453 = vrot.lane.b32.xlu1 %v6452_v47, %s6967_s8  ;;  %v1610_v60 = vcombine.low %v7692_v49, %v7714_v20  ;;  %v1642_v47 = vcombine.low %v7737_v50, %v7722_v5 }
 0x165   : > { %v7730_v25 = vrot.slane %v1538_v8, %v7529_v39  ;;  %v7745_v7 = vrot.slane %v1610_v60, %v7280_v51 }
 0x166   : > { %v7732_v22 = vpop.permute.xlu1 %524  ;;  %v7734_v41 = vpop.permute.xlu0 %433 }
 0x167   : > { %v1626_v38 = vcombine.low %v7712_v32, %v7732_v22  ;;  %6463 = vrot.lane.b32.xlu1 %v6462_v21, %s6968_s7  ;;  %v7761_v21 = vrot.slane %v1642_v47, %v7529_v39 }
 0x169   : > { %v7748_v35 = vrot.slane %v1626_v38, %v7280_v51 }
 0x16a   : > { %v7752_v53 = vpop.permute.xlu1 %437  ;;  %v7754_v34 = vpop.permute.xlu0 %441 }
 0x16b   : > { %v1674_v44 = vcombine.low %v7745_v7, %v7748_v35  ;;  %6468 = vrot.lane.b32.xlu1 %v7595_v58, %s6969_s9  ;;  %v830_v60 = vcombine.low %v7734_v41, %v7754_v34 }
 0x16d   : > { %v7764_v10 = vrot.slane %v1674_v44, %v7529_v39  ;;  %v7793_v46 = vrot.slane %v830_v60, %v7280_v51 }
 0x16e   : > { %v7766_v57 = vpop.permute.xlu1 %445  ;;  %v7768_v29 = vpop.permute.xlu0 %457 }
 0x16f   : > { %6473 = vrot.lane.b32.xlu1 %v6472_v18, %s6969_s9  ;;  %v846_v30 = vcombine.low %v7752_v53, %v7766_v57  ;;  %11094 = vst [vmem:[#allocation20_spill] sm:$0xff] %v7793_v46 }
 0x171   : > { %v7784_v38 = vrot.slane %v846_v30, %v7280_v51 }
 0x172   : > { %v7775_v8 = vpop.permute.xlu1 %461  ;;  %v7777_v58 = vpop.permute.xlu0 %465 }
 0x173   : > { %6478 = vrot.lane.b32.xlu1 %v7599_v6, %s6970_s10  ;;  %11093 = vst [vmem:[#allocation19_spill] sm:$0xff] %v7784_v38  ;;  %v862_v18 = vcombine.low %v7768_v29, %v7777_v58  ;;  %v982_v6 = vcombine.low %v7494_v54, %v7505_v27  ;;  %v894_v30 = vcombine.low %v7793_v46, %v7784_v38 }
 0x175   : > { %v7803_v45 = vrot.slane %v862_v18, %v7280_v51  ;;  %v990_v18 = vrot.slane %v982_v6, %v7280_v51  ;;  %v7822_v2 = vrot.slane %v894_v30, %v7529_v39 }
 0x176   : > { %v7788_v47 = vpop.permute.xlu1 %469  ;;  %v7790_v44 = vpop.permute.xlu0 %510 }
 0x177   : > { %v878_v11 = vcombine.low %v7775_v8, %v7788_v47  ;;  %6483 = vrot.lane.b32.xlu1 %v6482_v24, %s6970_s10  ;;  %11095 = vst [vmem:[#allocation21_spill] sm:$0xff] %v7803_v45  ;;  %11097 = vst [vmem:[#allocation23_spill] sm:$0xff] %v7822_v2 }
 0x179   : > { %v7806_v28 = vrot.slane %v878_v11, %v7280_v51 }
 0x17a   : > { %v7808_v4 = vpop.permute.xlu1 %514  ;;  %v7810_v60 = vpop.permute.xlu0 %518 }
 0x17b   : > { %11096 = vst [vmem:[#allocation22_spill] sm:$0xff] %v7806_v28  ;;  %v926_v24 = vcombine.low %v7803_v45, %v7806_v28  ;;  %6488 = vrot.lane.b32.xlu1 %v7612_v33, %s6971_s11  ;;  %v998_v11 = vcombine.low %v7790_v44, %v7810_v60 }
 0x17d   : > { %v7825_v61 = vrot.slane %v926_v24, %v7529_v39  ;;  %v7834_v6 = vrot.slane %v998_v11, %v7280_v51  ;;  %v1030_v24 = vcombine.low %v974_v63, %v990_v18 }
 0x17e   : > { %v523_v59 = vpop.permute.xlu1 %522  ;;  %v537_v1 = vpop.permute.xlu0 %536 }
 0x17f   : > { %11098 = vst [vmem:[#allocation24_spill] sm:$0xff] %v7825_v61  ;;  %v1014_v23 = vcombine.low %v7808_v4, %v523_v59  ;;  %6493 = vrot.lane.b32.xlu1 %v7694_v16, %s6971_s11  ;;  %v967_v16 = vcombine.high %v7485_v43, %v7497_v55  ;;  %v7846_v33 = vrot.slane %v1030_v24, %v7529_v39 }
 0x180   : > { %v1579_v43 = vcombine.high %v7443_v3, %v7456_v17  ;;  %v1595_v55 = vcombine.high %v7453_v19, %v7465_v26  ;;  %v1031_v19 = vcombine.high %v974_v63, %v990_v18 }
 0x181   : > { %v7837_v30 = vrot.slane %v1014_v23, %v7280_v51  ;;  %v7852_v23 = vrot.slane %v983_v14, %v7280_v51 }
 0x182   : > { %v541_v46 = vpop.permute.xlu1 %540  ;;  %v545_v56 = vpop.permute.xlu0 %544 }
 0x183   : > { %v1062_v38 = vcombine.low %v7834_v6, %v7837_v30  ;;  %v1714_v45 = vcombine.low %v537_v1, %v545_v56  ;;  %v1715_v27 = vcombine.high %v537_v1, %v545_v56 }
 0x185   : > { %v7849_v11 = vrot.slane %v1062_v38, %v7529_v39  ;;  %v7861_v38 = vrot.slane %v967_v16, %v7280_v51  ;;  %v7864_v14 = vrot.slane %v1714_v45, %v7280_v51  ;;  %v1729_v17 = vrot.slane %v1715_v27, %v7280_v51 }
 0x186   : > { %v549_v2 = vpop.permute.xlu1 %548  ;;  %v535_v54 = vpop.permute.xlu0 %534  ;;  %v7878_v45 = vrot.slane %v1579_v43, %v7280_v51  ;;  %v1459_v27 = vcombine.high %v7627_v62, %v7661_v52  ;;  %v879_v43 = vcombine.high %v7775_v8, %v7788_v47  ;;  %v847_v62 = vcombine.high %v7752_v53, %v7766_v57 }
 0x187   : > { %v1730_v61 = vcombine.low %v541_v46, %v549_v2  ;;  %v1731_v28 = vcombine.high %v541_v46, %v549_v2  ;;  %v1643_v2 = vcombine.high %v7737_v50, %v7722_v5  ;;  %v1046_v3 = vcombine.low %v7861_v38, %v7852_v23 }
 0x188   : > { %v863_v52 = vcombine.high %v7768_v29, %v7777_v58  ;;  %v1443_v53 = vcombine.high %v7610_v9, %v7629_v0  ;;  %v7926_v57 = vrot.slane %v1459_v27, %v7280_v51  ;;  %v1507_v29 = vcombine.high %v7697_v37, %v7686_v48 }
 0x189   : > { %v7867_v24 = vrot.slane %v1730_v61, %v7280_v51  ;;  %v1745_v1 = vrot.slane %v1731_v28, %v7280_v51  ;;  %v7881_v61 = vrot.slane %v1595_v55, %v7280_v51  ;;  %v1015_v28 = vcombine.high %v7808_v4, %v523_v59 }
 0x18a   : > { %v539_v46 = vpop.permute.xlu1 %538  ;;  %v543_v56 = vpop.permute.xlu0 %542  ;;  %v7890_v18 = vrot.slane %v1643_v2, %v7529_v39  ;;  %v7897_v4 = vrot.slane %v1046_v3, %v7529_v39  ;;  %v7900_v59 = vrot.slane %v1031_v19, %v7529_v39  ;;  %v831_v58 = vcombine.high %v7734_v41, %v7754_v34 }
 0x18b   : > { %v1747_v26 = vcombine.high %v7864_v14, %v7867_v24  ;;  %v1102_v50 = vcombine.low %v535_v54, %v543_v56  ;;  %v1762_v63 = vcombine.low %v1729_v17, %v1745_v1  ;;  %v1103_v49 = vcombine.high %v535_v54, %v543_v56 }
 0x18c   : > { %v7911_v8 = vrot.slane %v1015_v28, %v7280_v51  ;;  %v1763_v47 = vcombine.high %v1729_v17, %v1745_v1  ;;  %v7933_v1 = vrot.slane %v879_v43, %v7280_v51  ;;  %v1675_v48 = vcombine.high %v7745_v7, %v7748_v35 }
 0x18d   : > { %v7887_v16 = vrot.slane %v1747_v26, %v7529_v39  ;;  %v999_v26 = vcombine.high %v7790_v44, %v7810_v60  ;;  %v7914_v3 = vrot.slane %v1102_v50, %v7280_v51  ;;  %v7921_v54 = vrot.slane %v1762_v63, %v7529_v39 }
 0x18e   : > { %v547_v55 = vpop.permute.xlu1 %546  ;;  %v1117_v56 = vrot.slane %v1103_v49, %v7280_v51  ;;  %v7946_v37 = vrot.slane %v847_v62, %v7280_v51  ;;  %v7949_v41 = vrot.slane %v863_v52, %v7280_v51  ;;  %v1707_v34 = vcombine.high %v7761_v21, %v7764_v10  ;;  %v11099_v52 = vld [vmem:[#allocation18_spill] sm:$0xff] }
 0x18f   : > { %v1118_v5 = vcombine.low %v539_v46, %v547_v55  ;;  %v1119_v2 = vcombine.high %v539_v46, %v547_v55  ;;  %1955 = vrot.lane.b32.xlu0 %v7887_v16, %s6966_s16  ;;  %v7936_v46 = vrot.slane %v999_v26, %v7280_v51  ;;  %v7956_v17 = vrot.slane %v1763_v47, %v7529_v39 }
 0x190   : > { %v1539_v7 = vcombine.high %v7707_v40, %v7710_v31  ;;  %v1627_v35 = vcombine.high %v7712_v32, %v7732_v22  ;;  %v7966_v50 = vrot.slane %v831_v58, %v7280_v51  ;;  %v1571_v63 = vcombine.high %v7727_v12, %v7730_v25  ;;  %v11101_v58 = vld [vmem:[#allocation21_spill] sm:$0xff] }
 0x191   : > { %v7917_v44 = vrot.slane %v1118_v5, %v7280_v51  ;;  %v1133_v60 = vrot.slane %v1119_v2, %v7280_v51  ;;  %v1078_v49 = vcombine.low %v7936_v46, %v7911_v8  ;;  %v1475_v27 = vcombine.high %v7663_v36, %v7680_v13 }
 0x192   : > { %v942_v43 = vcombine.low %v7949_v41, %v7933_v1  ;;  %v7979_v40 = vrot.slane %v1507_v29, %v7529_v39  ;;  %v910_v31 = vcombine.low %v7966_v50, %v7946_v37  ;;  %v1063_v32 = vcombine.high %v7834_v6, %v7837_v30  ;;  %v11100_v29 = vld [vmem:[#allocation22_spill] sm:$0xff] }
 0x193   : > { %1995 = vrot.lane.b32.xlu0 %v7921_v54, %s6968_s7  ;;  %v1135_v19 = vcombine.high %v7914_v3, %v7917_v44  ;;  %v1150_v5 = vcombine.low %v1117_v56, %v1133_v60  ;;  %v6497_v22 = vpack.i.bf16 %v1707_v34, %v1571_v63  ;;  %v7986_v36 = vrot.slane %v1675_v48, %v7529_v39  ;;  %v11105_v34 = vld [vmem:[#allocation20_spill] sm:$0xff] }
 0x194   : > { %v1095_v55 = vcombine.high %v7846_v33, %v7849_v11  ;;  %v1151_v26 = vcombine.high %v1117_v56, %v1133_v60  ;;  %v1086_v2 = vrot.slane %v1078_v49, %v7529_v39  ;;  %v1491_v62 = vcombine.high %v7678_v42, %v7690_v15  ;;  %v11102_v60 = vld [vmem:[#allocation24_spill] sm:$0xff]  ;;  %v11103_v56 = vld [vmem:[#allocation23_spill] sm:$0xff] }
 0x195   : > { %v7959_v28 = vrot.slane %v1135_v19, %v7529_v39  ;;  %v7989_v13 = vrot.slane %v1150_v5, %v7529_v39  ;;  %v1611_v47 = vcombine.high %v11099_v52, %v7714_v20  ;;  %v1641_v6 = vrot.slane %v1627_v35, %v7280_v51  ;;  %v11104_v15 = vld [vmem:[#allocation19_spill] sm:$0xff] }
 0x196   : > { %v1553_v30 = vrot.slane %v1539_v7, %v7529_v39  ;;  %v927_v19 = vcombine.high %v11101_v58, %v11100_v29  ;;  %v959_v48 = vcombine.high %v11103_v56, %v11102_v60  ;;  %v950_v42 = vrot.slane %v942_v43, %v7529_v39 }
 0x197   : > { %2035 = vrot.lane.b32.xlu0 %v7956_v17, %s6970_s10  ;;  %1815 = vrot.lane.b32.xlu1 %v7959_v28, %s6966_s16  ;;  %v895_v20 = vcombine.high %v11105_v34, %v11104_v15  ;;  %v1079_v49 = vcombine.high %v7936_v46, %v7911_v8  ;;  %v1708_v5 = vcombine.low %v7890_v18, %v7986_v36 }
 0x198   : > { %v918_v7 = vrot.slane %v910_v31, %v7529_v39  ;;  %v6502_v35 = vpack.i.bf16 %v1095_v55, %v959_v48  ;;  %v8016_v63 = vrot.slane %v1151_v26, %v7529_v39  ;;  %v1077_v52 = vrot.slane %v1063_v32, %v7529_v39 }
 0x199   : > { %v1489_v43 = vrot.slane %v1475_v27, %v7280_v51  ;;  %v1505_v29 = vrot.slane %v1491_v62, %v7280_v51  ;;  %v1625_v58 = vrot.slane %v1611_v47, %v7280_v51  ;;  %v1572_v8 = vcombine.low %v7979_v40, %v1553_v30 }
 0x19a   : > { %v943_v46 = vcombine.high %v7949_v41, %v7933_v1  ;;  %v962_v31 = vcombine.low %v918_v7, %v950_v42  ;;  %v941_v55 = vrot.slane %v927_v19, %v7529_v39  ;;  %v911_v27 = vcombine.high %v7966_v50, %v7946_v37 }
 0x19b   : > { %6498 = vrot.lane.b32.xlu0 %v6497_v22, %s6965_s15  ;;  %1855 = vrot.lane.b32.xlu1 %v7989_v13, %s6968_s7  ;;  %v1098_v22 = vcombine.low %v7897_v4, %v1086_v2  ;;  %v1691_v32 = vcombine.high %v1625_v58, %v1641_v6  ;;  %v6507_v26 = vpack.i.bf16 %v1708_v5, %v1572_v8 }
 0x19c   : > { %v909_v62 = vrot.slane %v895_v20, %v7529_v39  ;;  %v1096_v48 = vcombine.low %v7900_v59, %v1077_v52  ;;  %v1099_v1 = vcombine.high %v7897_v4, %v1086_v2  ;;  %v1093_v41 = vrot.slane %v1079_v49, %v7529_v39 }
 0x19d   : > { %v6532_v47 = vpack.i.bf16 %v1098_v22, %v962_v31  ;;  %v1457_v15 = vrot.slane %v1443_v53, %v7280_v51  ;;  %v1555_v19 = vcombine.high %v1489_v43, %v1505_v29  ;;  %v11106_v37 = vcombine.high %v7861_v38, %v7852_v23 }
 0x19e   : > { %v1659_v34 = vcombine.high %v7878_v45, %v7881_v61  ;;  %v960_v4 = vcombine.low %v909_v62, %v941_v55  ;;  %v963_v2 = vcombine.high %v918_v7, %v950_v42  ;;  %v957_v20 = vrot.slane %v943_v46, %v7529_v39 }
 0x19f   : > { %6503 = vrot.lane.b32.xlu0 %v6502_v35, %s6965_s15  ;;  %1895 = vrot.lane.b32.xlu1 %v8016_v63, %s6970_s10  ;;  %v1061_v50 = vrot.slane %v11106_v37, %v7529_v39  ;;  %v1523_v9 = vcombine.high %v1457_v15, %v7926_v57  ;;  %v1690_v0 = vcombine.low %v1625_v58, %v1641_v6 }
 0x1a0   : > { %v1709_v53 = vcombine.high %v7890_v18, %v7986_v36  ;;  %v1705_v23 = vrot.slane %v1691_v32, %v7529_v39  ;;  %v6512_v38 = vpack.i.bf16 %v1096_v48, %v960_v4  ;;  %v6542_v49 = vpack.i.bf16 %v1099_v1, %v963_v2 }
 0x1a1   : > { %v925_v5 = vrot.slane %v911_v27, %v7529_v39  ;;  %v1100_v35 = vcombine.low %v1061_v50, %v1093_v41  ;;  %v1554_v22 = vcombine.low %v1489_v43, %v1505_v29  ;;  %v1673_v8 = vrot.slane %v1659_v34, %v7529_v39 }
 0x1a2   : > { %v1658_v42 = vcombine.low %v7878_v45, %v7881_v61  ;;  %v1573_v6 = vcombine.high %v7979_v40, %v1553_v30  ;;  %v1569_v36 = vrot.slane %v1555_v19, %v7529_v39  ;;  %v1522_v7 = vcombine.low %v1457_v15, %v7926_v57 }
 0x1a3   : > { %6508 = vrot.lane.b32.xlu0 %v6507_v26, %s6966_s16  ;;  %6533 = vrot.lane.b32.xlu1 %v6532_v47, %s6968_s7  ;;  %v964_v18 = vcombine.low %v925_v5, %v957_v20  ;;  %v1537_v58 = vrot.slane %v1523_v9, %v7529_v39  ;;  %v1698_v43 = vrot.slane %v1690_v0, %v7529_v39  ;;  %v11107_v34 = vmov 0.0  }
 0x1a4   : > { %v6517_v29 = vpack.i.bf16 %v1709_v53, %v1573_v6  ;;  %v1097_v31 = vcombine.high %v7900_v59, %v1077_v52  ;;  %v1713_v45 = vcombine.high %v1673_v8, %v1705_v23  ;;  %v1666_v61 = vrot.slane %v1658_v42, %v7529_v39 }
 0x1a5   : > { %v6552_v46 = vpack.i.bf16 %v1100_v35, %v964_v18  ;;  %v961_v40 = vcombine.high %v909_v62, %v941_v55  ;;  %v1577_v30 = vcombine.high %v1537_v58, %v1569_v36  ;;  %v1562_v32 = vrot.slane %v1554_v22, %v7529_v39 }
 0x1a6   : > { %v1530_v57 = vrot.slane %v1522_v7, %v7529_v39  ;;  %v1710_v47 = vcombine.low %v1666_v61, %v1698_v43  ;;  %v1101_v48 = vcombine.high %v1061_v50, %v1093_v41  ;;  %v965_v52 = vcombine.high %v925_v5, %v957_v20 }
 0x1a7   : > { %6513 = vrot.lane.b32.xlu0 %v6512_v38, %s6966_s16  ;;  %6543 = vrot.lane.b32.xlu1 %v6542_v49, %s6969_s9  ;;  %v6522_v27 = vpack.i.bf16 %v1097_v31, %v961_v40  ;;  %v6557_v26 = vpack.i.bf16 %v1713_v45, %v1577_v30  ;;  %v1711_v19 = vcombine.high %v1666_v61, %v1698_v43  ;;  %v343_v38 = vld [vmem:[%s10877_s2] sm:$0xff]  ;;  %v11108_v45 = vld [vmem:[#allocation13_spill] sm:$0xff]  ;;  %v11109_v61 = vld [vmem:[#allocation12_spill] sm:$0xff] }
 0x1a8   : > { %v1574_v59 = vcombine.low %v1530_v57, %v1562_v32  ;;  %v6562_v15 = vpack.i.bf16 %v1101_v48, %v965_v52  ;;  %v1575_v55 = vcombine.high %v1530_v57, %v1562_v32  ;;  %v1746_v62 = vcombine.low %v7864_v14, %v7867_v24  ;;  %v11111_v32 = vld [vmem:[#allocation10_spill] sm:$0xff]  ;;  %v11112_v57 = vld [vmem:[#allocation11_spill] sm:$0xff] }
 0x1a9   : > { %v1167_v41 = vcombine.high %v7959_v28, %v11107_v34  ;;  %v1712_v50 = vcombine.low %v1673_v8, %v1705_v23  ;;  %v1576_v4 = vcombine.low %v1537_v58, %v1569_v36  ;;  %v1134_v2 = vcombine.low %v7914_v3, %v7917_v44 }
 0x1aa   : > { %v6527_v1 = vpack.i.bf16 %v1710_v47, %v1574_v59  ;;  %v6537_v37 = vpack.i.bf16 %v1711_v19, %v1575_v55  ;;  %v1168_v9 = vcombine.high %v7989_v13, %v11107_v34  ;;  %v8085_v0 = vrot.slane %v1746_v62, %v7529_v39 }
 0x1ab   : > { %6518 = vrot.lane.b32.xlu0 %v6517_v29, %s6967_s8  ;;  %6553 = vrot.lane.b32.xlu1 %v6552_v46, %s6970_s10  ;;  %v6547_v20 = vpack.i.bf16 %v1712_v50, %v1576_v4  ;;  %v1169_v24 = vcombine.high %v8016_v63, %v11107_v34  ;;  %v8094_v28 = vrot.slane %v1134_v2, %v7529_v39  ;;  %v6972_v13 = vmov 0   ;;  %v11114_v4 = vld [vmem:[#allocation14_spill] sm:$0xff]  ;;  %v11115_v2 = vld [vmem:[#allocation15_spill] sm:$0xff] }
 0x1ac   : > { %v1778_v14 = vcombine.high %v8085_v0, %v11107_v34  ;;  %v1779_v44 = vcombine.high %v7887_v16, %v11107_v34  ;;  %6567 = vset.pattern.permute.xlu0 %v6972_v13  ;;  %v1780_v63 = vcombine.high %v7921_v54, %v11107_v34  ;;  %v1781_v23 = vcombine.high %v7956_v17, %v11107_v34 }
 0x1ad   : > { %v1166_v3 = vcombine.high %v8094_v28, %v11107_v34  ;;  %v11110_v40 = vcombine.low %v11108_v45, %v11109_v61 }
 0x1af   : > { %6523 = vrot.lane.b32.xlu0 %v6522_v27, %s6967_s8  ;;  %6558 = vrot.lane.b32.xlu1 %v6557_v26, %s6971_s11  ;;  %v11113_v27 = vcombine.low %v11111_v32, %v11112_v57 }
 0x1b3   : > { %6528 = vrot.lane.b32.xlu0 %v6527_v1, %s6968_s7  ;;  %6563 = vrot.lane.b32.xlu1 %v6562_v15, %s6971_s11 }
 0x1b7   : > { %6538 = vrot.lane.b32.xlu0 %v6537_v37, %s6969_s9  ;;  %1835 = vrot.lane.b32.xlu1 %v1167_v41, %s6967_s8 }
 0x1bb   : > { %6548 = vrot.lane.b32.xlu0 %v6547_v20, %s6970_s10  ;;  %1875 = vrot.lane.b32.xlu1 %v1168_v9, %s6969_s9  ;;  %v11116_v20 = vcombine.low %v11114_v4, %v11115_v2 }
 0x1bd   : > { %v6429_v16 = vpop.permute.xlu0 %6428 }
 0x1be   : > { %v6431_v6 = vunpack.i.h.bf16 %v6429_v16  ;;  %v6430_v18 = vunpack.i.l.bf16 %v6429_v16 }
 0x1bf   : > { %1935 = vrot.lane.b32.xlu0 %v1778_v14, %s6965_s15  ;;  %1915 = vrot.lane.b32.xlu1 %v1169_v24, %s6971_s11  ;;  %v11117_v14 = vld [vmem:[#allocation17_spill] sm:$0xff]  ;;  %v11118_v24 = vld [vmem:[#allocation16_spill] sm:$0xff] }
 0x1c0   : > { %v2105_v30 = vsel %vm2062_vm5, %v11110_v40, %v6431_v6  ;;  %v2104_v26 = vsel %vm2062_vm5, %v11113_v27, %v6430_v18 }
 0x1c1   : > { %v6439_v35 = vpop.permute.xlu0 %6438 }
 0x1c2   : > { %v6441_v36 = vunpack.i.h.bf16 %v6439_v35  ;;  %v6440_v7 = vunpack.i.l.bf16 %v6439_v35 }
 0x1c3   : > { %1795 = vrot.lane.b32.xlu0 %v1166_v3, %s6965_s15  ;;  %v11119_v3 = vcombine.low %v11117_v14, %v11118_v24 }
 0x1c4   : > { %v2109_v59 = vsel %vm2068_vm6, %v2104_v26, %v6440_v7  ;;  %v2110_v52 = vsel %vm2068_vm6, %v2105_v30, %v6441_v36 }
 0x1c5   : > { %v6449_v54 = vpop.permute.xlu0 %6448 }
 0x1c6   : > { %v6451_v58 = vunpack.i.h.bf16 %v6449_v54  ;;  %v6450_v43 = vunpack.i.l.bf16 %v6449_v54 }
 0x1c7   : > { %1975 = vrot.lane.b32.xlu0 %v1779_v44, %s6967_s8 }
 0x1c8   : > { %v2114_v19 = vsel %vm2074_vm7, %v2109_v59, %v6450_v43  ;;  %v2115_v55 = vsel %vm2074_vm7, %v2110_v52, %v6451_v58 }
 0x1c9   : > { %v6459_v17 = vpop.permute.xlu0 %6458 }
 0x1ca   : > { %v6461_v46 = vunpack.i.h.bf16 %v6459_v17  ;;  %v6460_v31 = vunpack.i.l.bf16 %v6459_v17 }
 0x1cb   : > { %2015 = vrot.lane.b32.xlu0 %v1780_v63, %s6969_s9 }
 0x1cc   : > { %v2119_v41 = vsel %vm2080_vm8, %v2114_v19, %v6460_v31  ;;  %v2120_v50 = vsel %vm2080_vm8, %v2115_v55, %v6461_v46 }
 0x1cd   : > { %v6434_v53 = vpop.permute.xlu1 %6433 }
 0x1ce   : > { %v6436_v47 = vunpack.i.h.bf16 %v6434_v53  ;;  %v6435_v48 = vunpack.i.l.bf16 %v6434_v53 }
 0x1cf   : > { %2055 = vrot.lane.b32.xlu0 %v1781_v23, %s6971_s11 }
 0x1d0   : > { %v2063_v9 = vsel %vm2062_vm5, %v11116_v20, %v6435_v48  ;;  %v2064_v44 = vsel %vm2062_vm5, %v11119_v3, %v6436_v47 }
 0x1d1   : > { %v6444_v49 = vpop.permute.xlu1 %6443 }
 0x1d2   : > { %v6446_v1 = vunpack.i.h.bf16 %v6444_v49  ;;  %v6445_v15 = vunpack.i.l.bf16 %v6444_v49 }
 0x1d3   : > { %2141 = vperm.xlu0 %6567, %v343_v38  }
 0x1d4   : > { %v2069_v53 = vsel %vm2068_vm6, %v2063_v9, %v6445_v15  ;;  %v2070_v23 = vsel %vm2068_vm6, %v2064_v44, %v6446_v1 }
 0x1d5   : > { %v6454_v5 = vpop.permute.xlu1 %6453 }
 0x1d6   : > { %v6456_v38 = vunpack.i.h.bf16 %v6454_v5  ;;  %v6455_v16 = vunpack.i.l.bf16 %v6454_v5 }
 0x1d8   : > { %v2075_v46 = vsel %vm2074_vm7, %v2069_v53, %v6455_v16 }
 0x1d9   : > { %v8113_v22 = vpop.permute.xlu1 %6463 }
 0x1da   : > { %v6466_v49 = vunpack.i.h.bf16 %v8113_v22  ;;  %v6465_v35 = vunpack.i.l.bf16 %v8113_v22  ;;  %v2076_v22 = vsel %vm2074_vm7, %v2070_v23, %v6456_v38  ;;  %v11120_v38 = vcombine.low %v7846_v33, %v7849_v11 }
 0x1dc   : > { %v2081_v61 = vsel %vm2080_vm8, %v2075_v46, %v6465_v35 }
 0x1dd   : > { %v6469_v8 = vpop.permute.xlu1 %6468 }
 0x1de   : > { %v6471_v62 = vunpack.i.h.bf16 %v6469_v8  ;;  %v6470_v37 = vunpack.i.l.bf16 %v6469_v8 }
 0x1e0   : > { %v2124_v8 = vsel %vm2086_vm9, %v2119_v41, %v6470_v37  ;;  %v2125_v6 = vsel %vm2086_vm9, %v2120_v50, %v6471_v62 }
 0x1e1   : > { %v8115_v42 = vpop.permute.xlu1 %6473 }
 0x1e2   : > { %v6476_v18 = vunpack.i.h.bf16 %v8115_v42  ;;  %v6475_v17 = vunpack.i.l.bf16 %v8115_v42  ;;  %v2082_v42 = vsel %vm2080_vm8, %v2076_v22, %v6466_v49  ;;  %v11121_v49 = vcombine.low %v11103_v56, %v11102_v60 }
 0x1e4   : > { %v2087_v27 = vsel %vm2086_vm9, %v2081_v61, %v6475_v17  ;;  %v2088_v26 = vsel %vm2086_vm9, %v2082_v42, %v6476_v18 }
 0x1e5   : > { %v6479_v29 = vpop.permute.xlu1 %6478 }
 0x1e6   : > { %v6481_v13 = vunpack.i.h.bf16 %v6479_v29  ;;  %v6480_v63 = vunpack.i.l.bf16 %v6479_v29 }
 0x1e8   : > { %v2129_v29 = vsel %vm2092_vm10, %v2124_v8, %v6480_v63  ;;  %v2130_v5 = vsel %vm2092_vm10, %v2125_v6, %v6481_v13 }
 0x1e9   : > { %v6484_v34 = vpop.permute.xlu1 %6483 }
 0x1ea   : > { %v6486_v58 = vunpack.i.h.bf16 %v6484_v34  ;;  %v6485_v43 = vunpack.i.l.bf16 %v6484_v34 }
 0x1ec   : > { %v2093_v47 = vsel %vm2092_vm10, %v2087_v27, %v6485_v43  ;;  %v2094_v48 = vsel %vm2092_vm10, %v2088_v26, %v6486_v58 }
 0x1ed   : > { %v6489_v54 = vpop.permute.xlu1 %6488 }
 0x1ee   : > { %v6491_v36 = vunpack.i.h.bf16 %v6489_v54  ;;  %v6490_v7 = vunpack.i.l.bf16 %v6489_v54 }
 0x1f0   : > { %v2134_v31 = vsel %vm2098_vm11, %v2129_v29, %v6490_v7  ;;  %v2135_v45 = vsel %vm2098_vm11, %v2130_v5, %v6491_v36 }
 0x1f1   : > { %v6494_v40 = vpop.permute.xlu1 %6493  ;;  %v6341_v30 = vpack.c.bf16 %v2135_v45, %v2134_v31 }
 0x1f2   : > { %v6496_v32 = vunpack.i.h.bf16 %v6494_v40  ;;  %v6495_v57 = vunpack.i.l.bf16 %v6494_v40 }
 0x1f3   : > { %6342 = vmatprep.subr.bf16.mxu0 %v6341_v30 }
 0x1f4   : > { %v2099_v59 = vsel %vm2098_vm11, %v2093_v47, %v6495_v57  ;;  %v2100_v52 = vsel %vm2098_vm11, %v2094_v48, %v6496_v32 }
 0x1f5   : > { %v6343_v1 = vpack.c.bf16 %v2100_v52, %v2099_v59 }
 0x1f7   : > { %6344 = vmatpush1.bf16.msra.mxu0 %v6343_v1 }
 0x201   : > { %v8161_v15 = vpop.permute.xlu0 %1955 }
 0x205   : > { %v8163_v19 = vpop.permute.xlu0 %1995 }
 0x209   : > { %v8165_v55 = vpop.permute.xlu0 %2035  ;;  %v8167_v62 = vpop.permute.xlu1 %1815 }
 0x20d   : > { %v6499_v37 = vpop.permute.xlu0 %6498  ;;  %v8169_v34 = vpop.permute.xlu1 %1855 }
 0x20e   : > { %v6501_v45 = vunpack.i.h.bf16 %v6499_v37  ;;  %v6500_v61 = vunpack.i.l.bf16 %v6499_v37 }
 0x211   : > { %v6504_v41 = vpop.permute.xlu0 %6503  ;;  %v8171_v50 = vpop.permute.xlu1 %1895 }
 0x212   : > { %v6506_v3 = vunpack.i.h.bf16 %v6504_v41  ;;  %v6505_v44 = vunpack.i.l.bf16 %v6504_v41 }
 0x214   : > { %v2066_v16 = vsel %vm2062_vm5, %v11120_v38, %v6506_v3  ;;  %v2065_v35 = vsel %vm2062_vm5, %v11121_v49, %v6505_v44 }
 0x215   : > { %v6509_v4 = vpop.permute.xlu0 %6508  ;;  %v6534_v2 = vpop.permute.xlu1 %6533 }
 0x216   : > { %v6536_v6 = vunpack.i.h.bf16 %v6534_v2  ;;  %v6535_v18 = vunpack.i.l.bf16 %v6534_v2  ;;  %v6511_v30 = vunpack.i.h.bf16 %v6509_v4  ;;  %v6510_v32 = vunpack.i.l.bf16 %v6509_v4 }
 0x217   : > { %v11122_v2 = vcombine.low %v7761_v21, %v7764_v10  ;;  %v11123_v4 = vcombine.low %v7727_v12, %v7730_v25 }
 0x219   : > { %v6514_v20 = vpop.permute.xlu0 %6513  ;;  %v6544_v9 = vpop.permute.xlu1 %6543 }
 0x21a   : > { %v6516_v13 = vunpack.i.h.bf16 %v6514_v20  ;;  %v6515_v63 = vunpack.i.l.bf16 %v6514_v20  ;;  %v6546_v33 = vunpack.i.h.bf16 %v6544_v9  ;;  %v6545_v11 = vunpack.i.l.bf16 %v6544_v9 }
 0x21b   : > { %v2107_v20 = vsel %vm2062_vm5, %v11122_v2, %v6501_v45  ;;  %v2106_v9 = vsel %vm2062_vm5, %v11123_v4, %v6500_v61 }
 0x21c   : > { %v2071_v17 = vsel %vm2068_vm6, %v2065_v35, %v6515_v63  ;;  %v2072_v36 = vsel %vm2068_vm6, %v2066_v16, %v6516_v13  ;;  %v2111_v3 = vsel %vm2068_vm6, %v2106_v9, %v6510_v32  ;;  %v2112_v44 = vsel %vm2068_vm6, %v2107_v20, %v6511_v30 }
 0x21d   : > { %v6519_v14 = vpop.permute.xlu0 %6518  ;;  %v6554_v24 = vpop.permute.xlu1 %6553 }
 0x21e   : > { %v6556_v5 = vunpack.i.h.bf16 %v6554_v24  ;;  %v6555_v46 = vunpack.i.l.bf16 %v6554_v24  ;;  %v6521_v26 = vunpack.i.h.bf16 %v6519_v14  ;;  %v6520_v47 = vunpack.i.l.bf16 %v6519_v14 }
 0x220   : > { %v2116_v13 = vsel %vm2074_vm7, %v2111_v3, %v6520_v47  ;;  %v2117_v63 = vsel %vm2074_vm7, %v2112_v44, %v6521_v26 }
 0x221   : > { %v6524_v53 = vpop.permute.xlu0 %6523  ;;  %v6559_v23 = vpop.permute.xlu1 %6558 }
 0x222   : > { %v6526_v54 = vunpack.i.h.bf16 %v6524_v53  ;;  %v6525_v8 = vunpack.i.l.bf16 %v6524_v53  ;;  %v6561_v12 = vunpack.i.h.bf16 %v6559_v23  ;;  %v6560_v25 = vunpack.i.l.bf16 %v6559_v23 }
 0x224   : > { %v2077_v7 = vsel %vm2074_vm7, %v2071_v17, %v6525_v8  ;;  %v2078_v58 = vsel %vm2074_vm7, %v2072_v36, %v6526_v54 }
 0x225   : > { %v2083_v43 = vsel %vm2080_vm8, %v2077_v7, %v6535_v18  ;;  %v2084_v60 = vsel %vm2080_vm8, %v2078_v58, %v6536_v6  ;;  %v6529_v56 = vpop.permute.xlu0 %6528  ;;  %v6564_v29 = vpop.permute.xlu1 %6563 }
 0x226   : > { %v6566_v22 = vunpack.i.h.bf16 %v6564_v29  ;;  %v6565_v31 = vunpack.i.l.bf16 %v6564_v29  ;;  %v2089_v42 = vsel %vm2086_vm9, %v2083_v43, %v6545_v11  ;;  %v2090_v40 = vsel %vm2086_vm9, %v2084_v60, %v6546_v33 }
 0x227   : > { %v2095_v57 = vsel %vm2092_vm10, %v2089_v42, %v6555_v46  ;;  %v2096_v27 = vsel %vm2092_vm10, %v2090_v40, %v6556_v5  ;;  %v6531_v1 = vunpack.i.h.bf16 %v6529_v56  ;;  %v6530_v41 = vunpack.i.l.bf16 %v6529_v56 }
 0x228   : > { %v2101_v59 = vsel %vm2098_vm11, %v2095_v57, %v6565_v31  ;;  %v2102_v52 = vsel %vm2098_vm11, %v2096_v27, %v6566_v22 }
 0x229   : > { %v6539_v48 = vpop.permute.xlu0 %6538  ;;  %v6347_v37 = vpack.c.bf16 %v2102_v52, %v2101_v59  ;;  %v2121_v21 = vsel %vm2080_vm8, %v2116_v13, %v6530_v41  ;;  %v2122_v10 = vsel %vm2080_vm8, %v2117_v63, %v6531_v1  ;;  %v1836_v58 = vpop.permute.xlu1 %1835 }
 0x22a   : > { %v6541_v24 = vunpack.i.h.bf16 %v6539_v48  ;;  %v6540_v14 = vunpack.i.l.bf16 %v6539_v48 }
 0x22c   : > { %v2126_v49 = vsel %vm2086_vm9, %v2121_v21, %v6540_v14  ;;  %v2127_v35 = vsel %vm2086_vm9, %v2122_v10, %v6541_v24 }
 0x22d   : > { %v6549_v53 = vpop.permute.xlu0 %6548  ;;  %v1876_v46 = vpop.permute.xlu1 %1875 }
 0x22e   : > { %v6551_v38 = vunpack.i.h.bf16 %v6549_v53  ;;  %v6550_v16 = vunpack.i.l.bf16 %v6549_v53 }
 0x230   : > { %v2131_v54 = vsel %vm2092_vm10, %v2126_v49, %v6550_v16  ;;  %v2132_v8 = vsel %vm2092_vm10, %v2127_v35, %v6551_v38 }
 0x231   : > { %v1936_v6 = vpop.permute.xlu0 %1935  ;;  %v2136_v18 = vsel %vm2098_vm11, %v2131_v54, %v6560_v25  ;;  %v2137_v17 = vsel %vm2098_vm11, %v2132_v8, %v6561_v12 }
 0x232   : > { %v6345_v36 = vpack.c.bf16 %v2137_v17, %v2136_v18  ;;  %v2108_v23 = vsel %vm2062_vm5, %v8085_v0, %v1936_v6 }
 0x233   : > { %v2113_v60 = vsel %vm2068_vm6, %v2108_v23, %v8161_v15 }
 0x234   : > { %6346 = vmatprep.subr.bf16.mxu0 %v6345_v36 }
 0x235   : > { %v1796_v7 = vpop.permute.xlu0 %1795  ;;  %6348 = vmatpush1.bf16.msra.mxu0 %v6347_v37 }
 0x236   : > { %v2067_v33 = vsel %vm2062_vm5, %v8094_v28, %v1796_v7 }
 0x237   : > { %v2073_v11 = vsel %vm2068_vm6, %v2067_v33, %v8167_v62 }
 0x238   : > { %v2079_v43 = vsel %vm2074_vm7, %v2073_v11, %v1836_v58 }
 0x239   : > { %v1976_v56 = vpop.permute.xlu0 %1975  ;;  %v2085_v29 = vsel %vm2080_vm8, %v2079_v43, %v8169_v34  ;;  %v1916_v34 = vpop.permute.xlu1 %1915 }
 0x23a   : > { %v2118_v5 = vsel %vm2074_vm7, %v2113_v60, %v1976_v56  ;;  %v2091_v28 = vsel %vm2086_vm9, %v2085_v29, %v1876_v46 }
 0x23b   : > { %v2123_v0 = vsel %vm2080_vm8, %v2118_v5, %v8163_v19  ;;  %v2097_v31 = vsel %vm2092_vm10, %v2091_v28, %v8171_v50  ;;  %v342_v19 = vld [vmem:[%s10876_s1] sm:$0xff] }
 0x23c   : > { %v2103_v42 = vsel %vm2098_vm11, %v2097_v31, %v1916_v34 }
 0x23d   : > { %v2016_v22 = vpop.permute.xlu0 %2015 }
 0x23e   : > { %v2128_v62 = vsel %vm2086_vm9, %v2123_v0, %v2016_v22 }
 0x23f   : > { %v2133_v15 = vsel %vm2092_vm10, %v2128_v62, %v8165_v55 }
 0x241   : > { %v2056_v45 = vpop.permute.xlu0 %2055 }
 0x242   : > { %v2138_v61 = vsel %vm2098_vm11, %v2133_v15, %v2056_v45 }
 0x243   : > { %6330 = vmatprep.subr.msk.mxu0 %vm2148_vm12, %v2138_v61 }
 0x244   : > { %6331 = vmatpush1.msk.msra.mxu0 %vm2148_vm12, %v2103_v42 }
 0x245   : > { %6332 = vmatmul.mubr.msk.f32.vlgmr.msra.gmra.mrb[0].mxu0 %vm2144_vm13, %v342_v19 }
 0x252   : > { %v2142_v40 = vpop.permute.xlu0 %2141 }
 0x318   : > { %v2221_v30 = vpop.f32.mrb[0].mxu0 }
 0x319   : > { %v2222_v50 = vadd.f32 %v2221_v30, %v2142_v40  ;;  %v2223_v32 = vpop.f32.mrb[1].mxu0 }
 0x31a   : > { %v2224_v55 = vadd.f32 %v2223_v32, %v2142_v40 }
 0x31b   : > { %v2226_v57 = vmax.f32 %v2222_v50, 0.0 }
 0x31c   : > { %v8244_v27 = vmax.f32 %v2224_v55, 0.0 }
 0x31d   : > { %2235 = vrot.lane.b32.xlu0 %v2226_v57, %s6969_s9  ;;  %2229 = vrot.lane.b32.xlu1 %v2226_v57, %s6971_s11 }
 0x321   : > { %2241 = vrot.lane.b32.xlu0 %v2226_v57, %s6967_s8  ;;  %2232 = vrot.lane.b32.xlu1 %v2226_v57, %s6970_s10 }
 0x325   : > { %2247 = vrot.lane.b32.xlu0 %v2226_v57, %s6965_s15  ;;  %2238 = vrot.lane.b32.xlu1 %v2226_v57, %s6968_s7 }
 0x329   : > { %2254 = vrot.lane.b32.xlu0 %v8244_v27, %s6970_s10  ;;  %2244 = vrot.lane.b32.xlu1 %v2226_v57, %s6966_s16 }
 0x32d   : > { %2260 = vrot.lane.b32.xlu0 %v8244_v27, %s6968_s7  ;;  %2251 = vrot.lane.b32.xlu1 %v8244_v27, %s6971_s11 }
 0x331   : > { %2266 = vrot.lane.b32.xlu0 %v8244_v27, %s6966_s16  ;;  %2257 = vrot.lane.b32.xlu1 %v8244_v27, %s6969_s9 }
 0x335   : > { %2263 = vrot.lane.b32.xlu1 %v8244_v27, %s6967_s8 }
 0x339   : > { %2269 = vrot.lane.b32.xlu1 %v8244_v27, %s6965_s15 }
 0x38f   : > { %v2236_v26 = vpop.permute.xlu0 %2235  ;;  %v2230_v47 = vpop.permute.xlu1 %2229 }
 0x390   : > { %v2288_v37 = vcombine.low %v2230_v47, %v2236_v26  ;;  %v2289_v7 = vcombine.high %v2230_v47, %v2236_v26 }
 0x392   : > { %v2296_v14 = vrot.slane %v2288_v37, %v7280_v51  ;;  %v2303_v22 = vrot.slane %v2289_v7, %v7280_v51 }
 0x393   : > { %v2242_v48 = vpop.permute.xlu0 %2241  ;;  %v2233_v59 = vpop.permute.xlu1 %2232 }
 0x394   : > { %v2272_v52 = vcombine.low %v2226_v57, %v2233_v59  ;;  %v2273_v54 = vcombine.high %v2226_v57, %v2233_v59 }
 0x396   : > { %v2280_v20 = vrot.slane %v2272_v52, %v7280_v51  ;;  %v2287_v60 = vrot.slane %v2273_v54, %v7280_v51 }
 0x397   : > { %v2248_v1 = vpop.permute.xlu0 %2247  ;;  %v2239_v41 = vpop.permute.xlu1 %2238 }
 0x398   : > { %v2320_v2 = vcombine.low %v2242_v48, %v2248_v1  ;;  %v2336_v13 = vcombine.low %v2280_v20, %v2296_v14  ;;  %v2337_v8 = vcombine.high %v2280_v20, %v2296_v14  ;;  %v2321_v6 = vcombine.high %v2242_v48, %v2248_v1 }
 0x399   : > { %v2352_v34 = vcombine.low %v2287_v60, %v2303_v22  ;;  %v2353_v1 = vcombine.high %v2287_v60, %v2303_v22 }
 0x39a   : > { %v2328_v3 = vrot.slane %v2320_v2, %v7280_v51  ;;  %v2344_v16 = vrot.slane %v2336_v13, %v7529_v39  ;;  %v2335_v56 = vrot.slane %v2321_v6, %v7280_v51  ;;  %v2351_v5 = vrot.slane %v2337_v8, %v7529_v39 }
 0x39b   : > { %v8262_v4 = vpop.permute.xlu0 %2254  ;;  %v2245_v9 = vpop.permute.xlu1 %2244  ;;  %v2360_v50 = vrot.slane %v2352_v34, %v7529_v39 }
 0x39c   : > { %v2304_v24 = vcombine.low %v2239_v41, %v2245_v9  ;;  %v2305_v12 = vcombine.high %v2239_v41, %v2245_v9  ;;  %v2408_v36 = vcombine.low %v8244_v27, %v8262_v4  ;;  %v2409_v41 = vcombine.high %v8244_v27, %v8262_v4 }
 0x39d   : > { %v2367_v27 = vrot.slane %v2353_v1, %v7529_v39 }
 0x39e   : > { %v2312_v44 = vrot.slane %v2304_v24, %v7280_v51  ;;  %v2319_v58 = vrot.slane %v2305_v12, %v7280_v51  ;;  %v2416_v46 = vrot.slane %v2408_v36, %v7280_v51  ;;  %v2423_v4 = vrot.slane %v2409_v41, %v7280_v51 }
 0x39f   : > { %v8267_v63 = vpop.permute.xlu1 %2251  ;;  %v2261_v21 = vpop.permute.xlu0 %2260 }
 0x3a0   : > { %v2368_v53 = vcombine.low %v2312_v44, %v2328_v3  ;;  %v2369_v25 = vcombine.high %v2312_v44, %v2328_v3  ;;  %v2384_v28 = vcombine.low %v2319_v58, %v2335_v56  ;;  %v2385_v26 = vcombine.high %v2319_v58, %v2335_v56 }
 0x3a2   : > { %v2376_v10 = vrot.slane %v2368_v53, %v7529_v39  ;;  %v2383_v33 = vrot.slane %v2369_v25, %v7529_v39  ;;  %v2392_v42 = vrot.slane %v2384_v28, %v7529_v39  ;;  %v2399_v24 = vrot.slane %v2385_v26, %v7529_v39 }
 0x3a3   : > { %v2258_v38 = vpop.permute.xlu1 %2257  ;;  %v2267_v18 = vpop.permute.xlu0 %2266 }
 0x3a4   : > { %v2400_v49 = vcombine.low %v2344_v16, %v2376_v10  ;;  %v2424_v35 = vcombine.low %v8267_v63, %v2258_v38  ;;  %v2401_v23 = vcombine.high %v2344_v16, %v2376_v10  ;;  %v2440_v11 = vcombine.low %v2261_v21, %v2267_v18 }
 0x3a5   : > { %v2402_v62 = vcombine.low %v2351_v5, %v2383_v33  ;;  %v2403_v19 = vcombine.high %v2351_v5, %v2383_v33  ;;  %v2404_v47 = vcombine.low %v2360_v50, %v2392_v42  ;;  %v2441_v48 = vcombine.high %v2261_v21, %v2267_v18 }
 0x3a6   : > { %2560 = vrot.lane.b32.xlu0 %v2400_v49, %s6960_s29  ;;  %v2432_v43 = vrot.slane %v2424_v35, %v7280_v51  ;;  %v2448_v31 = vrot.slane %v2440_v11, %v7280_v51  ;;  %v2425_v59 = vcombine.high %v8267_v63, %v2258_v38  ;;  %v2405_v9 = vcombine.high %v2360_v50, %v2392_v42 }
 0x3a7   : > { %v2264_v17 = vpop.permute.xlu1 %2263  ;;  %v2455_v14 = vrot.slane %v2441_v48, %v7280_v51  ;;  %v2406_v53 = vcombine.low %v2367_v27, %v2399_v24  ;;  %v2407_v16 = vcombine.high %v2367_v27, %v2399_v24 }
 0x3a8   : > { %v2472_v15 = vcombine.low %v2416_v46, %v2432_v43  ;;  %v2473_v52 = vcombine.high %v2416_v46, %v2432_v43  ;;  %v2439_v3 = vrot.slane %v2425_v59, %v7280_v51 }
 0x3aa   : > { %2564 = vrot.lane.b32.xlu0 %v2401_v23, %s6960_s29  ;;  %v2480_v40 = vrot.slane %v2472_v15, %v7529_v39  ;;  %v2487_v44 = vrot.slane %v2473_v52, %v7529_v39  ;;  %v2488_v21 = vcombine.low %v2423_v4, %v2439_v3  ;;  %v2489_v35 = vcombine.high %v2423_v4, %v2439_v3 }
 0x3ab   : > { %v2270_v29 = vpop.permute.xlu1 %2269 }
 0x3ac   : > { %v2456_v0 = vcombine.low %v2264_v17, %v2270_v29  ;;  %v2457_v32 = vcombine.high %v2264_v17, %v2270_v29  ;;  %v2496_v12 = vrot.slane %v2488_v21, %v7529_v39  ;;  %v2503_v6 = vrot.slane %v2489_v35, %v7529_v39 }
 0x3ae   : > { %v2464_v45 = vrot.slane %v2456_v0, %v7280_v51  ;;  %2568 = vrot.lane.b32.xlu0 %v2402_v62, %s6960_s29  ;;  %v2471_v37 = vrot.slane %v2457_v32, %v7280_v51 }
 0x3b0   : > { %v2504_v61 = vcombine.low %v2448_v31, %v2464_v45  ;;  %v2505_v57 = vcombine.high %v2448_v31, %v2464_v45  ;;  %v2520_v13 = vcombine.low %v2455_v14, %v2471_v37  ;;  %v2521_v25 = vcombine.high %v2455_v14, %v2471_v37 }
 0x3b2   : > { %v2512_v30 = vrot.slane %v2504_v61, %v7529_v39  ;;  %2572 = vrot.lane.b32.xlu0 %v2403_v19, %s6960_s29  ;;  %v2519_v20 = vrot.slane %v2505_v57, %v7529_v39  ;;  %v2528_v38 = vrot.slane %v2520_v13, %v7529_v39  ;;  %v2535_v8 = vrot.slane %v2521_v25, %v7529_v39 }
 0x3b4   : > { %v2536_v55 = vcombine.low %v2480_v40, %v2512_v30  ;;  %v2537_v2 = vcombine.high %v2480_v40, %v2512_v30  ;;  %v2538_v63 = vcombine.low %v2487_v44, %v2519_v20  ;;  %v2539_v10 = vcombine.high %v2487_v44, %v2519_v20 }
 0x3b5   : > { %v2540_v49 = vcombine.low %v2496_v12, %v2528_v38  ;;  %v2541_v54 = vcombine.high %v2496_v12, %v2528_v38  ;;  %v2542_v18 = vcombine.low %v2503_v6, %v2535_v8  ;;  %v2543_v17 = vcombine.high %v2503_v6, %v2535_v8 }
 0x3b6   : > { %2562 = vrot.lane.b32.xlu1 %v2536_v55, %s6960_s29  ;;  %2576 = vrot.lane.b32.xlu0 %v2404_v47, %s6960_s29 }
 0x3ba   : > { %2566 = vrot.lane.b32.xlu1 %v2537_v2, %s6960_s29  ;;  %2580 = vrot.lane.b32.xlu0 %v2405_v9, %s6960_s29 }
 0x3be   : > { %2570 = vrot.lane.b32.xlu1 %v2538_v63, %s6960_s29  ;;  %2584 = vrot.lane.b32.xlu0 %v2406_v53, %s6960_s29 }
 0x3c2   : > { %2574 = vrot.lane.b32.xlu1 %v2539_v10, %s6960_s29  ;;  %2588 = vrot.lane.b32.xlu0 %v2407_v16, %s6960_s29 }
 0x3c6   : > { %2578 = vrot.lane.b32.xlu1 %v2540_v49, %s6960_s29 }
 0x3ca   : > { %2582 = vrot.lane.b32.xlu1 %v2541_v54, %s6960_s29 }
 0x3ce   : > { %2586 = vrot.lane.b32.xlu1 %v2542_v18, %s6960_s29 }
 0x3d2   : > { %2590 = vrot.lane.b32.xlu1 %v2543_v17, %s6960_s29 }
 0x418   : > { %v2561_v36 = vpop.permute.xlu0 %2560 }
 0x419   : > { %2608 = vst.msk [vmem:[#allocation3 + $0x1] sm:$0xff] %vm321_vm2, %v2561_v36 }
 0x41c   : > { %v2565_v7 = vpop.permute.xlu0 %2564 }
 0x41d   : > { %2610 = vst.msk [vmem:[#allocation3 + $0x19] sm:$0xff] %vm321_vm2, %v2565_v7 }
 0x420   : > { %v2569_v58 = vpop.permute.xlu0 %2568  ;;  %v8321_v23 = vld [vmem:[#allocation3] sm:$0xff] }
 0x421   : > { %2612 = vst.msk [vmem:[#allocation3 + $0x31] sm:$0xff] %vm321_vm2, %v2569_v58  ;;  %2666 = vrot.lane.b32.xlu0 %v8321_v23, %s6962_s12  ;;  %v2922_v30 = vrot.slane %v8321_v23, 2 }
 0x424   : > { %v2573_v33 = vpop.permute.xlu0 %2572  ;;  %v8326_v11 = vld [vmem:[#allocation3 + $0x18] sm:$0xff] }
 0x425   : > { %2614 = vst.msk [vmem:[#allocation3 + $0x49] sm:$0xff] %vm321_vm2, %v2573_v33  ;;  %2670 = vrot.lane.b32.xlu0 %v8326_v11, %s6962_s12  ;;  %v2927_v37 = vrot.slane %v8326_v11, 2 }
 0x428   : > { %v2563_v43 = vpop.permute.xlu1 %2562  ;;  %v2577_v60 = vpop.permute.xlu0 %2576  ;;  %v8332_v56 = vld [vmem:[#allocation3 + $0x30] sm:$0xff] }
 0x429   : > { %2609 = vst.msk [vmem:[#allocation3 + $0x9] sm:$0xff] %vm321_vm2, %v2563_v43  ;;  %2616 = vst.msk [vmem:[#allocation3 + $0x61] sm:$0xff] %vm321_vm2, %v2577_v60  ;;  %2674 = vrot.lane.b32.xlu0 %v8332_v56, %s6962_s12  ;;  %v3074_v29 = vcombine.low %v8321_v23, %v8332_v56  ;;  %v3075_v5 = vcombine.high %v8321_v23, %v8332_v56  ;;  %v2932_v3 = vrot.slane %v8332_v56, 2 }
 0x42b   : > { %v8354_v45 = vrot.slane %v3074_v29, %v7280_v51  ;;  %v8377_v57 = vrot.slane %v3075_v5, %v7280_v51 }
 0x42c   : > { %v2567_v46 = vpop.permute.xlu1 %2566  ;;  %v2581_v0 = vpop.permute.xlu0 %2580  ;;  %v8342_v22 = vld [vmem:[#allocation3 + $0x48] sm:$0xff] }
 0x42d   : > { %2611 = vst.msk [vmem:[#allocation3 + $0x21] sm:$0xff] %vm321_vm2, %v2567_v46  ;;  %2618 = vst.msk [vmem:[#allocation3 + $0x79] sm:$0xff] %vm321_vm2, %v2581_v0  ;;  %2678 = vrot.lane.b32.xlu0 %v8342_v22, %s6962_s12  ;;  %v3090_v28 = vcombine.low %v8326_v11, %v8342_v22  ;;  %v3091_v62 = vcombine.high %v8326_v11, %v8342_v22  ;;  %v2937_v7 = vrot.slane %v8342_v22, 2 }
 0x42f   : > { %v8357_v34 = vrot.slane %v3090_v28, %v7280_v51  ;;  %v8360_v61 = vrot.slane %v3091_v62, %v7280_v51 }
 0x430   : > { %v2571_v31 = vpop.permute.xlu1 %2570  ;;  %v8351_v15 = vld [vmem:[#allocation3 + $0x8] sm:$0xff]  ;;  %v2585_v19 = vpop.permute.xlu0 %2584  ;;  %v8363_v42 = vld [vmem:[#allocation3 + $0x60] sm:$0xff]  ;;  %v2626_v28 = vld [vmem:[#allocation3 + $0x10] sm:$0x3] }
 0x431   : > { %2613 = vst.msk [vmem:[#allocation3 + $0x39] sm:$0xff] %vm321_vm2, %v2571_v31  ;;  %2668 = vrot.lane.b32.xlu1 %v8351_v15, %s6962_s12  ;;  %v2923_v40 = vrot.slane %v8351_v15, 2  ;;  %2620 = vst.msk [vmem:[#allocation3 + $0x91] sm:$0xff] %vm321_vm2, %v2585_v19  ;;  %2682 = vrot.lane.b32.xlu0 %v8363_v42, %s6962_s12  ;;  %v3138_v50 = vcombine.low %v8354_v45, %v8357_v34  ;;  %v3139_v32 = vcombine.high %v8354_v45, %v8357_v34 }
 0x432   : > { %v3154_v48 = vcombine.low %v8377_v57, %v8360_v61  ;;  %v3155_v59 = vcombine.high %v8377_v57, %v8360_v61  ;;  %v2942_v49 = vrot.slane %v8363_v42, 2 }
 0x433   : > { %v8382_v55 = vsel %vm481_vm4, %v2922_v30, %v2923_v40 }
 0x434   : > { %v2575_v26 = vpop.permute.xlu1 %2574  ;;  %v8384_v47 = vld [vmem:[#allocation3 + $0x20] sm:$0xff]  ;;  %v2589_v52 = vpop.permute.xlu0 %2588  ;;  %v8391_v1 = vld [vmem:[#allocation3 + $0x78] sm:$0xff]  ;;  %v8573_v45 = vrot.slane %v3154_v48, %v7529_v39  ;;  %v8579_v34 = vrot.slane %v3155_v59, %v7529_v39 }
 0x435   : > { %2615 = vst.msk [vmem:[#allocation3 + $0x51] sm:$0xff] %vm321_vm2, %v2575_v26  ;;  %2672 = vrot.lane.b32.xlu1 %v8384_v47, %s6962_s12  ;;  %v2928_v41 = vrot.slane %v8384_v47, 2  ;;  %2622 = vst.msk [vmem:[#allocation3 + $0xa9] sm:$0xff] %vm321_vm2, %v2589_v52  ;;  %2686 = vrot.lane.b32.xlu0 %v8391_v1, %s6962_s12  ;;  %v2947_v58 = vrot.slane %v8391_v1, 2  ;;  %v2771_v26 = vrot.slane %v8351_v15, 1 }
 0x436   : > { %11130 = vst [vmem:[#allocation20_spill] sm:$0xff] %v8573_v45  ;;  %11131 = vst [vmem:[#allocation13_spill] sm:$0xff] %v8579_v34 }
 0x437   : > { %v8403_v2 = vsel %vm481_vm4, %v2927_v37, %v2928_v41  ;;  %v2773_v37 = vrot.slane %v2626_v28, 1 }
 0x438   : > { %v2579_v20 = vpop.permute.xlu1 %2578  ;;  %v8405_v9 = vld [vmem:[#allocation3 + $0x38] sm:$0xff]  ;;  %v8408_v24 = vld [vmem:[#allocation3 + $0x90] sm:$0xff]  ;;  %v2632_v19 = vld [vmem:[#allocation3 + $0x40] sm:$0x3] }
 0x439   : > { %2617 = vst.msk [vmem:[#allocation3 + $0x69] sm:$0xff] %vm321_vm2, %v2579_v20  ;;  %2676 = vrot.lane.b32.xlu1 %v8405_v9, %s6962_s12  ;;  %v2933_v14 = vrot.slane %v8405_v9, 2  ;;  %2690 = vrot.lane.b32.xlu0 %v8408_v24, %s6962_s12  ;;  %v2781_v52 = vrot.slane %v8405_v9, 1  ;;  %v2952_v20 = vrot.slane %v8408_v24, 2  ;;  %v2935_v31 = vrot.slane %v2632_v19, 2 }
 0x43a   : > { %v2800_v61 = vrot.slane %v8408_v24, 1 }
 0x43b   : > { %v8423_v4 = vsel %vm481_vm4, %v2932_v3, %v2933_v14  ;;  %v2770_v3 = vrot.slane %v8321_v23, 1 }
 0x43c   : > { %v2583_v13 = vpop.permute.xlu1 %2582  ;;  %v8425_v63 = vld [vmem:[#allocation3 + $0x50] sm:$0xff]  ;;  %v8428_v53 = vld [vmem:[#allocation3 + $0xa8] sm:$0xff] }
 0x43d   : > { %2619 = vst.msk [vmem:[#allocation3 + $0x81] sm:$0xff] %vm321_vm2, %v2583_v13  ;;  %2680 = vrot.lane.b32.xlu1 %v8425_v63, %s6962_s12  ;;  %2694 = vrot.lane.b32.xlu0 %v8428_v53, %s6962_s12  ;;  %v10903_v8 = vrot.slane %v8425_v63, 2  ;;  %v2629_v13 = vld [vmem:[#allocation3 + $0x28] sm:$0x3]  ;;  %v2957_v59 = vrot.slane %v8428_v53, 2 }
 0x43f   : > { %v8476_v60 = vsel %vm481_vm4, %v2937_v7, %v10903_v8  ;;  %v2786_v7 = vrot.slane %v8425_v63, 1 }
 0x440   : > { %v2587_v21 = vpop.permute.xlu1 %2586  ;;  %v8434_v10 = vld [vmem:[#allocation3 + $0x68] sm:$0xff]  ;;  %v8443_v12 = vld [vmem:[#allocation3 + $0x70] sm:$0x3]  ;;  %11124 = vst [vmem:[#allocation18_spill] sm:$0xff] %v8476_v60 }
 0x441   : > { %2621 = vst.msk [vmem:[#allocation3 + $0x99] sm:$0xff] %vm321_vm2, %v2587_v21  ;;  %2684 = vrot.lane.b32.xlu1 %v8434_v10, %s6962_s12  ;;  %2714 = vrot.lane.b32.xlu0 %v8321_v23, %s6963_s14  ;;  %v10901_v25 = vrot.slane %v8434_v10, 2  ;;  %v2791_v35 = vrot.slane %v8434_v10, 1  ;;  %v2793_v54 = vrot.slane %v8443_v12, 1  ;;  %v2783_v21 = vrot.slane %v2632_v19, 1 }
 0x442   : > { %v8521_v23 = vsel %vm404_vm3, %v2770_v3, %v2771_v26  ;;  %v2930_v3 = vrot.slane %v2629_v13, 2  ;;  %v8544_v19 = vrot.slane %v3138_v50, %v7529_v39 }
 0x443   : > { %v8462_v17 = vsel %vm481_vm4, %v2942_v49, %v10901_v25  ;;  %v8491_v46 = vsel %vm404_vm3, %v2791_v35, %v2793_v54  ;;  %v2775_v49 = vrot.slane %v8326_v11, 1  ;;  %v2780_v54 = vrot.slane %v8332_v56, 1  ;;  %11126 = vst [vmem:[#allocation21_spill] sm:$0xff] %v8521_v23 }
 0x444   : > { %v2591_v38 = vpop.permute.xlu1 %2590  ;;  %v8441_v16 = vld [vmem:[#allocation3 + $0x80] sm:$0xff]  ;;  %v2778_v25 = vrot.slane %v2629_v13, 1  ;;  %11128 = vst [vmem:[#allocation23_spill] sm:$0xff] %v8544_v19  ;;  %v8598_v57 = vsel %vm481_vm4, %v2928_v41, %v2930_v3 }
 0x445   : > { %2623 = vst.msk [vmem:[#allocation3 + $0xb1] sm:$0xff] %vm321_vm2, %v2591_v38  ;;  %2688 = vrot.lane.b32.xlu1 %v8441_v16, %s6962_s12  ;;  %2718 = vrot.lane.b32.xlu0 %v8326_v11, %s6963_s14  ;;  %v10902_v36 = vrot.slane %v8441_v16, 2  ;;  %v2925_v38 = vrot.slane %v2626_v28, 2  ;;  %v2790_v28 = vrot.slane %v8363_v42, 1  ;;  %v2635_v11 = vld [vmem:[#allocation3 + $0x58] sm:$0x3]  ;;  %v8527_v62 = vsel %vm404_vm3, %v2780_v54, %v2781_v52 }
 0x446   : > { %v3482_v50 = vcombine.low %v8521_v23, %v8527_v62  ;;  %v2796_v3 = vrot.slane %v8441_v16, 1  ;;  %v2940_v8 = vrot.slane %v2635_v11, 2 }
 0x447   : > { %v8481_v29 = vsel %vm481_vm4, %v2947_v58, %v10902_v36  ;;  %v8533_v36 = vsel %vm404_vm3, %v2781_v52, %v2783_v21  ;;  %v2795_v52 = vrot.slane %v8391_v1, 1  ;;  %v8567_v21 = vsel %vm481_vm4, %v2933_v14, %v2935_v31  ;;  %v8589_v31 = vld [vmem:[#allocation3 + $0x88] sm:$0x3] }
 0x448   : > { %v8455_v6 = vld [vmem:[#allocation3 + $0x98] sm:$0xff]  ;;  %v8457_v18 = vld [vmem:[#allocation3 + $0xa0] sm:$0x3]  ;;  %11125 = vst [vmem:[#allocation22_spill] sm:$0xff] %v8481_v29  ;;  %11127 = vst [vmem:[#allocation24_spill] sm:$0xff] %v8533_v36  ;;  %v8613_v41 = vrot.slane %v3482_v50, %v7280_v51  ;;  %v2798_v27 = vrot.slane %v8589_v31, 1 }
 0x449   : > { %2692 = vrot.lane.b32.xlu1 %v8455_v6, %s6962_s12  ;;  %v2801_v33 = vrot.slane %v8455_v6, 1  ;;  %v2803_v43 = vrot.slane %v8457_v18, 1  ;;  %2722 = vrot.lane.b32.xlu0 %v8332_v56, %s6963_s14  ;;  %v10904_v30 = vrot.slane %v8455_v6, 2  ;;  %v2776_v56 = vrot.slane %v8384_v47, 1 }
 0x44a   : > { %v2955_v44 = vrot.slane %v8457_v18, 2 }
 0x44b   : > { %v8486_v5 = vsel %vm404_vm3, %v2801_v33, %v2803_v43  ;;  %v8516_v58 = vsel %vm481_vm4, %v2952_v20, %v10904_v30  ;;  %v2785_v43 = vrot.slane %v8342_v22, 1  ;;  %v8530_v20 = vsel %vm404_vm3, %v2771_v26, %v2773_v37 }
 0x44c   : > { %v8493_v0 = vld [vmem:[#allocation3 + $0xb0] sm:$0xff]  ;;  %v2788_v37 = vrot.slane %v2635_v11, 1  ;;  %v8562_v13 = vld [vmem:[#allocation3 + $0xb8] sm:$0x3]  ;;  %v4706_v14 = vcombine.low %v8530_v20, %v8533_v36  ;;  %v8633_v30 = vsel %vm404_vm3, %v2790_v28, %v2791_v35  ;;  %v4314_v35 = vcombine.low %v8384_v47, %v8425_v63 }
 0x44d   : > { %2696 = vrot.lane.b32.xlu1 %v8493_v0, %s6962_s12  ;;  %2726 = vrot.lane.b32.xlu0 %v8342_v22, %s6963_s14  ;;  %v8538_v22 = vsel %vm481_vm4, %v2923_v40, %v2925_v38  ;;  %v8549_v26 = vsel %vm404_vm3, %v2785_v43, %v2786_v7  ;;  %v8556_v40 = vrot.slane %v3139_v32, %v7529_v39  ;;  %v10905_v48 = vrot.slane %v8493_v0, 2 }
 0x44e   : > { %v8582_v32 = vsel %vm404_vm3, %v2775_v49, %v2776_v56  ;;  %v8585_v38 = vsel %vm404_vm3, %v2776_v56, %v2778_v25  ;;  %v8604_v25 = vsel %vm404_vm3, %v2786_v7, %v2788_v37  ;;  %v2806_v49 = vrot.slane %v8493_v0, 1 }
 0x44f   : > { %11129 = vst [vmem:[#allocation19_spill] sm:$0xff] %v8556_v40  ;;  %v3498_v54 = vcombine.low %v8582_v32, %v8549_v26  ;;  %v2808_v43 = vrot.slane %v8562_v13, 1  ;;  %v8620_v7 = vsel %vm481_vm4, %v2957_v59, %v10905_v48  ;;  %v8623_v37 = vrot.slane %v4706_v14, %v7280_v51 }
 0x450   : > { %v2805_v56 = vrot.slane %v8428_v53, 1  ;;  %v8640_v14 = vsel %vm404_vm3, %v2800_v61, %v2801_v33  ;;  %v4330_v28 = vcombine.low %v8434_v10, %v8455_v6  ;;  %v8655_v33 = vsel %vm404_vm3, %v2795_v52, %v2796_v3 }
 0x451   : > { %2716 = vrot.lane.b32.xlu1 %v8351_v15, %s6963_s14  ;;  %2730 = vrot.lane.b32.xlu0 %v8363_v42, %s6963_s14  ;;  %11132 = vst [vmem:[#allocation12_spill] sm:$0xff] %v8623_v37  ;;  %v8628_v50 = vrot.slane %v3498_v54, %v7280_v51  ;;  %v8645_v18 = vsel %vm404_vm3, %v2806_v49, %v2808_v43  ;;  %11133 = vst [vmem:[#allocation10_spill] sm:$0xff] %v8655_v33  ;;  %v11135_v11 = vrot.slane %v8455_v6, 2 }
 0x452   : > { %v8658_v54 = vsel %vm404_vm3, %v2796_v3, %v2798_v27  ;;  %v8661_v61 = vsel %vm404_vm3, %v2805_v56, %v2806_v49  ;;  %v11136_v52 = vrot.slane %v8425_v63, 2  ;;  %v2950_v27 = vrot.slane %v8589_v31, 2 }
 0x453   : > { %11134 = vst [vmem:[#allocation11_spill] sm:$0xff] %v8661_v61  ;;  %v8670_v48 = vsel %vm481_vm4, %v11135_v11, %v2955_v44  ;;  %v11137_v56 = vcombine.low %v8351_v15, %v8405_v9  ;;  %v4322_v43 = vrot.slane %v4314_v35, %v7280_v51  ;;  %v4346_v44 = vcombine.low %v8441_v16, %v8493_v0 }
 0x454   : > { %v8675_v36 = vsel %vm481_vm4, %v11136_v52, %v2940_v8  ;;  %v3530_v8 = vcombine.low %v8655_v33, %v8661_v61  ;;  %v2960_v31 = vrot.slane %v8562_v13, 2  ;;  %v4338_v11 = vrot.slane %v4330_v28, %v7280_v51 }
 0x455   : > { %2720 = vrot.lane.b32.xlu1 %v8384_v47, %s6963_s14  ;;  %2734 = vrot.lane.b32.xlu0 %v8391_v1, %s6963_s14  ;;  %v4306_v3 = vrot.slane %v11137_v56, %v7280_v51  ;;  %v11138_v52 = vcombine.low %v8363_v42, %v8408_v24  ;;  %v4354_v35 = vrot.slane %v4346_v44, %v7280_v51 }
 0x456   : > { %v3122_v59 = vcombine.low %v8391_v1, %v8428_v53  ;;  %v4299_v13 = vcombine.high %v8351_v15, %v8405_v9  ;;  %v4315_v28 = vcombine.high %v8384_v47, %v8425_v63  ;;  %v4331_v61 = vcombine.high %v8434_v10, %v8455_v6 }
 0x457   : > { %v3114_v56 = vrot.slane %v11138_v52, %v7280_v51  ;;  %v4362_v49 = vcombine.low %v4306_v3, %v4322_v43  ;;  %v4363_v37 = vcombine.high %v4306_v3, %v4322_v43  ;;  %v4347_v52 = vcombine.high %v8441_v16, %v8493_v0 }
 0x458   : > { %v4394_v44 = vcombine.low %v4338_v11, %v4354_v35  ;;  %v3130_v33 = vrot.slane %v3122_v59, %v7280_v51  ;;  %v4395_v15 = vcombine.high %v4338_v11, %v4354_v35  ;;  %v8720_v47 = vrot.slane %v4299_v13, %v7280_v51 }
 0x459   : > { %2724 = vrot.lane.b32.xlu1 %v8405_v9, %s6963_s14  ;;  %2738 = vrot.lane.b32.xlu0 %v8408_v24, %s6963_s14  ;;  %v8715_v43 = vrot.slane %v4363_v37, %v7529_v39  ;;  %v8723_v9 = vrot.slane %v4315_v28, %v7280_v51  ;;  %v8734_v3 = vrot.slane %v4347_v52, %v7280_v51 }
 0x45a   : > { %v8731_v59 = vrot.slane %v4394_v44, %v7529_v39  ;;  %v3170_v37 = vcombine.low %v3114_v56, %v3130_v33  ;;  %v8737_v11 = vrot.slane %v4395_v15, %v7529_v39  ;;  %v3123_v13 = vcombine.high %v8391_v1, %v8428_v53 }
 0x45b   : > { %11140 = vst [vmem:[#allocation15_spill] sm:$0xff] %v8715_v43  ;;  %v4378_v35 = vcombine.low %v8720_v47, %v8723_v9  ;;  %v3546_v15 = vcombine.low %v8613_v41, %v8628_v50  ;;  %v11158_v40 = vcombine.low %v8491_v46, %v8486_v5 }
 0x45c   : > { %11141 = vst [vmem:[#allocation17_spill] sm:$0xff] %v8731_v59  ;;  %11142 = vst [vmem:[#allocation16_spill] sm:$0xff] %v8737_v11  ;;  %v3137_v1 = vrot.slane %v3123_v13, %v7280_v51  ;;  %v11151_v13 = vrot.slane %v8434_v10, 2  ;;  %v4379_v11 = vcombine.high %v8720_v47, %v8723_v9  ;;  %v11157_v47 = vcombine.low %v8585_v38, %v8604_v25 }
 0x45d   : > { %2728 = vrot.lane.b32.xlu1 %v8425_v63, %s6963_s14  ;;  %2742 = vrot.lane.b32.xlu0 %v8428_v53, %s6963_s14  ;;  %v8726_v63 = vrot.slane %v4331_v61, %v7280_v51  ;;  %v3107_v61 = vcombine.high %v8363_v42, %v8408_v24  ;;  %v11145_v42 = vrot.slane %v8493_v0, 2  ;;  %v8767_v44 = vrot.slane %v4378_v35, %v7529_v39 }
 0x45e   : > { %v11148_v35 = vrot.slane %v8441_v16, 2  ;;  %v8863_v9 = vrot.slane %v11157_v47, %v7280_v51 }
 0x45f   : > { %v4410_v52 = vcombine.low %v8726_v63, %v8734_v3  ;;  %v8760_v24 = vsel %vm481_vm4, %v11145_v42, %v2960_v31  ;;  %11146 = vst [vmem:[#allocation27_spill] sm:$0xff] %v8767_v44  ;;  %v3121_v53 = vrot.slane %v3107_v61, %v7280_v51  ;;  %v11150_v61 = vrot.slane %v8443_v12, 2 }
 0x460   : > { %v8786_v42 = vsel %vm481_vm4, %v11148_v35, %v2950_v27  ;;  %v3922_v12 = vcombine.low %v8462_v17, %v8516_v58 }
 0x461   : > { %2732 = vrot.lane.b32.xlu1 %v8434_v10, %s6963_s14  ;;  %2826 = vrot.lane.b32.xlu0 %v8521_v23, %s6962_s12  ;;  %v8711_v23 = vrot.slane %v4362_v49, %v7529_v39  ;;  %v3171_v49 = vcombine.high %v3114_v56, %v3130_v33  ;;  %v8748_v33 = vrot.slane %v3170_v37, %v7529_v39 }
 0x462   : > { %v8778_v37 = vrot.slane %v4410_v52, %v7529_v39  ;;  %v5162_v31 = vcombine.low %v8786_v42, %v8760_v24  ;;  %v3938_v52 = vcombine.low %v8481_v29, %v8620_v7  ;;  %v8811_v35 = vsel %vm481_vm4, %v11151_v13, %v11150_v61 }
 0x463   : > { %11139 = vst [vmem:[#allocation14_spill] sm:$0xff] %v8711_v23  ;;  %11143 = vst [vmem:[#allocation25_spill] sm:$0xff] %v8748_v33  ;;  %v8751_v56 = vrot.slane %v3171_v49, %v7529_v39  ;;  %v8781_v49 = vrot.slane %v3530_v8, %v7280_v51  ;;  %v3187_v28 = vcombine.high %v3121_v53, %v3137_v1 }
 0x464   : > { %11147 = vst [vmem:[#allocation28_spill] sm:$0xff] %v8778_v37  ;;  %v5130_v10 = vcombine.low %v8598_v57, %v8675_v36 }
 0x465   : > { %2736 = vrot.lane.b32.xlu1 %v8441_v16, %s6963_s14  ;;  %2830 = vrot.lane.b32.xlu0 %v8582_v32, %s6962_s12  ;;  %11144 = vst [vmem:[#allocation26_spill] sm:$0xff] %v8751_v56  ;;  %v11149_v16 = vcombine.low %v8633_v30, %v8640_v14  ;;  %v8835_v13 = vrot.slane %v3187_v28, %v7529_v39 }
 0x466   : > { %v8841_v56 = vrot.slane %v3938_v52, %v7280_v51  ;;  %v8869_v28 = vrot.slane %v11158_v40, %v7280_v51  ;;  %v4411_v52 = vcombine.high %v8726_v63, %v8734_v3  ;;  %v8897_v3 = vrot.slane %v4379_v11, %v7529_v39 }
 0x467   : > { %v8804_v27 = vrot.slane %v11149_v16, %v7280_v51  ;;  %v5146_v16 = vcombine.low %v8811_v35, %v8670_v48  ;;  %11154 = vst [vmem:[#allocation30_spill] sm:$0xff] %v8835_v13  ;;  %v8880_v13 = vrot.slane %v3922_v12, %v7280_v51  ;;  %v11168_v12 = vcombine.low %v8382_v55, %v8423_v4 }
 0x468   : > { %11156 = vst [vmem:[#allocation32_spill] sm:$0xff] %v8841_v56  ;;  %11166 = vst [vmem:[#allocation39_spill] sm:$0xff] %v8897_v3  ;;  %v8915_v11 = vrot.slane %v3546_v15, %v7529_v39 }
 0x469   : > { %2740 = vrot.lane.b32.xlu1 %v8455_v6, %s6963_s14  ;;  %2834 = vrot.lane.b32.xlu0 %v8527_v62, %s6962_s12  ;;  %v3186_v6 = vcombine.low %v3121_v53, %v3137_v1  ;;  %v3578_v1 = vcombine.low %v8804_v27, %v8781_v49  ;;  %v3906_v53 = vcombine.low %v8403_v2, %v8476_v60 }
 0x46a   : > { %11161 = vst [vmem:[#allocation35_spill] sm:$0xff] %v8880_v13  ;;  %11170 = vst [vmem:[#allocation42_spill] sm:$0xff] %v8915_v11 }
 0x46b   : > { %v8832_v61 = vrot.slane %v3186_v6, %v7529_v39  ;;  %v8877_v6 = vrot.slane %v5130_v10, %v7280_v51  ;;  %v8883_v47 = vrot.slane %v3906_v53, %v7280_v51  ;;  %v8886_v34 = vrot.slane %v3578_v1, %v7529_v39 }
 0x46c   : > { %v8900_v10 = vrot.slane %v4411_v52, %v7529_v39  ;;  %v8908_v1 = vrot.slane %v11168_v12, %v7280_v51  ;;  %v11171_v52 = vld [vmem:[#allocation10_spill] sm:$0xff] }
 0x46d   : > { %2744 = vrot.lane.b32.xlu1 %v8493_v0, %s6963_s14  ;;  %2838 = vrot.lane.b32.xlu0 %v8549_v26, %s6962_s12  ;;  %v11152_v0 = vcombine.low %v8658_v54, %v8645_v18  ;;  %11153 = vst [vmem:[#allocation29_spill] sm:$0xff] %v8832_v61  ;;  %11160 = vst [vmem:[#allocation34_spill] sm:$0xff] %v8877_v6  ;;  %v11172_v61 = vld [vmem:[#allocation12_spill] sm:$0xff] }
 0x46e   : > { %11162 = vst [vmem:[#allocation36_spill] sm:$0xff] %v8883_v47  ;;  %11163 = vst [vmem:[#allocation37_spill] sm:$0xff] %v8886_v34  ;;  %v4770_v45 = vcombine.low %v11172_v61, %v8863_v9 }
 0x46f   : > { %v8819_v8 = vrot.slane %v11152_v0, %v7280_v51  ;;  %v8838_v0 = vrot.slane %v5162_v31, %v7280_v51  ;;  %v8872_v31 = vrot.slane %v5146_v16, %v7280_v51  ;;  %v11164_v16 = vcombine.low %v8538_v22, %v8567_v21  ;;  %11167 = vst [vmem:[#allocation40_spill] sm:$0xff] %v8900_v10 }
 0x470   : > { %11169 = vst [vmem:[#allocation41_spill] sm:$0xff] %v8908_v1  ;;  %v8945_v10 = vrot.slane %v4770_v45, %v7529_v39 }
 0x471   : > { %11155 = vst [vmem:[#allocation31_spill] sm:$0xff] %v8838_v0  ;;  %2828 = vrot.lane.b32.xlu1 %v8530_v20, %s6962_s12  ;;  %2842 = vrot.lane.b32.xlu0 %v8633_v30, %s6962_s12  ;;  %11159 = vst [vmem:[#allocation33_spill] sm:$0xff] %v8872_v31  ;;  %v4802_v40 = vcombine.low %v8869_v28, %v8819_v8  ;;  %v8894_v63 = vrot.slane %v11164_v16, %v7280_v51 }
 0x472   : > { %v5210_v53 = vcombine.low %v8872_v31, %v8838_v0  ;;  %v3986_v16 = vcombine.low %v8880_v13, %v8841_v56  ;;  %v3954_v13 = vcombine.low %v8908_v1, %v8883_v47  ;;  %v11174_v0 = vld [vmem:[#allocation24_spill] sm:$0xff]  ;;  %11177 = vst [vmem:[#allocation43_spill] sm:$0xff] %v8945_v10 }
 0x473   : > { %11165 = vst [vmem:[#allocation38_spill] sm:$0xff] %v8894_v63  ;;  %v5178_v31 = vcombine.low %v8894_v63, %v8877_v6  ;;  %v8932_v56 = vrot.slane %v4802_v40, %v7529_v39  ;;  %v11237_v63 = vld [vmem:[#allocation18_spill] sm:$0xff] }
 0x474   : > { %v8937_v37 = vrot.slane %v5210_v53, %v7529_v39  ;;  %v8940_v12 = vrot.slane %v3986_v16, %v7529_v39  ;;  %v8953_v3 = vrot.slane %v3954_v13, %v7529_v39  ;;  %v11180_v13 = vld [vmem:[#allocation21_spill] sm:$0xff]  ;;  %v11184_v16 = vld [vmem:[#allocation11_spill] sm:$0xff] }
 0x475   : > { %2832 = vrot.lane.b32.xlu1 %v8585_v38, %s6962_s12  ;;  %2846 = vrot.lane.b32.xlu0 %v11171_v52, %s6962_s12  ;;  %11173 = vst [vmem:[#allocation10_spill] sm:$0xff] %v8932_v56  ;;  %v8950_v40 = vrot.slane %v5178_v31, %v7529_v39 }
 0x476   : > { %11175 = vst [vmem:[#allocation12_spill] sm:$0xff] %v8937_v37  ;;  %11176 = vst [vmem:[#allocation24_spill] sm:$0xff] %v8940_v12 }
 0x477   : > { %11178 = vst [vmem:[#allocation44_spill] sm:$0xff] %v8950_v40  ;;  %11179 = vst [vmem:[#allocation45_spill] sm:$0xff] %v8953_v3 }
 0x479   : > { %2836 = vrot.lane.b32.xlu1 %v11174_v0, %s6962_s12  ;;  %2852 = vrot.lane.b32.xlu0 %v8486_v5, %s6962_s12 }
 0x47d   : > { %2840 = vrot.lane.b32.xlu1 %v8604_v25, %s6962_s12  ;;  %2876 = vrot.lane.b32.xlu0 %v8530_v20, %s6963_s14 }
 0x481   : > { %2844 = vrot.lane.b32.xlu1 %v8491_v46, %s6962_s12  ;;  %2884 = vrot.lane.b32.xlu0 %v11174_v0, %s6963_s14 }
 0x485   : > { %2848 = vrot.lane.b32.xlu1 %v8658_v54, %s6962_s12  ;;  %2892 = vrot.lane.b32.xlu0 %v8491_v46, %s6963_s14 }
 0x489   : > { %2856 = vrot.lane.b32.xlu1 %v8645_v18, %s6962_s12  ;;  %2900 = vrot.lane.b32.xlu0 %v8486_v5, %s6963_s14 }
 0x48d   : > { %2880 = vrot.lane.b32.xlu1 %v8585_v38, %s6963_s14  ;;  %2850 = vrot.lane.b32.xlu0 %v8640_v14, %s6962_s12 }
 0x491   : > { %2888 = vrot.lane.b32.xlu1 %v8604_v25, %s6963_s14  ;;  %2874 = vrot.lane.b32.xlu0 %v11180_v13, %s6963_s14 }
 0x493   : > { %v8987_v31 = vpop.permute.xlu0 %2666 }
 0x494   : > { %11181 = vst [vmem:[#allocation21_spill] sm:$0xff] %v8987_v31 }
 0x495   : > { %2896 = vrot.lane.b32.xlu1 %v8658_v54, %s6963_s14  ;;  %2882 = vrot.lane.b32.xlu0 %v8527_v62, %s6963_s14 }
 0x497   : > { %v8993_v45 = vpop.permute.xlu0 %2670 }
 0x498   : > { %11182 = vst [vmem:[#allocation46_spill] sm:$0xff] %v8993_v45 }
 0x499   : > { %2904 = vrot.lane.b32.xlu1 %v8645_v18, %s6963_s14  ;;  %2890 = vrot.lane.b32.xlu0 %v8633_v30, %s6963_s14 }
 0x49b   : > { %v8999_v15 = vpop.permute.xlu0 %2674 }
 0x49c   : > { %11183 = vst [vmem:[#allocation47_spill] sm:$0xff] %v8999_v15  ;;  %v3210_v10 = vcombine.low %v8987_v31, %v8999_v15 }
 0x49d   : > { %2854 = vrot.lane.b32.xlu1 %v11184_v16, %s6962_s12  ;;  %2898 = vrot.lane.b32.xlu0 %v8640_v14, %s6963_s14 }
 0x49e   : > { %v9053_v23 = vrot.slane %v3210_v10, %v7280_v51 }
 0x49f   : > { %v9005_v53 = vpop.permute.xlu0 %2678 }
 0x4a0   : > { %11185 = vst [vmem:[#allocation11_spill] sm:$0xff] %v9005_v53  ;;  %v3226_v47 = vcombine.low %v8993_v45, %v9005_v53  ;;  %11195 = vst [vmem:[#allocation57_spill] sm:$0xff] %v9053_v23 }
 0x4a1   : > { %2878 = vrot.lane.b32.xlu1 %v8582_v32, %s6963_s14  ;;  %2980 = vrot.lane.b32.xlu0 %v8538_v22, %s6962_s12 }
 0x4a2   : > { %v9044_v33 = vrot.slane %v3226_v47, %v7280_v51 }
 0x4a3   : > { %v9011_v3 = vpop.permute.xlu1 %2668  ;;  %v9013_v12 = vpop.permute.xlu0 %2682 }
 0x4a4   : > { %11186 = vst [vmem:[#allocation48_spill] sm:$0xff] %v9011_v3  ;;  %11187 = vst [vmem:[#allocation49_spill] sm:$0xff] %v9013_v12 }
 0x4a5   : > { %2886 = vrot.lane.b32.xlu1 %v8549_v26, %s6963_s14  ;;  %2988 = vrot.lane.b32.xlu0 %v8567_v21, %s6962_s12  ;;  %11193 = vst [vmem:[#allocation55_spill] sm:$0xff] %v9044_v33 }
 0x4a7   : > { %v9019_v40 = vpop.permute.xlu1 %2672  ;;  %v9021_v37 = vpop.permute.xlu0 %2686 }
 0x4a8   : > { %11188 = vst [vmem:[#allocation50_spill] sm:$0xff] %v9019_v40  ;;  %11189 = vst [vmem:[#allocation51_spill] sm:$0xff] %v9021_v37 }
 0x4a9   : > { %2894 = vrot.lane.b32.xlu1 %v11171_v52, %s6963_s14  ;;  %2996 = vrot.lane.b32.xlu0 %v8811_v35, %s6962_s12 }
 0x4ab   : > { %v9027_v1 = vpop.permute.xlu1 %2676  ;;  %v9031_v44 = vpop.permute.xlu0 %2690 }
 0x4ac   : > { %11190 = vst [vmem:[#allocation52_spill] sm:$0xff] %v9027_v1  ;;  %11191 = vst [vmem:[#allocation53_spill] sm:$0xff] %v9031_v44  ;;  %v3242_v56 = vcombine.low %v9013_v12, %v9031_v44  ;;  %v3274_v12 = vcombine.low %v9053_v23, %v9044_v33 }
 0x4ad   : > { %2902 = vrot.lane.b32.xlu1 %v11184_v16, %s6963_s14  ;;  %3004 = vrot.lane.b32.xlu0 %v8670_v48, %s6962_s12 }
 0x4ae   : > { %v9058_v31 = vrot.slane %v3242_v56, %v7280_v51 }
 0x4af   : > { %v9041_v43 = vpop.permute.xlu1 %2680  ;;  %v9046_v19 = vpop.permute.xlu0 %2694 }
 0x4b0   : > { %11192 = vst [vmem:[#allocation54_spill] sm:$0xff] %v9041_v43  ;;  %11194 = vst [vmem:[#allocation56_spill] sm:$0xff] %v9046_v19  ;;  %v3258_v59 = vcombine.low %v9021_v37, %v9046_v19  ;;  %v9081_v37 = vrot.slane %v3274_v12, %v7529_v39  ;;  %v4434_v12 = vcombine.low %v9011_v3, %v9027_v1 }
 0x4b1   : > { %2984 = vrot.lane.b32.xlu1 %v8598_v57, %s6962_s12  ;;  %2978 = vrot.lane.b32.xlu0 %v8382_v55, %s6962_s12  ;;  %11196 = vst [vmem:[#allocation58_spill] sm:$0xff] %v9058_v31 }
 0x4b2   : > { %v9061_v47 = vrot.slane %v3258_v59, %v7280_v51  ;;  %11201 = vst [vmem:[#allocation63_spill] sm:$0xff] %v9081_v37  ;;  %v9115_v3 = vrot.slane %v4434_v12, %v7280_v51 }
 0x4b3   : > { %v9063_v15 = vpop.permute.xlu1 %2684  ;;  %v9067_v44 = vpop.permute.xlu0 %2714 }
 0x4b4   : > { %11197 = vst [vmem:[#allocation59_spill] sm:$0xff] %v9061_v47  ;;  %11198 = vst [vmem:[#allocation60_spill] sm:$0xff] %v9063_v15  ;;  %v3306_v10 = vcombine.low %v9058_v31, %v9061_v47 }
 0x4b5   : > { %11199 = vst [vmem:[#allocation61_spill] sm:$0xff] %v9067_v44  ;;  %2992 = vrot.lane.b32.xlu1 %v8675_v36, %s6962_s12  ;;  %2986 = vrot.lane.b32.xlu0 %v8423_v4, %s6962_s12  ;;  %11207 = vst [vmem:[#allocation69_spill] sm:$0xff] %v9115_v3 }
 0x4b6   : > { %v9076_v56 = vrot.slane %v3306_v10, %v7529_v39  ;;  %v4450_v10 = vcombine.low %v9019_v40, %v9041_v43 }
 0x4b7   : > { %v9078_v59 = vpop.permute.xlu1 %2688  ;;  %v9083_v23 = vpop.permute.xlu0 %2718 }
 0x4b8   : > { %11200 = vst [vmem:[#allocation62_spill] sm:$0xff] %v9076_v56  ;;  %11202 = vst [vmem:[#allocation64_spill] sm:$0xff] %v9083_v23  ;;  %v9106_v33 = vrot.slane %v4450_v10, %v7280_v51 }
 0x4b9   : > { %3000 = vrot.lane.b32.xlu1 %v8786_v42, %s6962_s12  ;;  %2994 = vrot.lane.b32.xlu0 %v8462_v17, %s6962_s12 }
 0x4ba   : > { %11205 = vst [vmem:[#allocation67_spill] sm:$0xff] %v9106_v33  ;;  %v4498_v10 = vcombine.low %v9115_v3, %v9106_v33 }
 0x4bb   : > { %v9093_v31 = vpop.permute.xlu1 %2692  ;;  %v9095_v47 = vpop.permute.xlu0 %2722 }
 0x4bc   : > { %11203 = vst [vmem:[#allocation65_spill] sm:$0xff] %v9093_v31  ;;  %11204 = vst [vmem:[#allocation66_spill] sm:$0xff] %v9095_v47  ;;  %v4466_v19 = vcombine.low %v9063_v15, %v9093_v31  ;;  %v3346_v53 = vcombine.low %v9067_v44, %v9095_v47  ;;  %v3483_v47 = vcombine.high %v11180_v13, %v8527_v62 }
 0x4bd   : > { %3008 = vrot.lane.b32.xlu1 %v8760_v24, %s6962_s12  ;;  %3002 = vrot.lane.b32.xlu0 %v8516_v58, %s6962_s12  ;;  %v5115_v62 = vcombine.high %v8538_v22, %v8567_v21 }
 0x4be   : > { %v9120_v1 = vrot.slane %v4466_v19, %v7280_v51  ;;  %v3354_v44 = vrot.slane %v3346_v53, %v7280_v51 }
 0x4bf   : > { %v9108_v37 = vpop.permute.xlu1 %2696  ;;  %v9110_v56 = vpop.permute.xlu0 %2726 }
 0x4c0   : > { %11206 = vst [vmem:[#allocation68_spill] sm:$0xff] %v9110_v56  ;;  %v4482_v40 = vcombine.low %v9078_v59, %v9108_v37 }
 0x4c1   : > { %2982 = vrot.lane.b32.xlu1 %v8403_v2, %s6962_s12  ;;  %3028 = vrot.lane.b32.xlu0 %v8538_v22, %s6963_s14 }
 0x4c2   : > { %v9123_v15 = vrot.slane %v4482_v40, %v7280_v51  ;;  %v9143_v40 = vrot.slane %v4498_v10, %v7529_v39 }
 0x4c3   : > { %v9129_v31 = vpop.permute.xlu1 %2716  ;;  %v9133_v43 = vpop.permute.xlu0 %2730 }
 0x4c4   : > { %v4530_v12 = vcombine.low %v9120_v1, %v9123_v15  ;;  %11208 = vst [vmem:[#allocation70_spill] sm:$0xff] %v9133_v43  ;;  %11210 = vst [vmem:[#allocation72_spill] sm:$0xff] %v9143_v40 }
 0x4c5   : > { %2990 = vrot.lane.b32.xlu1 %v8476_v60, %s6962_s12  ;;  %3036 = vrot.lane.b32.xlu0 %v8567_v21, %s6963_s14  ;;  %v3362_v60 = vcombine.low %v9083_v23, %v9110_v56  ;;  %v3499_v23 = vcombine.high %v8582_v32, %v8549_v26 }
 0x4c6   : > { %v9138_v19 = vrot.slane %v4530_v12, %v7529_v39 }
 0x4c7   : > { %v9145_v3 = vpop.permute.xlu1 %2720  ;;  %v9147_v33 = vpop.permute.xlu0 %2734  ;;  %v3370_v40 = vrot.slane %v3362_v60, %v7280_v51  ;;  %v4723_v60 = vcombine.high %v8585_v38, %v8604_v25  ;;  %v9194_v53 = vrot.slane %v3499_v23, %v7280_v51  ;;  %v9205_v38 = vrot.slane %v3483_v47, %v7280_v51 }
 0x4c8   : > { %11209 = vst [vmem:[#allocation71_spill] sm:$0xff] %v9138_v19  ;;  %11211 = vst [vmem:[#allocation73_spill] sm:$0xff] %v9147_v33  ;;  %v5147_v47 = vcombine.high %v8811_v35, %v8670_v48 }
 0x4c9   : > { %2998 = vrot.lane.b32.xlu1 %v8481_v29, %s6962_s12  ;;  %3044 = vrot.lane.b32.xlu0 %v8811_v35, %s6963_s14  ;;  %11215 = vst [vmem:[#allocation77_spill] sm:$0xff] %v9194_v53  ;;  %11216 = vst [vmem:[#allocation78_spill] sm:$0xff] %v9205_v38  ;;  %v9208_v25 = vrot.slane %v4723_v60, %v7280_v51  ;;  %v9228_v60 = vrot.slane %v5115_v62, %v7280_v51 }
 0x4ca   : > { %v3891_v62 = vcombine.high %v8382_v55, %v8423_v4 }
 0x4cb   : > { %v9155_v12 = vpop.permute.xlu1 %2724  ;;  %v9159_v10 = vpop.permute.xlu0 %2738  ;;  %11217 = vst [vmem:[#allocation79_spill] sm:$0xff] %v9208_v25  ;;  %11222 = vst [vmem:[#allocation84_spill] sm:$0xff] %v9228_v60 }
 0x4cc   : > { %11212 = vst [vmem:[#allocation74_spill] sm:$0xff] %v9159_v10  ;;  %v3378_v45 = vcombine.low %v9133_v43, %v9159_v10  ;;  %v3410_v10 = vcombine.low %v3354_v44, %v3370_v40 }
 0x4cd   : > { %3006 = vrot.lane.b32.xlu1 %v8620_v7, %s6962_s12  ;;  %3052 = vrot.lane.b32.xlu0 %v8670_v48, %s6963_s14  ;;  %v11224_v48 = vcombine.high %v8491_v46, %v8486_v5 }
 0x4ce   : > { %v3386_v43 = vrot.slane %v3378_v45, %v7280_v51  ;;  %v9216_v22 = vrot.slane %v3410_v10, %v7529_v39  ;;  %v3547_v45 = vcombine.high %v8613_v41, %v8628_v50  ;;  %v3579_v10 = vcombine.high %v8804_v27, %v8781_v49 }
 0x4cf   : > { %v9169_v29 = vpop.permute.xlu1 %2728  ;;  %v9172_v19 = vpop.permute.xlu0 %2742  ;;  %v3515_v27 = vcombine.high %v8633_v30, %v8640_v14  ;;  %v9281_v35 = vrot.slane %v11224_v48, %v7280_v51 }
 0x4d0   : > { %11213 = vst [vmem:[#allocation75_spill] sm:$0xff] %v9172_v19  ;;  %v3394_v56 = vcombine.low %v9147_v33, %v9172_v19  ;;  %v4707_v19 = vcombine.high %v8530_v20, %v11174_v0  ;;  %11219 = vst [vmem:[#allocation81_spill] sm:$0xff] %v9216_v22  ;;  %v3561_v46 = vrot.slane %v3547_v45, %v7529_v39 }
 0x4d1   : > { %3032 = vrot.lane.b32.xlu1 %v8598_v57, %s6963_s14  ;;  %3026 = vrot.lane.b32.xlu0 %v8382_v55, %s6963_s14  ;;  %v4755_v55 = vcombine.high %v8658_v54, %v8645_v18  ;;  %v3611_v18 = vcombine.high %v8915_v11, %v8886_v34  ;;  %v3593_v54 = vrot.slane %v3579_v10, %v7529_v39  ;;  %v11233_v11 = vld [vmem:[#allocation11_spill] sm:$0xff] }
 0x4d2   : > { %v3402_v26 = vrot.slane %v3394_v56, %v7280_v51  ;;  %v9225_v56 = vrot.slane %v4707_v19, %v7280_v51  ;;  %v9302_v48 = vrot.slane %v3515_v27, %v7280_v51 }
 0x4d3   : > { %v9189_v32 = vpop.permute.xlu1 %2732  ;;  %v9191_v33 = vpop.permute.xlu0 %2826  ;;  %v3612_v27 = vcombine.low %v3561_v46, %v3593_v54 }
 0x4d4   : > { %11214 = vst [vmem:[#allocation76_spill] sm:$0xff] %v9191_v33  ;;  %v3442_v13 = vcombine.low %v3386_v43, %v3402_v26  ;;  %v3443_v21 = vcombine.high %v3386_v43, %v3402_v26  ;;  %11221 = vst [vmem:[#allocation83_spill] sm:$0xff] %v9225_v56  ;;  %v3411_v26 = vcombine.high %v3354_v44, %v3370_v40  ;;  %v11239_v33 = vld [vmem:[#allocation50_spill] sm:$0xff] }
 0x4d5   : > { %3040 = vrot.lane.b32.xlu1 %v8675_v36, %s6963_s14  ;;  %3034 = vrot.lane.b32.xlu0 %v8423_v4, %s6963_s14  ;;  %v3531_v4 = vcombine.high %v11171_v52, %v11184_v16  ;;  %v4570_v44 = vcombine.low %v9129_v31, %v9155_v12  ;;  %v9284_v52 = vrot.slane %v3891_v62, %v7280_v51 }
 0x4d6   : > { %v9211_v23 = vrot.slane %v3442_v13, %v7529_v39  ;;  %v4586_v13 = vcombine.low %v9145_v3, %v9169_v29  ;;  %v3457_v40 = vrot.slane %v3443_v21, %v7529_v39  ;;  %v3425_v30 = vrot.slane %v3411_v26, %v7529_v39  ;;  %11228 = vst [vmem:[#allocation89_spill] sm:$0xff] %v9302_v48 }
 0x4d7   : > { %v9213_v20 = vpop.permute.xlu1 %2736  ;;  %v9218_v0 = vpop.permute.xlu0 %2830  ;;  %11225 = vst [vmem:[#allocation86_spill] sm:$0xff] %v9284_v52  ;;  %v5131_v16 = vcombine.high %v8598_v57, %v8675_v36  ;;  %v9299_v62 = vrot.slane %v4755_v55, %v7280_v51  ;;  %v9305_v36 = vrot.slane %v5147_v47, %v7280_v51  ;;  %v9308_v57 = vrot.slane %v4570_v44, %v7280_v51  ;;  %v11332_v52 = vld [vmem:[#allocation78_spill] sm:$0xff] }
 0x4d8   : > { %11218 = vst [vmem:[#allocation80_spill] sm:$0xff] %v9211_v23  ;;  %11220 = vst [vmem:[#allocation82_spill] sm:$0xff] %v9218_v0  ;;  %v3475_v43 = vcombine.high %v9216_v22, %v9211_v23  ;;  %v9289_v21 = vrot.slane %v4586_v13, %v7280_v51  ;;  %v3476_v5 = vcombine.low %v3425_v30, %v3457_v40  ;;  %v11235_v23 = vld [vmem:[#allocation56_spill] sm:$0xff]  ;;  %v11236_v22 = vld [vmem:[#allocation51_spill] sm:$0xff] }
 0x4d9   : > { %3048 = vrot.lane.b32.xlu1 %v8786_v42, %s6963_s14  ;;  %3042 = vrot.lane.b32.xlu0 %v8462_v17, %s6963_s14  ;;  %11227 = vst [vmem:[#allocation88_spill] sm:$0xff] %v9299_v62  ;;  %11229 = vst [vmem:[#allocation90_spill] sm:$0xff] %v9305_v36  ;;  %v9323_v47 = vrot.slane %v5131_v16, %v7280_v51  ;;  %v4483_v55 = vcombine.high %v9078_v59, %v9108_v37  ;;  %v11234_v37 = vld [vmem:[#allocation46_spill] sm:$0xff]  ;;  %v11240_v0 = vld [vmem:[#allocation67_spill] sm:$0xff] }
 0x4da   : > { %v6588_v50 = vpack.i.bf16 %v3611_v18, %v3475_v43  ;;  %v9313_v43 = vrot.slane %v3531_v4, %v7280_v51  ;;  %v4634_v4 = vcombine.low %v9308_v57, %v9289_v21  ;;  %v4531_v18 = vcombine.high %v9120_v1, %v9123_v15  ;;  %v11238_v15 = vld [vmem:[#allocation54_spill] sm:$0xff] }
 0x4db   : > { %v9248_v49 = vpop.permute.xlu1 %2740  ;;  %v9255_v41 = vpop.permute.xlu0 %2834  ;;  %11231 = vst [vmem:[#allocation92_spill] sm:$0xff] %v9323_v47  ;;  %v6598_v16 = vpack.i.bf16 %v3612_v27, %v3476_v5  ;;  %v3477_v34 = vcombine.high %v3425_v30, %v3457_v40  ;;  %v3227_v59 = vcombine.high %v11234_v37, %v11233_v11  ;;  %v3259_v6 = vcombine.high %v11236_v22, %v11235_v23  ;;  %v11242_v40 = vld [vmem:[#allocation65_spill] sm:$0xff]  ;;  %v11243_v30 = vld [vmem:[#allocation60_spill] sm:$0xff]  ;;  %v11250_v36 = vld [vmem:[#allocation58_spill] sm:$0xff] }
 0x4dc   : > { %11223 = vst [vmem:[#allocation85_spill] sm:$0xff] %v9255_v41  ;;  %v4602_v14 = vcombine.low %v9189_v32, %v9248_v49  ;;  %11230 = vst [vmem:[#allocation91_spill] sm:$0xff] %v9313_v43  ;;  %v3613_v1 = vcombine.high %v3561_v46, %v3593_v54  ;;  %v4451_v41 = vcombine.high %v11239_v33, %v11238_v15  ;;  %v11245_v11 = vld [vmem:[#allocation53_spill] sm:$0xff]  ;;  %v11247_v37 = vld [vmem:[#allocation52_spill] sm:$0xff] }
 0x4dd   : > { %3056 = vrot.lane.b32.xlu1 %v8760_v24, %s6963_s14  ;;  %3050 = vrot.lane.b32.xlu0 %v8516_v58, %s6963_s14  ;;  %v4467_v27 = vcombine.high %v11243_v30, %v11242_v40  ;;  %v11246_v23 = vld [vmem:[#allocation49_spill] sm:$0xff]  ;;  %v11249_v46 = vld [vmem:[#allocation59_spill] sm:$0xff]  ;;  %v9364_v15 = vrot.slane %v4634_v4, %v7529_v39  ;;  %v9381_v38 = vrot.slane %v3259_v6, %v7280_v51 }
 0x4de   : > { %v9316_v45 = vrot.slane %v4602_v14, %v7280_v51  ;;  %v3243_v22 = vcombine.high %v11246_v23, %v11245_v11  ;;  %v3307_v33 = vcombine.high %v11250_v36, %v11249_v46  ;;  %v6608_v40 = vpack.i.bf16 %v3613_v1, %v3477_v34  ;;  %v11254_v30 = vld [vmem:[#allocation71_spill] sm:$0xff]  ;;  %v11255_v11 = vld [vmem:[#allocation72_spill] sm:$0xff]  ;;  %v11259_v46 = vld [vmem:[#allocation57_spill] sm:$0xff] }
 0x4df   : > { %v9291_v26 = vpop.permute.xlu1 %2744  ;;  %v9293_v19 = vpop.permute.xlu0 %2838  ;;  %11251 = vst [vmem:[#allocation46_spill] sm:$0xff] %v9364_v15  ;;  %v4563_v23 = vcombine.high %v11255_v11, %v11254_v30  ;;  %v11258_v36 = vld [vmem:[#allocation55_spill] sm:$0xff]  ;;  %v9388_v34 = vrot.slane %v4451_v41, %v7280_v51  ;;  %v9392_v30 = vrot.slane %v4467_v27, %v7280_v51  ;;  %v3241_v6 = vrot.slane %v3227_v59, %v7280_v51  ;;  %v11263_v41 = vld [vmem:[#allocation62_spill] sm:$0xff]  ;;  %v11268_v59 = vld [vmem:[#allocation17_spill] sm:$0xff] }
 0x4e0   : > { %11226 = vst [vmem:[#allocation87_spill] sm:$0xff] %v9293_v19  ;;  %v4618_v10 = vcombine.low %v9213_v20, %v9291_v26  ;;  %v11248_v19 = vld [vmem:[#allocation48_spill] sm:$0xff]  ;;  %v3275_v4 = vcombine.high %v11259_v46, %v11258_v36  ;;  %v9400_v36 = vrot.slane %v3307_v33, %v7529_v39 }
 0x4e1   : > { %3030 = vrot.lane.b32.xlu1 %v8403_v2, %s6963_s14  ;;  %6589 = vrot.lane.b32.xlu0 %v6588_v50, %s6965_s15  ;;  %v4435_v54 = vcombine.high %v11248_v19, %v11247_v37  ;;  %v11256_v19 = vld [vmem:[#allocation47_spill] sm:$0xff]  ;;  %v11257_v37 = vld [vmem:[#allocation21_spill] sm:$0xff]  ;;  %11261 = vst [vmem:[#allocation18_spill] sm:$0xff] %v9388_v34  ;;  %11262 = vst [vmem:[#allocation54_spill] sm:$0xff] %v9392_v30 }
 0x4e2   : > { %v9319_v13 = vrot.slane %v4618_v10, %v7280_v51  ;;  %v3211_v53 = vcombine.high %v11257_v37, %v11256_v19  ;;  %v3923_v19 = vcombine.high %v8462_v17, %v8516_v58  ;;  %v3257_v37 = vrot.slane %v3243_v22, %v7280_v51 }
 0x4e3   : > { %v9331_v14 = vpop.permute.xlu1 %2828  ;;  %v9337_v10 = vpop.permute.xlu0 %2842  ;;  %v9407_v27 = vrot.slane %v4435_v54, %v7280_v51  ;;  %v3289_v25 = vrot.slane %v3275_v4, %v7529_v39  ;;  %v3907_v54 = vcombine.high %v8403_v2, %v11237_v63  ;;  %v11270_v4 = vld [vmem:[#allocation23_spill] sm:$0xff] }
 0x4e4   : > { %v4666_v50 = vcombine.low %v9316_v45, %v9319_v13  ;;  %11232 = vst [vmem:[#allocation93_spill] sm:$0xff] %v9337_v10  ;;  %v11241_v10 = vld [vmem:[#allocation69_spill] sm:$0xff]  ;;  %v3225_v33 = vrot.slane %v3211_v53, %v7280_v51  ;;  %v3322_v56 = vcombine.low %v3257_v37, %v9381_v38 }
 0x4e5   : > { %3038 = vrot.lane.b32.xlu1 %v11237_v63, %s6963_s14  ;;  %v4499_v5 = vcombine.high %v11241_v10, %v11240_v0  ;;  %6599 = vrot.lane.b32.xlu0 %v6598_v16, %s6966_s16  ;;  %v9369_v10 = vrot.slane %v4483_v55, %v7280_v51  ;;  %v11260_v55 = vld [vmem:[#allocation22_spill] sm:$0xff]  ;;  %11265 = vst [vmem:[#allocation50_spill] sm:$0xff] %v9407_v27 }
 0x4e6   : > { %v9354_v44 = vrot.slane %v4666_v50, %v7529_v39  ;;  %v4545_v50 = vrot.slane %v4531_v18, %v7529_v39  ;;  %v11264_v18 = vld [vmem:[#allocation63_spill] sm:$0xff]  ;;  %v4514_v53 = vcombine.low %v9407_v27, %v9388_v34  ;;  %v3290_v63 = vcombine.low %v3225_v33, %v3241_v6  ;;  %v11274_v27 = vld [vmem:[#allocation16_spill] sm:$0xff] }
 0x4e7   : > { %v9366_v0 = vpop.permute.xlu1 %2832  ;;  %11252 = vst [vmem:[#allocation56_spill] sm:$0xff] %v9369_v10  ;;  %v9372_v16 = vpop.permute.xlu0 %2846  ;;  %v4513_v1 = vrot.slane %v4499_v5, %v7529_v39  ;;  %v3339_v5 = vcombine.high %v11264_v18, %v11263_v41  ;;  %v4546_v17 = vcombine.low %v9392_v30, %v9369_v10  ;;  %v3291_v48 = vcombine.high %v3225_v33, %v3241_v6  ;;  %v11281_v6 = vld [vmem:[#allocation26_spill] sm:$0xff] }
 0x4e8   : > { %11244 = vst [vmem:[#allocation11_spill] sm:$0xff] %v9354_v44  ;;  %11253 = vst [vmem:[#allocation51_spill] sm:$0xff] %v9372_v16  ;;  %v9451_v62 = vrot.slane %v3322_v56, %v7529_v39  ;;  %v11278_v56 = vcombine.high %v11172_v61, %v8863_v9 }
 0x4e9   : > { %3046 = vrot.lane.b32.xlu1 %v11260_v55, %s6963_s14  ;;  %6609 = vrot.lane.b32.xlu0 %v6608_v40, %s6967_s8  ;;  %v11267_v40 = vld [vmem:[#allocation14_spill] sm:$0xff]  ;;  %v4564_v16 = vcombine.low %v4513_v1, %v4545_v50  ;;  %v9443_v30 = vrot.slane %v4546_v17, %v7529_v39  ;;  %v4565_v43 = vcombine.high %v4513_v1, %v4545_v50 }
 0x4ea   : > { %v11269_v11 = vcombine.high %v11267_v40, %v11268_v59  ;;  %v11271_v40 = vld [vmem:[#allocation25_spill] sm:$0xff]  ;;  %v3340_v59 = vcombine.low %v3289_v25, %v9400_v36  ;;  %v3323_v17 = vcombine.high %v3257_v37, %v9381_v38  ;;  %v9474_v1 = vrot.slane %v3290_v63, %v7529_v39 }
 0x4eb   : > { %v9402_v46 = vpop.permute.xlu1 %2836  ;;  %v9411_v58 = vpop.permute.xlu0 %2852  ;;  %v11272_v41 = vcombine.high %v11270_v4, %v11271_v40  ;;  %v4619_v38 = vcombine.high %v9213_v20, %v9291_v26  ;;  %v11284_v26 = vcombine.high %v8869_v28, %v8819_v8  ;;  %v4587_v8 = vcombine.high %v9145_v3, %v9169_v29  ;;  %v11288_v63 = vld [vmem:[#allocation73_spill] sm:$0xff] }
 0x4ec   : > { %11266 = vst [vmem:[#allocation67_spill] sm:$0xff] %v9411_v58  ;;  %v6638_v22 = vpack.i.bf16 %v4563_v23, %v11269_v11  ;;  %v9462_v11 = vrot.slane %v4514_v53, %v7529_v39  ;;  %v4635_v28 = vcombine.high %v9308_v57, %v9289_v21 }
 0x4ed   : > { %3054 = vrot.lane.b32.xlu1 %v8620_v7, %s6963_s14  ;;  %v6568_v18 = vpack.i.bf16 %v3339_v5, %v11272_v41  ;;  %v9454_v41 = vrot.slane %v3923_v19, %v7280_v51  ;;  %v9457_v5 = vrot.slane %v3907_v54, %v7280_v51  ;;  %v11280_v19 = vld [vmem:[#allocation19_spill] sm:$0xff]  ;;  %v4667_v54 = vcombine.high %v9316_v45, %v9319_v13  ;;  %v11285_v13 = vld [vmem:[#allocation10_spill] sm:$0xff] }
 0x4ee   : > { %6639 = vrot.lane.b32.xlu0 %v6638_v22, %s6965_s15  ;;  %v11273_v22 = vld [vmem:[#allocation15_spill] sm:$0xff]  ;;  %v11282_v37 = vcombine.low %v11280_v19, %v11281_v6  ;;  %v4566_v20 = vcombine.low %v9462_v11, %v9443_v30  ;;  %v4603_v45 = vcombine.high %v9189_v32, %v9248_v49  ;;  %v3343_v32 = vcombine.high %v9474_v1, %v9451_v62 }
 0x4ef   : > { %v9434_v23 = vpop.permute.xlu1 %2840  ;;  %v9445_v10 = vpop.permute.xlu0 %2876  ;;  %v11275_v2 = vcombine.low %v11273_v22, %v11274_v27  ;;  %11276 = vst [vmem:[#allocation69_spill] sm:$0xff] %v9454_v41  ;;  %11277 = vst [vmem:[#allocation65_spill] sm:$0xff] %v9457_v5  ;;  %v11283_v9 = vcombine.high %v11273_v22, %v11274_v27  ;;  %v4571_v49 = vcombine.high %v9129_v31, %v9155_v12  ;;  %v11291_v31 = vld [vmem:[#allocation27_spill] sm:$0xff]  ;;  %v11292_v12 = vld [vmem:[#allocation28_spill] sm:$0xff] }
 0x4f0   : > { %v6573_v33 = vpack.i.bf16 %v3340_v59, %v11282_v37  ;;  %v9510_v59 = vrot.slane %v3323_v17, %v7529_v39  ;;  %v9524_v17 = vrot.slane %v4619_v38, %v7280_v51  ;;  %v11290_v29 = vcombine.high %v11280_v19, %v11281_v6  ;;  %v11296_v19 = vld [vmem:[#allocation74_spill] sm:$0xff] }
 0x4f1   : > { %v6643_v34 = vpack.i.bf16 %v4564_v16, %v11275_v2  ;;  %6569 = vrot.lane.b32.xlu1 %v6568_v18, %s6965_s15  ;;  %v9471_v16 = vrot.slane %v11278_v56, %v7529_v39  ;;  %v6648_v53 = vpack.i.bf16 %v4565_v43, %v11283_v9  ;;  %v9497_v2 = vrot.slane %v11284_v26, %v7529_v39  ;;  %v11295_v9 = vld [vmem:[#allocation64_spill] sm:$0xff]  ;;  %v11297_v6 = vld [vmem:[#allocation70_spill] sm:$0xff] }
 0x4f2   : > { %v3342_v43 = vcombine.low %v9474_v1, %v9451_v62  ;;  %v9532_v21 = vrot.slane %v4667_v54, %v7529_v39  ;;  %v4858_v62 = vcombine.low %v9366_v0, %v9434_v23  ;;  %v11293_v1 = vcombine.low %v11291_v31, %v11292_v12  ;;  %v11298_v26 = vld [vmem:[#allocation20_spill] sm:$0xff] }
 0x4f3   : > { %6644 = vrot.lane.b32.xlu0 %v6643_v34, %s6966_s16  ;;  %v9478_v18 = vpop.permute.xlu1 %2844  ;;  %v3341_v34 = vcombine.high %v3289_v25, %v9400_v36  ;;  %v9486_v61 = vpop.permute.xlu0 %2884  ;;  %v9500_v25 = vrot.slane %v3291_v48, %v7529_v39  ;;  %v11286_v36 = vld [vmem:[#allocation43_spill] sm:$0xff]  ;;  %v4699_v38 = vcombine.high %v9364_v15, %v9354_v44  ;;  %v9548_v54 = vrot.slane %v4603_v45, %v7280_v51  ;;  %v11301_v45 = vld [vmem:[#allocation66_spill] sm:$0xff] }
 0x4f4   : > { %11279 = vst [vmem:[#allocation60_spill] sm:$0xff] %v9478_v18  ;;  %v4835_v27 = vcombine.high %v11286_v36, %v11285_v13  ;;  %v11287_v48 = vld [vmem:[#allocation75_spill] sm:$0xff]  ;;  %v6653_v37 = vpack.i.bf16 %v4566_v20, %v11293_v1  ;;  %v9555_v20 = vrot.slane %v4587_v8, %v7280_v51  ;;  %v4649_v1 = vrot.slane %v4635_v28, %v7529_v39 }
 0x4f5   : > { %6574 = vrot.lane.b32.xlu1 %v6573_v33, %s6966_s16  ;;  %v3395_v22 = vcombine.high %v11288_v63, %v11287_v48  ;;  %v6578_v3 = vpack.i.bf16 %v3341_v34, %v11290_v29  ;;  %v11294_v33 = vld [vmem:[#allocation68_spill] sm:$0xff]  ;;  %v3379_v34 = vcombine.high %v11297_v6, %v11296_v19  ;;  %v11299_v48 = vld [vmem:[#allocation29_spill] sm:$0xff]  ;;  %v9566_v6 = vrot.slane %v4571_v49, %v7280_v51 }
 0x4f6   : > { %v11300_v63 = vcombine.low %v11298_v26, %v11299_v48  ;;  %v11302_v19 = vld [vmem:[#allocation61_spill] sm:$0xff]  ;;  %v4682_v8 = vcombine.low %v9548_v54, %v9524_v17  ;;  %v4700_v49 = vcombine.low %v4649_v1, %v9532_v21  ;;  %v3344_v44 = vcombine.low %v9500_v25, %v9510_v59 }
 0x4f7   : > { %6649 = vrot.lane.b32.xlu0 %v6648_v53, %s6967_s8  ;;  %v9526_v56 = vpop.permute.xlu1 %2848  ;;  %v9536_v57 = vpop.permute.xlu0 %2892  ;;  %v3363_v53 = vcombine.high %v11295_v9, %v11294_v33  ;;  %v4842_v33 = vcombine.low %v9331_v14, %v9402_v46  ;;  %v4874_v9 = vcombine.low %v9478_v18, %v9411_v58  ;;  %v4650_v15 = vcombine.low %v9566_v6, %v9555_v20  ;;  %v11340_v18 = vld [vmem:[#allocation18_spill] sm:$0xff] }
 0x4f8   : > { %11289 = vst [vmem:[#allocation53_spill] sm:$0xff] %v9526_v56  ;;  %v6583_v29 = vpack.i.bf16 %v3342_v43, %v11300_v63  ;;  %v9569_v43 = vrot.slane %v3395_v22, %v7280_v51  ;;  %v9576_v63 = vrot.slane %v4858_v62, %v7280_v51  ;;  %v9587_v22 = vrot.slane %v3379_v34, %v7280_v51 }
 0x4f9   : > { %6579 = vrot.lane.b32.xlu1 %v6578_v3, %s6967_s8  ;;  %v3347_v3 = vcombine.high %v11302_v19, %v11301_v45  ;;  %v6658_v45 = vpack.i.bf16 %v4835_v27, %v4699_v38  ;;  %v9584_v19 = vrot.slane %v3363_v53, %v7280_v51  ;;  %v4836_v62 = vcombine.low %v9471_v16, %v9497_v2 }
 0x4fa   : > { %v9597_v27 = vrot.slane %v4842_v33, %v7280_v51  ;;  %v9600_v38 = vrot.slane %v4874_v9, %v7280_v51  ;;  %v9612_v13 = vrot.slane %v4682_v8, %v7529_v39  ;;  %v11307_v33 = vcombine.high %v11298_v26, %v11299_v48 }
 0x4fb   : > { %6654 = vrot.lane.b32.xlu0 %v6653_v37, %s6968_s7  ;;  %v9573_v28 = vpop.permute.xlu1 %2856  ;;  %v9578_v50 = vpop.permute.xlu0 %2900  ;;  %v9607_v34 = vrot.slane %v3347_v3, %v7280_v51  ;;  %v6668_v40 = vpack.i.bf16 %v4836_v62, %v4700_v49  ;;  %v4701_v4 = vcombine.high %v4649_v1, %v9532_v21  ;;  %v3939_v26 = vcombine.high %v11260_v55, %v8620_v7  ;;  %v11311_v1 = vld [vmem:[#allocation88_spill] sm:$0xff] }
 0x4fc   : > { %11303 = vst [vmem:[#allocation49_spill] sm:$0xff] %v9573_v28  ;;  %v4890_v37 = vcombine.low %v9526_v56, %v9573_v28  ;;  %11304 = vst [vmem:[#allocation52_spill] sm:$0xff] %v9600_v38  ;;  %v6593_v9 = vpack.i.bf16 %v3343_v32, %v11307_v33  ;;  %v9636_v48 = vrot.slane %v4650_v15, %v7529_v39 }
 0x4fd   : > { %6584 = vrot.lane.b32.xlu1 %v6583_v29, %s6968_s7  ;;  %v3458_v29 = vcombine.low %v9587_v22, %v9569_v43  ;;  %v3426_v8 = vcombine.low %v9607_v34, %v9584_v19  ;;  %v4837_v21 = vcombine.high %v9471_v16, %v9497_v2  ;;  %v11312_v62 = vcombine.low %v9281_v35, %v11311_v1 }
 0x4fe   : > { %v9603_v53 = vrot.slane %v4890_v37, %v7280_v51  ;;  %v4906_v37 = vcombine.low %v9597_v27, %v9576_v63  ;;  %v11313_v7 = vcombine.high %v8786_v42, %v8760_v24  ;;  %v3345_v2 = vcombine.high %v9500_v25, %v9510_v59  ;;  %v11321_v42 = vld [vmem:[#allocation83_spill] sm:$0xff] }
 0x4ff   : > { %6659 = vrot.lane.b32.xlu0 %v6658_v45, %s6965_s15  ;;  %v9614_v36 = vpop.permute.xlu1 %2880  ;;  %v9623_v3 = vpop.permute.xlu0 %2850  ;;  %v9648_v33 = vrot.slane %v11312_v62, %v7529_v39  ;;  %v3466_v55 = vrot.slane %v3458_v29, %v7529_v39  ;;  %v6678_v60 = vpack.i.bf16 %v4837_v21, %v4701_v4  ;;  %v4702_v24 = vcombine.low %v9636_v48, %v9612_v13  ;;  %v11322_v29 = vld [vmem:[#allocation79_spill] sm:$0xff]  ;;  %v11325_v4 = vld [vmem:[#allocation89_spill] sm:$0xff] }
 0x500   : > { %11305 = vst [vmem:[#allocation48_spill] sm:$0xff] %v9603_v53  ;;  %11306 = vst [vmem:[#allocation59_spill] sm:$0xff] %v9614_v36  ;;  %v4938_v45 = vcombine.low %v9600_v38, %v9603_v53  ;;  %v9654_v15 = vrot.slane %v11313_v7, %v7280_v51  ;;  %v9665_v62 = vrot.slane %v4906_v37, %v7529_v39  ;;  %v11333_v38 = vld [vmem:[#allocation77_spill] sm:$0xff] }
 0x501   : > { %6594 = vrot.lane.b32.xlu1 %v6593_v9, %s6969_s9  ;;  %v11323_v7 = vcombine.low %v11321_v42, %v11322_v29  ;;  %v9681_v59 = vrot.slane %v3939_v26, %v7280_v51 }
 0x502   : > { %v9639_v49 = vrot.slane %v4938_v45, %v7529_v39  ;;  %11314 = vst [vmem:[#allocation47_spill] sm:$0xff] %v9654_v15  ;;  %v11317_v45 = vld [vmem:[#allocation30_spill] sm:$0xff]  ;;  %11319 = vst [vmem:[#allocation55_spill] sm:$0xff] %v9665_v62 }
 0x503   : > { %6669 = vrot.lane.b32.xlu0 %v6668_v40, %s6966_s16  ;;  %v9657_v9 = vpop.permute.xlu1 %2888  ;;  %v11316_v40 = vld [vmem:[#allocation13_spill] sm:$0xff]  ;;  %v9667_v32 = vpop.permute.xlu0 %2874  ;;  %v9675_v47 = vrot.slane %v11323_v7, %v7529_v39  ;;  %11324 = vst [vmem:[#allocation22_spill] sm:$0xff] %v9681_v59  ;;  %v11343_v15 = vld [vmem:[#allocation54_spill] sm:$0xff] }
 0x504   : > { %11310 = vst [vmem:[#allocation58_spill] sm:$0xff] %v9639_v49  ;;  %11315 = vst [vmem:[#allocation21_spill] sm:$0xff] %v9657_v9  ;;  %v11318_v56 = vcombine.low %v11316_v40, %v11317_v45  ;;  %v4994_v7 = vcombine.low %v9614_v36, %v9657_v9 }
 0x505   : > { %11320 = vst [vmem:[#allocation57_spill] sm:$0xff] %v9667_v32 }
 0x506   : > { %v6603_v16 = vpack.i.bf16 %v3344_v44, %v11318_v56  ;;  %v3434_v44 = vrot.slane %v3426_v8, %v7529_v39  ;;  %v11326_v56 = vld [vmem:[#allocation91_spill] sm:$0xff]  ;;  %v4838_v8 = vcombine.low %v9675_v47, %v9648_v33 }
 0x507   : > { %v11327_v37 = vcombine.low %v11325_v4, %v11326_v56  ;;  %6679 = vrot.lane.b32.xlu0 %v6678_v60, %s6967_s8  ;;  %v9699_v25 = vpop.permute.xlu1 %2896  ;;  %v11334_v60 = vcombine.low %v11332_v52, %v11333_v38 }
 0x508   : > { %6604 = vrot.lane.b32.xlu1 %v6603_v16, %s6970_s10  ;;  %v3459_v16 = vcombine.high %v9587_v22, %v9569_v43  ;;  %11330 = vst [vmem:[#allocation15_spill] sm:$0xff] %v9699_v25  ;;  %v3478_v5 = vcombine.low %v3434_v44, %v3466_v55  ;;  %v4978_v43 = vcombine.low %v9445_v10, %v9486_v61  ;;  %v9714_v22 = vpop.permute.xlu0 %2882 }
 0x509   : > { %v3602_v21 = vrot.slane %v11327_v37, %v7529_v39  ;;  %v11331_v37 = vcombine.high %v11316_v40, %v11317_v45  ;;  %v3570_v53 = vrot.slane %v11334_v60, %v7529_v39  ;;  %v6688_v58 = vpack.i.bf16 %v4838_v8, %v4702_v24  ;;  %v11341_v45 = vld [vmem:[#allocation50_spill] sm:$0xff] }
 0x50a   : > { %v3427_v40 = vcombine.high %v9607_v34, %v9584_v19  ;;  %v5010_v24 = vcombine.low %v9536_v57, %v9578_v50  ;;  %v9732_v19 = vrot.slane %v4994_v7, %v7280_v51  ;;  %v4515_v36 = vcombine.high %v11341_v45, %v11340_v18  ;;  %v11342_v7 = vld [vmem:[#allocation56_spill] sm:$0xff] }
 0x50b   : > { %v6613_v28 = vpack.i.bf16 %v3345_v2, %v11331_v37  ;;  %v3614_v2 = vcombine.low %v3570_v53, %v3602_v21  ;;  %v11338_v37 = vcombine.high %v11325_v4, %v11326_v56  ;;  %6689 = vrot.lane.b32.xlu0 %v6688_v58, %s6968_s7  ;;  %v3473_v4 = vrot.slane %v3459_v16, %v7529_v39  ;;  %v9742_v56 = vpop.permute.xlu1 %2904 }
 0x50c   : > { %v3615_v9 = vcombine.high %v3570_v53, %v3602_v21  ;;  %v4547_v32 = vcombine.high %v11343_v15, %v11342_v7  ;;  %v9749_v58 = vrot.slane %v4978_v43, %v7280_v51  ;;  %v9751_v26 = vpop.permute.xlu0 %2890  ;;  %v9764_v15 = vrot.slane %v5010_v24, %v7280_v51  ;;  %v11345_v43 = vld [vmem:[#allocation87_spill] sm:$0xff] }
 0x50d   : > { %6614 = vrot.lane.b32.xlu1 %v6613_v28, %s6971_s11  ;;  %v9725_v60 = vrot.slane %v11338_v37, %v7529_v39  ;;  %v11339_v28 = vcombine.high %v11332_v52, %v11333_v38  ;;  %v6618_v8 = vpack.i.bf16 %v3614_v2, %v3478_v5  ;;  %v3479_v37 = vcombine.high %v3434_v44, %v3466_v55 }
 0x50e   : > { %v5026_v52 = vcombine.low %v9699_v25, %v9742_v56  ;;  %v3441_v38 = vrot.slane %v3427_v40, %v7529_v39  ;;  %v5042_v55 = vcombine.low %v9749_v58, %v9732_v19  ;;  %v11344_v21 = vcombine.high %v11321_v42, %v11322_v29  ;;  %v11346_v40 = vld [vmem:[#allocation82_spill] sm:$0xff] }
 0x50f   : > { %v9739_v34 = vrot.slane %v11339_v28, %v7529_v39  ;;  %v3634_v45 = vcombine.low %v11346_v40, %v11345_v43  ;;  %v9779_v2 = vpop.permute.xlu1 %2854  ;;  %v11347_v28 = vcombine.high %v9281_v35, %v11311_v1  ;;  %v4561_v7 = vrot.slane %v4547_v32, %v7529_v39  ;;  %v11350_v1 = vld [vmem:[#allocation93_spill] sm:$0xff] }
 0x510   : > { %v9769_v44 = vrot.slane %v5026_v52, %v7280_v51  ;;  %v9775_v16 = vrot.slane %v11344_v21, %v7529_v39  ;;  %v3480_v24 = vcombine.low %v3441_v38, %v3473_v4  ;;  %v3635_v42 = vcombine.high %v11346_v40, %v11345_v43  ;;  %v9793_v52 = vpop.permute.xlu0 %2898 }
 0x511   : > { %6619 = vrot.lane.b32.xlu1 %v6618_v8, %s6968_s7  ;;  %v3616_v5 = vcombine.low %v9739_v34, %v9725_v60  ;;  %v3617_v18 = vcombine.high %v9739_v34, %v9725_v60  ;;  %v6623_v60 = vpack.i.bf16 %v3615_v9, %v3479_v37  ;;  %v9785_v34 = vrot.slane %v11347_v28, %v7529_v39  ;;  %v11348_v9 = vld [vmem:[#allocation85_spill] sm:$0xff]  ;;  %v11349_v37 = vld [vmem:[#allocation76_spill] sm:$0xff] }
 0x512   : > { %v4529_v8 = vrot.slane %v4515_v36, %v7529_v39  ;;  %v5074_v29 = vcombine.low %v9764_v15, %v9769_v44  ;;  %v3618_v21 = vcombine.low %v11349_v37, %v11348_v9  ;;  %v4683_v35 = vcombine.high %v9548_v54, %v9524_v17  ;;  %v11351_v36 = vld [vmem:[#allocation51_spill] sm:$0xff] }
 0x513   : > { %v3650_v28 = vcombine.low %v11350_v1, %v9623_v3  ;;  %v3666_v32 = vcombine.low %v11351_v36, %v9779_v2  ;;  %v4651_v43 = vcombine.high %v9566_v6, %v9555_v20  ;;  %v3619_v40 = vcombine.high %v11349_v37, %v11348_v9  ;;  %v9818_v41 = vpop.permute.xlu1 %2878 }
 0x514   : > { %v9809_v53 = vrot.slane %v5042_v55, %v7529_v39  ;;  %v9812_v59 = vrot.slane %v5074_v29, %v7529_v39  ;;  %v3642_v17 = vrot.slane %v3634_v45, %v7280_v51  ;;  %v3481_v25 = vcombine.high %v3441_v38, %v3473_v4  ;;  %v9823_v6 = vpop.permute.xlu0 %2980 }
 0x515   : > { %6624 = vrot.lane.b32.xlu1 %v6623_v60, %s6969_s9  ;;  %v9816_v54 = vrot.slane %v3666_v32, %v7280_v51  ;;  %v6628_v60 = vpack.i.bf16 %v3616_v5, %v3480_v24  ;;  %v9821_v20 = vrot.slane %v3635_v42, %v7280_v51  ;;  %v4971_v55 = vcombine.high %v9665_v62, %v9639_v49 }
 0x516   : > { %11352 = vst [vmem:[#allocation16_spill] sm:$0xff] %v9809_v53  ;;  %11353 = vst [vmem:[#allocation19_spill] sm:$0xff] %v9812_v59  ;;  %v5107_v29 = vcombine.high %v9809_v53, %v9812_v59  ;;  %v4567_v45 = vcombine.high %v9462_v11, %v9443_v30  ;;  %v3626_v9 = vrot.slane %v3618_v21, %v7280_v51 }
 0x517   : > { %v9833_v37 = vrot.slane %v4683_v35, %v7529_v39  ;;  %v9836_v4 = vrot.slane %v3650_v28, %v7280_v51  ;;  %v4568_v38 = vcombine.low %v4529_v8, %v4561_v7  ;;  %v9840_v5 = vrot.slane %v4651_v43, %v7529_v39  ;;  %v9847_v35 = vpop.permute.xlu1 %2886 }
 0x518   : > { %v9843_v24 = vrot.slane %v3619_v40, %v7280_v51  ;;  %v6708_v42 = vpack.i.bf16 %v5107_v29, %v4971_v55  ;;  %v4569_v32 = vcombine.high %v4529_v8, %v4561_v7  ;;  %v3682_v30 = vcombine.low %v3626_v9, %v3642_v17  ;;  %v9851_v49 = vpop.permute.xlu0 %2988  ;;  %v11355_v55 = vld [vmem:[#allocation67_spill] sm:$0xff]  ;;  %v11356_v29 = vld [vmem:[#allocation60_spill] sm:$0xff] }
 0x519   : > { %6629 = vrot.lane.b32.xlu1 %v6628_v60, %s6970_s10  ;;  %v3683_v11 = vcombine.high %v3626_v9, %v3642_v17  ;;  %v3714_v21 = vcombine.low %v9836_v4, %v9816_v54  ;;  %v6633_v28 = vpack.i.bf16 %v3617_v18, %v3481_v25  ;;  %v4703_v43 = vcombine.high %v9636_v48, %v9612_v13  ;;  %v11368_v7 = vld [vmem:[#allocation52_spill] sm:$0xff] }
 0x51a   : > { %v3698_v60 = vcombine.low %v9843_v24, %v9821_v20  ;;  %6709 = vrot.lane.b32.xlu0 %v6708_v42, %s6965_s15  ;;  %v4840_v8 = vcombine.low %v9775_v16, %v9785_v34  ;;  %v4843_v40 = vcombine.high %v9331_v14, %v9402_v46  ;;  %v4859_v25 = vcombine.high %v9366_v0, %v9434_v23  ;;  %v11357_v46 = vld [vmem:[#allocation39_spill] sm:$0xff]  ;;  %v11358_v0 = vld [vmem:[#allocation40_spill] sm:$0xff] }
 0x51b   : > { %v11354_v18 = vcombine.high %v11291_v31, %v11292_v12  ;;  %v4704_v13 = vcombine.low %v9840_v5, %v9833_v37  ;;  %v4907_v48 = vcombine.high %v9597_v27, %v9576_v63  ;;  %v4875_v9 = vcombine.high %v11356_v29, %v11355_v55  ;;  %v2895_v63 = vpop.permute.xlu1 %2894  ;;  %v11363_v55 = vld [vmem:[#allocation57_spill] sm:$0xff] }
 0x51c   : > { %v3770_v14 = vcombine.low %v9818_v41, %v9847_v35  ;;  %v11359_v23 = vcombine.low %v11357_v46, %v11358_v0  ;;  %v9883_v31 = vrot.slane %v3683_v11, %v7529_v39  ;;  %v9886_v12 = vrot.slane %v3714_v21, %v7529_v39  ;;  %v9896_v29 = vpop.permute.xlu0 %2996 }
 0x51d   : > { %6634 = vrot.lane.b32.xlu1 %v6633_v28, %s6971_s11  ;;  %v6663_v17 = vpack.i.bf16 %v4567_v45, %v11354_v18  ;;  %v9880_v28 = vrot.slane %v3682_v30, %v7529_v39  ;;  %v11362_v27 = vcombine.high %v11357_v46, %v11358_v0  ;;  %v9892_v18 = vrot.slane %v3698_v60, %v7529_v39  ;;  %v11366_v0 = vld [vmem:[#allocation53_spill] sm:$0xff] }
 0x51e   : > { %v6673_v42 = vpack.i.bf16 %v4568_v38, %v11359_v23  ;;  %11361 = vst [vmem:[#allocation75_spill] sm:$0xff] %v9886_v12  ;;  %v3754_v38 = vcombine.low %v11363_v55, %v9714_v22  ;;  %v11364_v30 = vcombine.high %v9675_v47, %v9648_v33  ;;  %v9906_v23 = vrot.slane %v4843_v40, %v7280_v51 }
 0x51f   : > { %11360 = vst [vmem:[#allocation26_spill] sm:$0xff] %v9880_v28  ;;  %v6683_v45 = vpack.i.bf16 %v4569_v32, %v11362_v27  ;;  %v9909_v32 = vrot.slane %v4859_v25, %v7280_v51  ;;  %v9914_v46 = vpack.i.bf16 %v4840_v8, %v4704_v13  ;;  %v9917_v47 = vrot.slane %v4907_v48, %v7529_v39  ;;  %v11365_v25 = vld [vmem:[#allocation49_spill] sm:$0xff]  ;;  %v2903_v8 = vpop.permute.xlu1 %2902 }
 0x520   : > { %v9901_v11 = vpack.i.bf16 %v11364_v30, %v4703_v43  ;;  %v9920_v33 = vrot.slane %v4875_v9, %v7280_v51  ;;  %v3786_v43 = vcombine.low %v9751_v26, %v9793_v52  ;;  %v9925_v40 = vrot.slane %v3770_v14, %v7280_v51  ;;  %v11367_v30 = vld [vmem:[#allocation48_spill] sm:$0xff]  ;;  %v9938_v14 = vpop.permute.xlu0 %3004 }
 0x521   : > { %6664 = vrot.lane.b32.xlu1 %v6663_v17, %s6969_s9  ;;  %v4891_v27 = vcombine.high %v11366_v0, %v11365_v25  ;;  %v4939_v17 = vcombine.high %v11368_v7, %v11367_v30  ;;  %v3651_v9 = vcombine.high %v11350_v1, %v9623_v3  ;;  %v3762_v21 = vrot.slane %v3754_v38, %v7280_v51 }
 0x522   : > { %v3802_v60 = vcombine.low %v2895_v63, %v2903_v8  ;;  %v3803_v62 = vcombine.high %v2895_v63, %v2903_v8  ;;  %v5011_v25 = vcombine.high %v9536_v57, %v9578_v50  ;;  %v3787_v7 = vcombine.high %v9751_v26, %v9793_v52 }
 0x523   : > { %v3667_v0 = vcombine.high %v11351_v36, %v9779_v2  ;;  %v3771_v30 = vcombine.high %v9818_v41, %v9847_v35  ;;  %v5075_v3 = vcombine.high %v9764_v15, %v9769_v44  ;;  %v3794_v1 = vrot.slane %v3786_v43, %v7280_v51  ;;  %v11369_v2 = vld [vmem:[#allocation15_spill] sm:$0xff]  ;;  %v9963_v36 = vpop.permute.xlu1 %2984 }
 0x524   : > { %v3818_v63 = vcombine.low %v3762_v21, %v9925_v40  ;;  %v3810_v50 = vrot.slane %v3802_v60, %v7280_v51  ;;  %v5043_v57 = vcombine.high %v9749_v58, %v9732_v19  ;;  %v3755_v26 = vcombine.high %v11363_v55, %v9714_v22  ;;  %v9974_v58 = vpop.permute.xlu0 %2978  ;;  %v11370_v22 = vld [vmem:[#allocation21_spill] sm:$0xff] }
 0x525   : > { %6674 = vrot.lane.b32.xlu1 %v6673_v42, %s6970_s10  ;;  %v5027_v41 = vcombine.high %v11369_v2, %v9742_v56  ;;  %v9961_v52 = vrot.slane %v3803_v62, %v7280_v51  ;;  %v9966_v15 = vrot.slane %v4891_v27, %v7280_v51  ;;  %v9969_v44 = vrot.slane %v4939_v17, %v7529_v39  ;;  %v11371_v42 = vld [vmem:[#allocation59_spill] sm:$0xff] }
 0x526   : > { %v9972_v35 = vrot.slane %v3651_v9, %v7280_v51  ;;  %v3850_v19 = vcombine.low %v3794_v1, %v3810_v50  ;;  %v4995_v56 = vcombine.high %v11371_v42, %v11370_v22  ;;  %v9979_v62 = vrot.slane %v3787_v7, %v7280_v51 }
 0x527   : > { %v9982_v55 = vrot.slane %v3667_v0, %v7280_v51  ;;  %v9985_v38 = vrot.slane %v3771_v30, %v7280_v51  ;;  %v9989_v60 = vrot.slane %v5075_v3, %v7529_v39  ;;  %v9992_v43 = vrot.slane %v3818_v63, %v7529_v39  ;;  %v10008_v0 = vpop.permute.xlu1 %2992 }
 0x528   : > { %v3851_v27 = vcombine.high %v3794_v1, %v3810_v50  ;;  %v9995_v17 = vrot.slane %v3850_v19, %v7529_v39  ;;  %v9998_v8 = vrot.slane %v5043_v57, %v7529_v39  ;;  %v10001_v9 = vrot.slane %v3755_v26, %v7280_v51  ;;  %v10013_v1 = vpop.permute.xlu0 %2986 }
 0x529   : > { %6684 = vrot.lane.b32.xlu1 %v6683_v45, %s6971_s11  ;;  %11372 = vst [vmem:[#allocation73_spill] sm:$0xff] %v9992_v43  ;;  %v10004_v7 = vrot.slane %v5027_v41, %v7280_v51  ;;  %v3866_v45 = vcombine.low %v9979_v62, %v9961_v52  ;;  %v3715_v30 = vcombine.high %v9836_v4, %v9816_v54 }
 0x52a   : > { %11373 = vst [vmem:[#allocation27_spill] sm:$0xff] %v9995_v17  ;;  %v3819_v3 = vcombine.high %v3762_v21, %v9925_v40  ;;  %v3747_v63 = vcombine.high %v9880_v28, %v9886_v12  ;;  %v3883_v50 = vcombine.high %v9992_v43, %v9995_v17  ;;  %v10020_v57 = vrot.slane %v5011_v25, %v7280_v51 }
 0x52b   : > { %v10023_v26 = vrot.slane %v4995_v56, %v7280_v51  ;;  %v3730_v2 = vcombine.low %v9972_v35, %v9982_v55  ;;  %v3834_v54 = vcombine.low %v10001_v9, %v9985_v38  ;;  %v10032_v4 = vrot.slane %v3851_v27, %v7529_v39  ;;  %v10051_v56 = vpop.permute.xlu1 %3000 }
 0x52c   : > { %v5266_v21 = vcombine.low %v9963_v36, %v10008_v0  ;;  %v6713_v40 = vpack.i.bf16 %v3883_v50, %v3747_v63  ;;  %v5108_v25 = vcombine.low %v9998_v8, %v9989_v60  ;;  %v11374_v41 = vcombine.high %v9445_v10, %v9486_v61  ;;  %v10061_v61 = vpop.permute.xlu0 %2994 }
 0x52d   : > { %6694 = vrot.lane.b32.xlu1 %v9901_v11, %s6969_s9  ;;  %v4954_v22 = vcombine.low %v9920_v33, %v9966_v15  ;;  %v5090_v11 = vcombine.low %v10020_v57, %v10004_v7  ;;  %v10049_v42 = vrot.slane %v3866_v45, %v7529_v39  ;;  %v10054_v27 = vrot.slane %v3715_v30, %v7529_v39 }
 0x52e   : > { %v10042_v19 = vrot.slane %v11374_v41, %v7280_v51  ;;  %v5250_v63 = vcombine.low %v9823_v6, %v9851_v49  ;;  %v10059_v10 = vrot.slane %v3819_v3, %v7529_v39  ;;  %6714 = vrot.lane.b32.xlu0 %v6713_v40, %s6965_s15  ;;  %v4972_v50 = vcombine.low %v9917_v47, %v9969_v44 }
 0x52f   : > { %v10069_v41 = vrot.slane %v3730_v2, %v7529_v39  ;;  %v10072_v30 = vrot.slane %v3834_v54, %v7529_v39  ;;  %v5282_v40 = vcombine.low %v9896_v29, %v9938_v14  ;;  %v10081_v48 = vrot.slane %v5266_v21, %v7280_v51 }
 0x530   : > { %v5058_v45 = vcombine.low %v10042_v19, %v10023_v26  ;;  %v6718_v13 = vpack.i.bf16 %v5108_v25, %v4972_v50  ;;  %v3884_v2 = vcombine.low %v10059_v10, %v10032_v4  ;;  %v4922_v54 = vcombine.low %v9906_v23, %v9909_v32  ;;  %v10103_v43 = vpop.permute.xlu0 %3002 }
 0x531   : > { %6699 = vrot.lane.b32.xlu1 %v9914_v46, %s6970_s10  ;;  %v10088_v12 = vrot.slane %v5090_v11, %v7529_v39  ;;  %v10090_v46 = vpop.permute.xlu1 %3008  ;;  %v11375_v3 = vcombine.high %v9840_v5, %v9833_v37  ;;  %v11376_v17 = vcombine.high %v9775_v16, %v9785_v34  ;;  %v3886_v25 = vcombine.low %v10072_v30, %v10049_v42  ;;  %v11377_v5 = vld [vmem:[#allocation38_spill] sm:$0xff] }
 0x532   : > { %v10101_v50 = vrot.slane %v5250_v63, %v7280_v51  ;;  %v5298_v11 = vcombine.low %v10051_v56, %v10090_v46  ;;  %6719 = vrot.lane.b32.xlu0 %v6718_v13, %s6966_s16  ;;  %v3748_v37 = vcombine.low %v9883_v31, %v10054_v27  ;;  %v11378_v16 = vld [vmem:[#allocation34_spill] sm:$0xff]  ;;  %v10120_v63 = vrot.slane %v5058_v45, %v7529_v39 }
 0x533   : > { %v6703_v21 = vpack.i.bf16 %v11376_v17, %v11375_v3  ;;  %v11379_v34 = vcombine.high %v11377_v5, %v11378_v16  ;;  %v10117_v3 = vrot.slane %v4954_v22, %v7529_v39  ;;  %v3750_v13 = vcombine.low %v9892_v18, %v10069_v41 }
 0x534   : > { %v5109_v28 = vcombine.high %v9998_v8, %v9989_v60  ;;  %v10128_v59 = vrot.slane %v5282_v40, %v7280_v51  ;;  %v5314_v5 = vcombine.low %v10101_v50, %v10081_v48  ;;  %v10133_v22 = vrot.slane %v5298_v11, %v7280_v51  ;;  %v10146_v11 = vpop.permute.xlu0 %3028 }
 0x535   : > { %v10114_v17 = vrot.slane %v11379_v34, %v7529_v39  ;;  %6704 = vrot.lane.b32.xlu1 %v6703_v21, %s6971_s11  ;;  %v6723_v16 = vpack.i.bf16 %v3884_v2, %v3748_v37  ;;  %v4930_v45 = vrot.slane %v4922_v54, %v7529_v39  ;;  %v5091_v21 = vcombine.high %v10020_v57, %v10004_v7  ;;  %v10138_v34 = vpop.permute.xlu1 %2982  ;;  %v11381_v7 = vld [vmem:[#allocation33_spill] sm:$0xff]  ;;  %v11382_v57 = vld [vmem:[#allocation31_spill] sm:$0xff] }
 0x536   : > { %v6743_v53 = vpack.i.bf16 %v3886_v25, %v3750_v13  ;;  %v5111_v60 = vcombine.high %v10120_v63, %v10088_v12  ;;  %v4955_v8 = vcombine.high %v9920_v33, %v9966_v15  ;;  %v5346_v40 = vcombine.low %v10128_v59, %v10133_v22  ;;  %11380 = vst [vmem:[#allocation28_spill] sm:$0xff] %v10146_v11  ;;  %v11384_v13 = vld [vmem:[#allocation12_spill] sm:$0xff] }
 0x537   : > { %6724 = vrot.lane.b32.xlu0 %v6723_v16, %s6966_s16  ;;  %v4973_v2 = vcombine.high %v9917_v47, %v9969_v44  ;;  %v11383_v54 = vcombine.high %v11381_v7, %v11382_v57  ;;  %v4923_v37 = vcombine.high %v9906_v23, %v9909_v32  ;;  %v5059_v33 = vcombine.high %v10042_v19, %v10023_v26  ;;  %v11385_v16 = vld [vmem:[#allocation44_spill] sm:$0xff] }
 0x538   : > { %v4975_v15 = vcombine.high %v4930_v45, %v10117_v3  ;;  %v5243_v11 = vcombine.high %v11385_v16, %v11384_v13  ;;  %v10166_v47 = vrot.slane %v5314_v5, %v7529_v39  ;;  %v10169_v44 = vrot.slane %v5346_v40, %v7529_v39 }
 0x539   : > { %v10155_v25 = vrot.slane %v11383_v54, %v7529_v39  ;;  %6744 = vrot.lane.b32.xlu1 %v6743_v53, %s6968_s7  ;;  %v6728_v7 = vpack.i.bf16 %v5109_v28, %v4973_v2  ;;  %v3885_v23 = vcombine.high %v10059_v10, %v10032_v4  ;;  %v10174_v32 = vrot.slane %v5091_v21, %v7529_v39  ;;  %v2991_v26 = vpop.permute.xlu1 %2990  ;;  %v10187_v10 = vpop.permute.xlu0 %3036 }
 0x53a   : > { %v3867_v53 = vcombine.high %v9979_v62, %v9961_v52  ;;  %v6753_v19 = vpack.i.bf16 %v5111_v60, %v4975_v15  ;;  %v3887_v57 = vcombine.high %v10072_v30, %v10049_v42  ;;  %v10181_v5 = vrot.slane %v4955_v8, %v7529_v39  ;;  %v11387_v8 = vld [vmem:[#allocation45_spill] sm:$0xff] }
 0x53b   : > { %v3731_v28 = vcombine.high %v9972_v35, %v9982_v55  ;;  %v5378_v4 = vcombine.low %v10166_v47, %v10169_v44  ;;  %6729 = vrot.lane.b32.xlu0 %v6728_v7, %s6967_s8  ;;  %v3749_v52 = vcombine.high %v9883_v31, %v10054_v27  ;;  %v3699_v62 = vcombine.high %v9843_v24, %v9821_v20 }
 0x53c   : > { %v10195_v42 = vrot.slane %v5059_v33, %v7529_v39  ;;  %v3835_v30 = vcombine.high %v10001_v9, %v9985_v38  ;;  %v3751_v35 = vcombine.high %v9892_v18, %v10069_v41  ;;  %v10203_v55 = vrot.slane %v4923_v37, %v7529_v39  ;;  %v11386_v9 = vld [vmem:[#allocation24_spill] sm:$0xff] }
 0x53d   : > { %6754 = vrot.lane.b32.xlu1 %v6753_v19, %s6969_s9  ;;  %v4042_v21 = vcombine.low %v10138_v34, %v2991_v26  ;;  %v6733_v31 = vpack.i.bf16 %v3885_v23, %v3749_v52  ;;  %v5110_v20 = vcombine.low %v10120_v63, %v10088_v12  ;;  %v10209_v24 = vrot.slane %v3867_v53, %v7529_v39  ;;  %v2999_v27 = vpop.permute.xlu1 %2998  ;;  %v10220_v2 = vpop.permute.xlu0 %3044 }
 0x53e   : > { %v6763_v60 = vpack.i.bf16 %v3887_v57, %v3751_v35  ;;  %v5112_v38 = vcombine.low %v10195_v42, %v10174_v32  ;;  %v4019_v18 = vcombine.high %v11387_v8, %v11386_v9  ;;  %v10216_v41 = vrot.slane %v3731_v28, %v7529_v39 }
 0x53f   : > { %v4026_v40 = vcombine.low %v9974_v58, %v10013_v1  ;;  %6734 = vrot.lane.b32.xlu0 %v6733_v31, %s6967_s8  ;;  %v4974_v12 = vcombine.low %v4930_v45, %v10117_v3  ;;  %v4976_v63 = vcombine.low %v10203_v55, %v10181_v5  ;;  %v10227_v54 = vrot.slane %v3835_v30, %v7529_v39 }
 0x540   : > { %v4058_v37 = vcombine.low %v10061_v61, %v10103_v43  ;;  %v4059_v33 = vcombine.high %v10061_v61, %v10103_v43  ;;  %v4043_v15 = vcombine.high %v10138_v34, %v2991_v26  ;;  %v10236_v7 = vrot.slane %v3699_v62, %v7529_v39 }
 0x541   : > { %6764 = vrot.lane.b32.xlu1 %v6763_v60, %s6969_s9  ;;  %v10239_v3 = vrot.slane %v4042_v21, %v7280_v51  ;;  %v6738_v45 = vpack.i.bf16 %v5110_v20, %v4974_v12  ;;  %v5379_v23 = vcombine.high %v10166_v47, %v10169_v44  ;;  %v4027_v53 = vcombine.high %v9974_v58, %v10013_v1  ;;  %v3007_v19 = vpop.permute.xlu1 %3006  ;;  %v10250_v26 = vpop.permute.xlu0 %3052  ;;  %v11389_v12 = vld [vmem:[#allocation65_spill] sm:$0xff] }
 0x542   : > { %v6773_v57 = vpack.i.bf16 %v5112_v38, %v4976_v63  ;;  %v3888_v43 = vcombine.low %v10227_v54, %v10209_v24  ;;  %v5244_v61 = vcombine.low %v10114_v17, %v10155_v25  ;;  %v4034_v34 = vrot.slane %v4026_v40, %v7280_v51  ;;  %v11388_v40 = vld [vmem:[#allocation86_spill] sm:$0xff] }
 0x543   : > { %v4074_v28 = vcombine.low %v2999_v27, %v3007_v19  ;;  %v4075_v52 = vcombine.high %v2999_v27, %v3007_v19  ;;  %6739 = vrot.lane.b32.xlu0 %v6738_v45, %s6968_s7  ;;  %v3752_v62 = vcombine.low %v10236_v7, %v10216_v41  ;;  %v4066_v58 = vrot.slane %v4058_v37, %v7280_v51 }
 0x544   : > { %v10257_v1 = vrot.slane %v4059_v33, %v7280_v51  ;;  %v5347_v30 = vcombine.high %v10128_v59, %v10133_v22  ;;  %v10262_v35 = vrot.slane %v4043_v15, %v7280_v51  ;;  %v4090_v21 = vcombine.low %v4034_v34, %v10239_v3 }
 0x545   : > { %6774 = vrot.lane.b32.xlu1 %v6773_v57, %s6970_s10  ;;  %v4082_v31 = vrot.slane %v4074_v28, %v7280_v51  ;;  %v10268_v20 = vrot.slane %v4075_v52, %v7280_v51  ;;  %v6748_v27 = vpack.i.bf16 %v5379_v23, %v5243_v11  ;;  %v10274_v60 = vrot.slane %v4027_v53, %v7280_v51  ;;  %v10276_v59 = vpop.permute.xlu1 %3032  ;;  %v10290_v45 = vpop.permute.xlu0 %3026  ;;  %v11391_v23 = vld [vmem:[#allocation69_spill] sm:$0xff] }
 0x546   : > { %v6783_v22 = vpack.i.bf16 %v3888_v43, %v3752_v62  ;;  %v5113_v38 = vcombine.high %v10195_v42, %v10174_v32  ;;  %v11390_v63 = vcombine.low %v11388_v40, %v11389_v12  ;;  %v5315_v33 = vcombine.high %v10101_v50, %v10081_v48  ;;  %v11392_v32 = vld [vmem:[#allocation22_spill] sm:$0xff]  ;;  %v11394_v57 = vld [vmem:[#allocation41_spill] sm:$0xff]  ;;  %v11395_v43 = vld [vmem:[#allocation36_spill] sm:$0xff] }
 0x547   : > { %v4122_v15 = vcombine.low %v4066_v58, %v4082_v31  ;;  %v4138_v11 = vcombine.low %v10257_v1, %v10268_v20  ;;  %6749 = vrot.lane.b32.xlu0 %v6748_v27, %s6965_s15  ;;  %v11393_v42 = vcombine.low %v11391_v23, %v11392_v32  ;;  %v5299_v19 = vcombine.high %v10051_v56, %v10090_v46 }
 0x548   : > { %v10284_v37 = vrot.slane %v11390_v63, %v7529_v39  ;;  %v4106_v48 = vcombine.low %v10274_v60, %v10262_v35  ;;  %v4977_v50 = vcombine.high %v10203_v55, %v10181_v5  ;;  %v11396_v28 = vcombine.high %v11394_v57, %v11395_v43 }
 0x549   : > { %v10297_v53 = vrot.slane %v11393_v42, %v7529_v39  ;;  %6784 = vrot.lane.b32.xlu1 %v6783_v22, %s6970_s10  ;;  %v10313_v62 = vrot.slane %v5347_v30, %v7529_v39  ;;  %v10316_v27 = vrot.slane %v4090_v21, %v7529_v39  ;;  %v4123_v56 = vcombine.high %v4066_v58, %v4082_v31  ;;  %v10324_v55 = vpop.permute.xlu1 %3040  ;;  %v10334_v31 = vpop.permute.xlu0 %3034 }
 0x54a   : > { %v10310_v52 = vrot.slane %v11396_v28, %v7529_v39  ;;  %v10319_v46 = vrot.slane %v4122_v15, %v7529_v39  ;;  %v5283_v22 = vcombine.high %v9896_v29, %v9938_v14  ;;  %v4146_v5 = vrot.slane %v4138_v11, %v7529_v39 }
 0x54b   : > { %v6793_v63 = vpack.i.bf16 %v5113_v38, %v4977_v50  ;;  %v3889_v42 = vcombine.high %v10227_v54, %v10209_v24  ;;  %v10329_v30 = vrot.slane %v5315_v33, %v7529_v39  ;;  %v4091_v21 = vcombine.high %v4034_v34, %v10239_v3 }
 0x54c   : > { %v4154_v58 = vcombine.low %v10316_v27, %v10319_v46  ;;  %v4155_v29 = vcombine.high %v10316_v27, %v10319_v46  ;;  %v5251_v14 = vcombine.high %v9823_v6, %v9851_v49  ;;  %v5267_v38 = vcombine.high %v9963_v36, %v10008_v0 }
 0x54d   : > { %v4114_v24 = vrot.slane %v4106_v48, %v7529_v39  ;;  %6794 = vrot.lane.b32.xlu1 %v6793_v63, %s6971_s11  ;;  %v3753_v54 = vcombine.high %v10236_v7, %v10216_v41  ;;  %v5313_v3 = vrot.slane %v5299_v19, %v7280_v51  ;;  %v10348_v34 = vrot.slane %v4123_v56, %v7529_v39  ;;  %v10357_v36 = vpop.permute.xlu1 %3048  ;;  %v11397_v41 = vld [vmem:[#allocation35_spill] sm:$0xff]  ;;  %v11398_v7 = vld [vmem:[#allocation32_spill] sm:$0xff] }
 0x54e   : > { %v6758_v33 = vpack.i.bf16 %v4155_v29, %v4019_v18  ;;  %v5380_v49 = vcombine.low %v10329_v30, %v10313_v62  ;;  %v4139_v6 = vcombine.high %v10257_v1, %v10268_v20  ;;  %v11399_v11 = vcombine.high %v11397_v41, %v11398_v7 }
 0x54f   : > { %v6803_v0 = vpack.i.bf16 %v3889_v42, %v3753_v54  ;;  %v4158_v15 = vcombine.low %v4114_v24, %v4146_v5  ;;  %v5297_v48 = vrot.slane %v5283_v22, %v7280_v51  ;;  %v10367_v18 = vrot.slane %v4091_v21, %v7529_v39  ;;  %v10387_v42 = vpop.permute.xlu0 %3042 }
 0x550   : > { %v10363_v19 = vrot.slane %v11399_v11, %v7529_v39  ;;  %6759 = vrot.lane.b32.xlu0 %v6758_v33, %s6965_s15  ;;  %v4022_v1 = vcombine.low %v10284_v37, %v10297_v53  ;;  %v11400_v20 = vcombine.high %v11388_v40, %v11389_v12  ;;  %v5265_v57 = vrot.slane %v5251_v14, %v7280_v51 }
 0x551   : > { %v5281_v43 = vrot.slane %v5267_v38, %v7280_v51  ;;  %v4107_v28 = vcombine.high %v10274_v60, %v10262_v35  ;;  %v5402_v56 = vcombine.low %v10276_v59, %v10324_v55  ;;  %6804 = vrot.lane.b32.xlu1 %v6803_v0, %s6971_s11  ;;  %v5363_v22 = vcombine.high %v5297_v48, %v5313_v3  ;;  %v11401_v35 = vld [vmem:[#allocation28_spill] sm:$0xff]  ;;  %v10399_v29 = vpop.permute.xlu1 %3056 }
 0x552   : > { %v10376_v50 = vrot.slane %v11400_v20, %v7529_v39  ;;  %v5418_v63 = vcombine.low %v10220_v2, %v10250_v26  ;;  %v6768_v40 = vpack.i.bf16 %v5380_v49, %v5244_v61  ;;  %v4156_v12 = vcombine.low %v10367_v18, %v10348_v34  ;;  %v11404_v20 = vld [vmem:[#allocation90_spill] sm:$0xff] }
 0x553   : > { %v5386_v60 = vcombine.low %v11401_v35, %v10187_v10  ;;  %v10397_v21 = vrot.slane %v4139_v6, %v7529_v39  ;;  %v6813_v14 = vpack.i.bf16 %v4158_v15, %v4022_v1  ;;  %v4159_v38 = vcombine.high %v4114_v24, %v4146_v5  ;;  %v11403_v1 = vld [vmem:[#allocation47_spill] sm:$0xff] }
 0x554   : > { %v5434_v54 = vcombine.low %v10357_v36, %v10399_v29  ;;  %6769 = vrot.lane.b32.xlu0 %v6768_v40, %s6966_s16  ;;  %v4020_v61 = vcombine.low %v10310_v52, %v10363_v19  ;;  %v4023_v33 = vcombine.high %v10284_v37, %v10297_v53  ;;  %v11402_v49 = vcombine.high %v11391_v23, %v11392_v32 }
 0x555   : > { %v5331_v0 = vcombine.high %v5265_v57, %v5281_v43  ;;  %v5362_v41 = vcombine.low %v5297_v48, %v5313_v3  ;;  %v4121_v5 = vrot.slane %v4107_v28, %v7529_v39  ;;  %v10414_v24 = vrot.slane %v5402_v56, %v7280_v51  ;;  %6814 = vrot.lane.b32.xlu1 %v6813_v14, %s6968_s7  ;;  %v10431_v3 = vpop.permute.xlu1 %3030  ;;  %v11407_v14 = vld [vmem:[#allocation84_spill] sm:$0xff] }
 0x556   : > { %v4017_v6 = vrot.slane %v11402_v49, %v7529_v39  ;;  %v10418_v15 = vrot.slane %v5418_v63, %v7280_v51  ;;  %v10421_v7 = vrot.slane %v5434_v54, %v7280_v51  ;;  %v6778_v37 = vpack.i.bf16 %v4156_v12, %v4020_v61  ;;  %v10436_v63 = vpop.permute.xlu0 %3050 }
 0x557   : > { %v5381_v23 = vcombine.high %v10329_v30, %v10313_v62  ;;  %v10426_v32 = vrot.slane %v5363_v22, %v7529_v39  ;;  %v10429_v53 = vrot.slane %v5386_v60, %v7280_v51  ;;  %v6823_v11 = vpack.i.bf16 %v4159_v38, %v4023_v33  ;;  %v11406_v60 = vld [vmem:[#allocation92_spill] sm:$0xff] }
 0x558   : > { %v4160_v48 = vcombine.low %v4121_v5, %v10397_v21  ;;  %v5226_v28 = vcombine.low %v11404_v20, %v11403_v1  ;;  %v5330_v56 = vcombine.low %v5265_v57, %v5281_v43  ;;  %v5482_v62 = vcombine.low %v10418_v15, %v10421_v7  ;;  %6779 = vrot.lane.b32.xlu0 %v6778_v37, %s6966_s16 }
 0x559   : > { %v5245_v30 = vcombine.high %v10114_v17, %v10155_v25  ;;  %v10444_v22 = vrot.slane %v5331_v0, %v7529_v39  ;;  %v5450_v40 = vcombine.low %v10429_v53, %v10414_v24  ;;  %6824 = vrot.lane.b32.xlu1 %v6823_v11, %s6969_s9  ;;  %v4024_v57 = vcombine.low %v10376_v50, %v4017_v6  ;;  %v3039_v33 = vpop.permute.xlu1 %3038 }
 0x55a   : > { %v11405_v43 = vcombine.high %v11404_v20, %v11403_v1  ;;  %v5194_v38 = vcombine.low %v11407_v14, %v11406_v60  ;;  %v5370_v17 = vrot.slane %v5362_v41, %v7529_v39  ;;  %v4157_v54 = vcombine.high %v10367_v18, %v10348_v34 }
 0x55b   : > { %v6788_v25 = vpack.i.bf16 %v5381_v23, %v5245_v30  ;;  %v10460_v61 = vrot.slane %v5482_v62, %v7529_v39  ;;  %v6833_v49 = vpack.i.bf16 %v4160_v48, %v4024_v57  ;;  %v11408_v0 = vcombine.high %v11407_v14, %v11406_v60  ;;  %v10477_v48 = vpop.permute.xlu0 %6589 }
 0x55c   : > { %v5241_v12 = vrot.slane %v11405_v43, %v7529_v39  ;;  %v5385_v11 = vcombine.high %v10444_v22, %v10426_v32  ;;  %v5338_v1 = vrot.slane %v5330_v56, %v7529_v39  ;;  %v4021_v34 = vcombine.high %v10310_v52, %v10363_v19 }
 0x55d   : > { %v5209_v37 = vrot.slane %v11408_v0, %v7529_v39  ;;  %6789 = vrot.lane.b32.xlu0 %v6788_v25, %s6967_s8  ;;  %v5234_v18 = vrot.slane %v5226_v28, %v7529_v39  ;;  %v10474_v41 = vrot.slane %v5450_v40, %v7529_v39  ;;  %6834 = vrot.lane.b32.xlu1 %v6833_v49, %s6970_s10  ;;  %v3047_v57 = vpop.permute.xlu1 %3046 }
 0x55e   : > { %v4178_v20 = vcombine.low %v10431_v3, %v3039_v33  ;;  %v6798_v62 = vpack.i.bf16 %v4157_v54, %v4021_v34  ;;  %v5202_v56 = vrot.slane %v5194_v38, %v7529_v39  ;;  %v5382_v30 = vcombine.low %v5338_v1, %v5370_v17 }
 0x55f   : > { %v5249_v23 = vcombine.high %v5209_v37, %v5241_v12  ;;  %v4161_v52 = vcombine.high %v4121_v5, %v10397_v21  ;;  %v5514_v19 = vcombine.low %v10474_v41, %v10460_v61  ;;  %v4162_v28 = vcombine.low %v10290_v45, %v10334_v31 }
 0x560   : > { %v5246_v40 = vcombine.low %v5202_v56, %v5234_v18  ;;  %v4025_v60 = vcombine.high %v10376_v50, %v4017_v6  ;;  %v5383_v14 = vcombine.high %v5338_v1, %v5370_v17  ;;  %v4194_v38 = vcombine.low %v10387_v42, %v10436_v63 }
 0x561   : > { %v6838_v43 = vpack.i.bf16 %v5385_v11, %v5249_v23  ;;  %6799 = vrot.lane.b32.xlu0 %v6798_v62, %s6967_s8  ;;  %v4186_v25 = vrot.slane %v4178_v20, %v7280_v51  ;;  %v3055_v5 = vpop.permute.xlu1 %3054  ;;  %v5247_v49 = vcombine.high %v5202_v56, %v5234_v18  ;;  %v4170_v0 = vrot.slane %v4162_v28, %v7280_v51  ;;  %v10493_v11 = vpop.permute.xlu0 %6599 }
 0x562   : > { %v6808_v21 = vpack.i.bf16 %v5382_v30, %v5246_v40  ;;  %v6843_v54 = vpack.i.bf16 %v4161_v52, %v4025_v60  ;;  %v4210_v34 = vcombine.low %v3047_v57, %v3055_v5  ;;  %v4211_v23 = vcombine.high %v3047_v57, %v3055_v5 }
 0x563   : > { %6839 = vrot.lane.b32.xlu1 %v6838_v43, %s6971_s11  ;;  %v4195_v50 = vcombine.high %v10387_v42, %v10436_v63  ;;  %v6818_v6 = vpack.i.bf16 %v5383_v14, %v5247_v49  ;;  %v5384_v17 = vcombine.low %v10444_v22, %v10426_v32  ;;  %v4202_v1 = vrot.slane %v4194_v38, %v7280_v51 }
 0x564   : > { %v4179_v18 = vcombine.high %v10431_v3, %v3039_v33  ;;  %v4227_v20 = vcombine.high %v4170_v0, %v4186_v25  ;;  %v4218_v62 = vrot.slane %v4210_v34, %v7280_v51  ;;  %v5248_v30 = vcombine.low %v5209_v37, %v5241_v12 }
 0x565   : > { %6809 = vrot.lane.b32.xlu0 %v6808_v21, %s6968_s7  ;;  %v10504_v56 = vpop.permute.xlu1 %6569  ;;  %v4163_v57 = vcombine.high %v10290_v45, %v10334_v31  ;;  %v4225_v42 = vrot.slane %v4211_v23, %v7280_v51  ;;  %v4226_v32 = vcombine.low %v4170_v0, %v4186_v25  ;;  %v4209_v52 = vrot.slane %v4195_v50, %v7280_v51  ;;  %v10513_v28 = vpop.permute.xlu0 %6609 }
 0x566   : > { %v4258_v63 = vcombine.low %v4202_v1, %v4218_v62  ;;  %v4259_v43 = vcombine.high %v4202_v1, %v4218_v62  ;;  %v6828_v22 = vpack.i.bf16 %v5384_v17, %v5248_v30  ;;  %v4193_v3 = vrot.slane %v4179_v18, %v7280_v51 }
 0x567   : > { %6844 = vrot.lane.b32.xlu1 %v6843_v54, %s6971_s11  ;;  %v4241_v33 = vrot.slane %v4227_v20, %v7529_v39  ;;  %v4177_v37 = vrot.slane %v4163_v57, %v7280_v51  ;;  %v4274_v40 = vcombine.low %v4209_v52, %v4225_v42  ;;  %v5435_v14 = vcombine.high %v10357_v36, %v10399_v29 }
 0x568   : > { %v4273_v12 = vrot.slane %v4259_v43, %v7529_v39  ;;  %v10517_v45 = vrot.slane %v4258_v63, %v7529_v39  ;;  %v10526_v38 = vrot.slane %v4226_v32, %v7529_v39  ;;  %v5483_v25 = vcombine.high %v10418_v15, %v10421_v7 }
 0x569   : > { %6819 = vrot.lane.b32.xlu0 %v6818_v6, %s6969_s9  ;;  %v10519_v31 = vpop.permute.xlu1 %6574  ;;  %v4242_v21 = vcombine.low %v4177_v37, %v4193_v3  ;;  %v5515_v5 = vcombine.high %v10474_v41, %v10460_v61  ;;  %v5419_v54 = vcombine.high %v10220_v2, %v10250_v26  ;;  %v5403_v49 = vcombine.high %v10276_v59, %v10324_v55  ;;  %v10541_v15 = vpop.permute.xlu0 %6639 }
 0x56a   : > { %v4292_v60 = vcombine.low %v4241_v33, %v4273_v12  ;;  %v4290_v36 = vcombine.low %v10526_v38, %v10517_v45  ;;  %v5451_v29 = vcombine.high %v10429_v53, %v10414_v24  ;;  %v4282_v7 = vrot.slane %v4274_v40, %v7529_v39 }
 0x56b   : > { %v4293_v34 = vcombine.high %v4241_v33, %v4273_v12  ;;  %v5387_v2 = vcombine.high %v11401_v35, %v10187_v10  ;;  %v10548_v26 = vrot.slane %v5435_v14, %v7280_v51  ;;  %v5497_v59 = vrot.slane %v5483_v25, %v7529_v39 }
 0x56c   : > { %5583 = vrot.lane.b32.xlu1 %v4292_v60, %s6966_s16  ;;  %v4250_v55 = vrot.slane %v4242_v21, %v7529_v39  ;;  %v4291_v24 = vcombine.high %v10526_v38, %v10517_v45  ;;  %v5433_v53 = vrot.slane %v5419_v54, %v7280_v51  ;;  %v10557_v23 = vrot.slane %v5403_v49, %v7280_v51  ;;  %v11409_v60 = vld [vmem:[#allocation63_spill] sm:$0xff] }
 0x56d   : > { %6829 = vrot.lane.b32.xlu0 %v6828_v22, %s6970_s10  ;;  %v6580_v0 = vpop.permute.xlu1 %6579  ;;  %v5465_v10 = vrot.slane %v5451_v29, %v7529_v39  ;;  %v4275_v35 = vcombine.high %v4209_v52, %v4225_v42  ;;  %v5401_v17 = vrot.slane %v5387_v2, %v7280_v51  ;;  %v4243_v18 = vcombine.high %v4177_v37, %v4193_v3  ;;  %v10563_v20 = vpop.permute.xlu0 %6644  ;;  %v11412_v49 = vld [vmem:[#allocation23_spill] sm:$0xff]  ;;  %v11413_v29 = vld [vmem:[#allocation25_spill] sm:$0xff] }
 0x56e   : > { %v4294_v6 = vcombine.low %v4250_v55, %v4282_v7  ;;  %v5498_v1 = vcombine.low %v5433_v53, %v10548_v26  ;;  %v6572_v57 = vunpack.i.h.bf16 %v10504_v56  ;;  %v6571_v43 = vunpack.i.l.bf16 %v10504_v56  ;;  %v11410_v56 = vld [vmem:[#allocation62_spill] sm:$0xff] }
 0x56f   : > { %v5516_v62 = vcombine.low %v5465_v10, %v5497_v59  ;;  %v5466_v30 = vcombine.low %v5401_v17, %v10557_v23  ;;  %v4289_v42 = vrot.slane %v4275_v35, %v7529_v39  ;;  %v4295_v51 = vcombine.high %v4250_v55, %v4282_v7 }
 0x570   : > { %5619 = vrot.lane.b32.xlu1 %v4293_v34, %s6967_s8  ;;  %v5506_v32 = vrot.slane %v5498_v1, %v7529_v39  ;;  %v6577_v22 = vunpack.i.h.bf16 %v10519_v31  ;;  %v6576_v52 = vunpack.i.l.bf16 %v10519_v31  ;;  %v4257_v3 = vrot.slane %v4243_v18, %v7529_v39 }
 0x571   : > { %5799 = vrot.lane.b32.xlu0 %v5515_v5, %s6965_s15  ;;  %v6585_v50 = vpop.permute.xlu1 %6584  ;;  %v6582_v33 = vunpack.i.h.bf16 %v6580_v0  ;;  %v6581_v12 = vunpack.i.l.bf16 %v6580_v0  ;;  %v5517_v37 = vcombine.high %v5465_v10, %v5497_v59  ;;  %v5474_v40 = vrot.slane %v5466_v30, %v7529_v39  ;;  %v10585_v34 = vpop.permute.xlu0 %6649 }
 0x572   : > { %v11411_v14 = vcombine.low %v11409_v60, %v11410_v56  ;;  %v6587_v21 = vunpack.i.h.bf16 %v6585_v50  ;;  %v6586_v5 = vunpack.i.l.bf16 %v6585_v50  ;;  %v11414_v31 = vcombine.low %v11412_v49, %v11413_v29 }
 0x573   : > { %v4296_v59 = vcombine.low %v4257_v3, %v4289_v42  ;;  %v5499_v50 = vcombine.high %v5433_v53, %v10548_v26  ;;  %v5518_v18 = vcombine.low %v5474_v40, %v5506_v32  ;;  %v6612_v49 = vunpack.i.h.bf16 %v10513_v28 }
 0x574   : > { %5655 = vrot.lane.b32.xlu1 %v4294_v6, %s6968_s7  ;;  %v6027_v25 = vsel %vm2062_vm5, %v11411_v14, %v6572_v57  ;;  %v6026_v7 = vsel %vm2062_vm5, %v11414_v31, %v6571_v43  ;;  %v4297_v43 = vcombine.high %v4257_v3, %v4289_v42 }
 0x575   : > { %5547 = vrot.lane.b32.xlu0 %v4291_v24, %s6965_s15  ;;  %v6595_v63 = vpop.permute.xlu1 %6594  ;;  %v6035_v55 = vsel %vm2068_vm6, %v6026_v7, %v6576_v52  ;;  %v6036_v24 = vsel %vm2068_vm6, %v6027_v25, %v6577_v22  ;;  %s6329_s15 = sshll.u32 %s7108_s23, 4 }
 0x576   : > { %v6597_v0 = vunpack.i.h.bf16 %v6595_v63  ;;  %v6596_v2 = vunpack.i.l.bf16 %v6595_v63  ;;  %v6044_v6 = vsel %vm2074_vm7, %v6035_v55, %v6581_v12  ;;  %v6045_v1 = vsel %vm2074_vm7, %v6036_v24, %v6582_v33  ;;  %v11418_v24 = vld [vmem:[#allocation42_spill] sm:$0xff] }
 0x577   : > { %v6053_v30 = vsel %vm2080_vm8, %v6044_v6, %v6586_v5  ;;  %v6054_v57 = vsel %vm2080_vm8, %v6045_v1, %v6587_v21  ;;  %v5519_v12 = vcombine.high %v5474_v40, %v5506_v32  ;;  %v6592_v21 = vunpack.i.h.bf16 %v10477_v48 }
 0x578   : > { %5691 = vrot.lane.b32.xlu1 %v4295_v51, %s6969_s9  ;;  %v6062_v51 = vsel %vm2086_vm9, %v6053_v30, %v6596_v2  ;;  %v6063_v22 = vsel %vm2086_vm9, %v6054_v57, %v6597_v0  ;;  %v6591_v32 = vunpack.i.l.bf16 %v10477_v48  ;;  %v6602_v5 = vunpack.i.h.bf16 %v10493_v11  ;;  %v11415_v2 = vld [vmem:[#allocation81_spill] sm:$0xff]  ;;  %v2649_v30 = vld [vmem:[%s10879_s4] sm:$0xff] }
 0x579   : > { %5835 = vrot.lane.b32.xlu0 %v5516_v62, %s6966_s16  ;;  %v5467_v62 = vcombine.high %v5401_v17, %v10557_v23  ;;  %v5513_v23 = vrot.slane %v5499_v50, %v7529_v39  ;;  %v10603_v17 = vpop.permute.xlu0 %6654  ;;  %s6340_s16 = sshll.u32 %s7025_s22, 8  ;;  %s6973_s22 = smov [#allocation7]  }
 0x57a   : > { %v6605_v54 = vpop.permute.xlu1 %6604  ;;  %s6892_s25 = sshll.u32 %s6973_s22, 4  ;;  %s6893_s25 = int_to_ptr.vmem [resolvable:$false] %s6892_s25 }
 0x57b   : > { %v6607_v10 = vunpack.i.h.bf16 %v6605_v54  ;;  %v6606_v35 = vunpack.i.l.bf16 %v6605_v54  ;;  %v5481_v56 = vrot.slane %v5467_v62, %v7529_v39  ;;  %v6601_v54 = vunpack.i.l.bf16 %v10493_v11  ;;  %s6894_s26 = scalar_lea.vmem %s6893_s25, 512 }
 0x57c   : > { %5727 = vrot.lane.b32.xlu1 %v4296_v59, %s6970_s10  ;;  %v6611_v39 = vunpack.i.l.bf16 %v10513_v28  ;;  %v11416_v59 = vld [vmem:[#allocation80_spill] sm:$0xff] }
 0x57d   : > { %5871 = vrot.lane.b32.xlu0 %v5517_v37, %s6967_s8  ;;  %v6071_v52 = vsel %vm2092_vm10, %v6062_v51, %v6606_v35  ;;  %v6072_v33 = vsel %vm2092_vm10, %v6063_v22, %v6607_v10  ;;  %v5520_v14 = vcombine.low %v5481_v56, %v5513_v23  ;;  %v10618_v40 = vpop.permute.xlu0 %6659  ;;  %v5521_v29 = vcombine.high %v5481_v56, %v5513_v23  ;;  %v11419_v10 = vld [vmem:[#allocation37_spill] sm:$0xff]  ;;  %s242_s8 = scalar_lea.vmem [#allocation7], %s6329_s15 }
 0x57e   : > { %v11417_v55 = vcombine.low %v11415_v2, %v11416_v59  ;;  %v11420_v35 = vcombine.low %v11418_v24, %v11419_v10  ;;  %v11421_v59 = vld [vmem:[#allocation14_spill] sm:$0xff]  ;;  %v11425_v10 = vld [vmem:[#allocation71_spill] sm:$0xff] }
 0x57f   : > { %v6615_v63 = vpop.permute.xlu1 %6614 }
 0x580   : > { %v6617_v26 = vunpack.i.h.bf16 %v6615_v63  ;;  %v6616_v53 = vunpack.i.l.bf16 %v6615_v63  ;;  %5763 = vrot.lane.b32.xlu1 %v4297_v43, %s6971_s11  ;;  %v6028_v48 = vsel %vm2062_vm5, %v11417_v55, %v6591_v32  ;;  %v6029_v50 = vsel %vm2062_vm5, %v11420_v35, %v6592_v21  ;;  %v11422_v55 = vld [vmem:[#allocation17_spill] sm:$0xff] }
 0x581   : > { %5907 = vrot.lane.b32.xlu0 %v5518_v18, %s6968_s7  ;;  %v6037_v28 = vsel %vm2068_vm6, %v6028_v48, %v6601_v54  ;;  %v6038_v1 = vsel %vm2068_vm6, %v6029_v50, %v6602_v5  ;;  %v10641_v43 = vpop.permute.xlu0 %6669  ;;  %v6642_v32 = vunpack.i.h.bf16 %v10541_v15  ;;  %v6641_v5 = vunpack.i.l.bf16 %v10541_v15  ;;  %v11424_v15 = vld [vmem:[#allocation72_spill] sm:$0xff]  ;;  %s6251_s7 = sshll.u32 %s242_s8, 4  ;;  %s10833_s7 = int_to_ptr.vmem [resolvable:$true] %s6251_s7 }
 0x582   : > { %v10607_v42 = vsel %vm2098_vm11, %v6071_v52, %v6616_v53  ;;  %v10610_v3 = vsel %vm2098_vm11, %v6072_v33, %v6617_v26  ;;  %v6046_v57 = vsel %vm2074_vm7, %v6037_v28, %v6611_v39  ;;  %v6047_v63 = vsel %vm2074_vm7, %v6038_v1, %v6612_v49  ;;  %s6888_s17 = scalar_lea.vmem %s10833_s7, 256  ;;  %p6895_p8 = scmp.lt.s32.totalorder %s10833_s7, %s6893_s25 }
 0x583   : > { %v6620_v37 = vpop.permute.xlu1 %6619  ;;  %v6351_v60 = vpack.c.bf16 %v10610_v3, %v10607_v42  ;;  %v6647_v49 = vunpack.i.h.bf16 %v10563_v20  ;;  %v6646_v39 = vunpack.i.l.bf16 %v10563_v20  ;;  %v11423_v48 = vcombine.low %v11421_v59, %v11422_v55  ;;  %p6889_p6 = scmp.ne.s32.totalorder %s10833_s7, %s6888_s17  ;;  %p6896_p10 = scmp.lt.s32.totalorder %s6894_s26, %s6888_s17 }
 0x584   : > { %v6622_v31 = vunpack.i.h.bf16 %v6620_v37  ;;  %v6621_v7 = vunpack.i.l.bf16 %v6620_v37  ;;  %v11426_v35 = vcombine.low %v11424_v15, %v11425_v10  ;;  %v11430_v10 = vld [vmem:[#allocation46_spill] sm:$0xff] }
 0x585   : > { %5943 = vrot.lane.b32.xlu0 %v5519_v12, %s6969_s9  ;;  %v6680_v54 = vpop.permute.xlu0 %6679  ;;  %v6089_v24 = vsel %vm2062_vm5, %v11423_v48, %v6641_v5  ;;  %v6662_v5 = vunpack.i.h.bf16 %v10618_v40  ;;  %v11427_v48 = vld [vmem:[#allocation43_spill] sm:$0xff]  ;;  %p6890_p12 = pnand %p6889_p6, %p11447_p11  ;;  %p6897_p0 = por %p6896_p10, %p6895_p8 }
 0x586   : > { %v6056_v51 = vsel %vm2080_vm8, %v6047_v63, %v6622_v31  ;;  %v6055_v22 = vsel %vm2080_vm8, %v6046_v57, %v6621_v7  ;;  %v6651_v31 = vunpack.i.l.bf16 %v10585_v34  ;;  %v6657_v7 = vunpack.i.h.bf16 %v10603_v17 }
 0x587   : > { %v6625_v25 = vpop.permute.xlu1 %6624  ;;  %v6090_v50 = vsel %vm2062_vm5, %v11426_v35, %v6642_v32  ;;  %v11431_v35 = vld [vmem:[#allocation11_spill] sm:$0xff]  ;;  %p6891_p13 = pneg %p6890_p12 }
 0x588   : > { %v6627_v6 = vunpack.i.h.bf16 %v6625_v25  ;;  %v6626_v11 = vunpack.i.l.bf16 %v6625_v25 }
 0x589   : > { %5979 = vrot.lane.b32.xlu0 %v5520_v14, %s6970_s10  ;;  %p6898_p2 = pnand %p6897_p0, %p6891_p13 }
 0x58a   : > { %v6064_v53 = vsel %vm2086_vm9, %v6055_v22, %v6626_v11  ;;  %v6065_v52 = vsel %vm2086_vm9, %v6056_v51, %v6627_v6  ;;  %v6098_v11 = vsel %vm2068_vm6, %v6089_v24, %v6646_v39  ;;  %v6672_v39 = vunpack.i.h.bf16 %v10641_v43  ;;  %v11428_v24 = vld [vmem:[#allocation10_spill] sm:$0xff] }
 0x58b   : > { %v6630_v0 = vpop.permute.xlu1 %6629  ;;  %v11429_v15 = vcombine.low %v11427_v48, %v11428_v24 }
 0x58c   : > { %v6632_v18 = vunpack.i.h.bf16 %v6630_v0  ;;  %v6631_v62 = vunpack.i.l.bf16 %v6630_v0  ;;  %v6656_v0 = vunpack.i.l.bf16 %v10603_v17  ;;  %v6107_v17 = vsel %vm2074_vm7, %v6098_v11, %v6651_v31 }
 0x58d   : > { %6015 = vrot.lane.b32.xlu0 %v5521_v29, %s6971_s11  ;;  %v6652_v29 = vunpack.i.h.bf16 %v10585_v34  ;;  %v6099_v34 = vsel %vm2068_vm6, %v6090_v50, %v6647_v49  ;;  %v6661_v49 = vunpack.i.l.bf16 %v10618_v40  ;;  %v6682_v31 = vunpack.i.h.bf16 %v6680_v54  ;;  %s10831_s11 = scalar_lea.hbm %s10880_s5, %s6340_s16 }
 0x58e   : > { %v6073_v12 = vsel %vm2092_vm10, %v6064_v53, %v6631_v62  ;;  %v6074_v37 = vsel %vm2092_vm10, %v6065_v52, %v6632_v18  ;;  %v6690_v62 = vpop.permute.xlu0 %6689  ;;  %v6092_v40 = vsel %vm2062_vm5, %v11429_v15, %v6662_v5  ;;  %v11432_v50 = vcombine.low %v11430_v10, %v11431_v35  ;;  %v11433_v10 = vld [vmem:[#allocation55_spill] sm:$0xff]  ;;  %v11436_v35 = vld [vmem:[#allocation16_spill] sm:$0xff] }
 0x58f   : > { %v6635_v26 = vpop.permute.xlu1 %6634  ;;  %v6108_v18 = vsel %vm2074_vm7, %v6099_v34, %v6652_v29  ;;  %v6671_v29 = vunpack.i.l.bf16 %v10641_v43  ;;  %v6691_v59 = vunpack.i.l.bf16 %v6690_v62  ;;  %v6101_v42 = vsel %vm2068_vm6, %v6092_v40, %v6672_v39 }
 0x590   : > { %v6637_v33 = vunpack.i.h.bf16 %v6635_v26  ;;  %v6636_v23 = vunpack.i.l.bf16 %v6635_v26  ;;  %v6117_v57 = vsel %vm2080_vm8, %v6108_v18, %v6657_v7  ;;  %v6681_v7 = vunpack.i.l.bf16 %v6680_v54 }
 0x591   : > { %6154 = vperm.xlu0 %6567, %v2649_v30   ;;  %v6116_v30 = vsel %vm2080_vm8, %v6107_v17, %v6656_v0  ;;  %v6091_v43 = vsel %vm2062_vm5, %v11432_v50, %v6661_v49  ;;  %v6110_v34 = vsel %vm2074_vm7, %v6101_v42, %v6682_v31  ;;  %v11437_v50 = vld [vmem:[#allocation19_spill] sm:$0xff] }
 0x592   : > { %v10650_v56 = vsel %vm2098_vm11, %v6073_v12, %v6636_v23  ;;  %v10653_v14 = vsel %vm2098_vm11, %v6074_v37, %v6637_v33  ;;  %v10683_v23 = vpop.permute.xlu0 %6709 }
 0x593   : > { %v6665_v25 = vpop.permute.xlu1 %6664  ;;  %v6355_v21 = vpack.c.bf16 %v10653_v14, %v10650_v56  ;;  %v6712_v49 = vunpack.i.h.bf16 %v10683_v23  ;;  %v6711_v39 = vunpack.i.l.bf16 %v10683_v23  ;;  %v11434_v56 = vld [vmem:[#allocation58_spill] sm:$0xff] }
 0x594   : > { %v6667_v20 = vunpack.i.h.bf16 %v6665_v25  ;;  %v6666_v6 = vunpack.i.l.bf16 %v6665_v25  ;;  %v11435_v14 = vcombine.low %v11433_v10, %v11434_v56 }
 0x596   : > { %v6125_v26 = vsel %vm2086_vm9, %v6116_v30, %v6666_v6  ;;  %v6126_v53 = vsel %vm2086_vm9, %v6117_v57, %v6667_v20  ;;  %v6100_v6 = vsel %vm2068_vm6, %v6091_v43, %v6671_v29  ;;  %v11438_v43 = vcombine.low %v11436_v35, %v11437_v50 }
 0x597   : > { %v6675_v2 = vpop.permute.xlu1 %6674  ;;  %v6109_v11 = vsel %vm2074_vm7, %v6100_v6, %v6681_v7 }
 0x598   : > { %v6677_v28 = vunpack.i.h.bf16 %v6675_v2  ;;  %v6676_v1 = vunpack.i.l.bf16 %v6675_v2  ;;  %v6692_v2 = vunpack.i.h.bf16 %v6690_v62  ;;  %v6094_v23 = vsel %vm2062_vm5, %v11438_v43, %v6712_v49 }
 0x59a   : > { %v6134_v52 = vsel %vm2092_vm10, %v6125_v26, %v6676_v1  ;;  %v6135_v33 = vsel %vm2092_vm10, %v6126_v53, %v6677_v28  ;;  %v6118_v1 = vsel %vm2080_vm8, %v6109_v11, %v6691_v59  ;;  %v6119_v17 = vsel %vm2080_vm8, %v6110_v34, %v6692_v2  ;;  %v11439_v34 = vld [vmem:[#allocation26_spill] sm:$0xff] }
 0x59b   : > { %v6685_v63 = vpop.permute.xlu1 %6684 }
 0x59c   : > { %v6687_v51 = vunpack.i.h.bf16 %v6685_v63  ;;  %v6686_v22 = vunpack.i.l.bf16 %v6685_v63 }
 0x59e   : > { %v6143_v12 = vsel %vm2098_vm11, %v6134_v52, %v6686_v22  ;;  %v6144_v37 = vsel %vm2098_vm11, %v6135_v33, %v6687_v51 }
 0x59f   : > { %v6695_v25 = vpop.permute.xlu1 %6694  ;;  %v6349_v32 = vpack.c.bf16 %v6144_v37, %v6143_v12 }
 0x5a0   : > { %v6715_v0 = vpop.permute.xlu0 %6714  ;;  %v6697_v20 = vunpack.i.h.bf16 %v6695_v25  ;;  %v6696_v54 = vunpack.i.l.bf16 %v6695_v25 }
 0x5a1   : > { %6350 = vmatprep.subr.bf16.mxu1 %v6349_v32  ;;  %v6716_v48 = vunpack.i.l.bf16 %v6715_v0 }
 0x5a2   : > { %6352 = vmatpush1.bf16.msra.mxu1 %v6351_v60  ;;  %v6128_v62 = vsel %vm2086_vm9, %v6119_v17, %v6697_v20  ;;  %v6127_v30 = vsel %vm2086_vm9, %v6118_v1, %v6696_v54 }
 0x5a3   : > { %v6700_v55 = vpop.permute.xlu1 %6699 }
 0x5a4   : > { %v6702_v3 = vunpack.i.h.bf16 %v6700_v55  ;;  %v6701_v60 = vunpack.i.l.bf16 %v6700_v55  ;;  %v6720_v28 = vpop.permute.xlu0 %6719  ;;  %v6717_v55 = vunpack.i.h.bf16 %v6715_v0 }
 0x5a5   : > { %v6722_v29 = vunpack.i.h.bf16 %v6720_v28  ;;  %v6721_v31 = vunpack.i.l.bf16 %v6720_v28  ;;  %v11440_v28 = vld [vmem:[#allocation75_spill] sm:$0xff] }
 0x5a6   : > { %v6136_v51 = vsel %vm2092_vm10, %v6127_v30, %v6701_v60  ;;  %v6137_v22 = vsel %vm2092_vm10, %v6128_v62, %v6702_v3  ;;  %v11441_v1 = vcombine.low %v11439_v34, %v11440_v28  ;;  %v11443_v62 = vld [vmem:[#allocation27_spill] sm:$0xff] }
 0x5a7   : > { %v6705_v18 = vpop.permute.xlu1 %6704  ;;  %v6103_v6 = vsel %vm2068_vm6, %v6094_v23, %v6722_v29 }
 0x5a8   : > { %v6707_v57 = vunpack.i.h.bf16 %v6705_v18  ;;  %v6706_v63 = vunpack.i.l.bf16 %v6705_v18  ;;  %v6030_v17 = vsel %vm2062_vm5, %v11441_v1, %v6716_v48  ;;  %v11442_v18 = vld [vmem:[#allocation73_spill] sm:$0xff] }
 0x5a9   : > { %v6725_v26 = vpop.permute.xlu0 %6724  ;;  %v11444_v30 = vcombine.low %v11442_v18, %v11443_v62 }
 0x5aa   : > { %v6145_v53 = vsel %vm2098_vm11, %v6136_v51, %v6706_v63  ;;  %v6146_v52 = vsel %vm2098_vm11, %v6137_v22, %v6707_v57  ;;  %v6727_v20 = vunpack.i.h.bf16 %v6725_v26  ;;  %v6726_v54 = vunpack.i.l.bf16 %v6725_v26 }
 0x5ab   : > { %v6745_v33 = vpop.permute.xlu1 %6744  ;;  %v6353_v12 = vpack.c.bf16 %v6146_v52, %v6145_v53  ;;  %v6031_v57 = vsel %vm2062_vm5, %v11444_v30, %v6717_v55 }
 0x5ac   : > { %v6039_v26 = vsel %vm2068_vm6, %v6030_v17, %v6726_v54  ;;  %v6040_v53 = vsel %vm2068_vm6, %v6031_v57, %v6727_v20  ;;  %v6747_v29 = vunpack.i.h.bf16 %v6745_v33 }
 0x5ad   : > { %6354 = vmatprep.subr.bf16.mxu1 %v6353_v12  ;;  %v6730_v37 = vpop.permute.xlu0 %6729 }
 0x5ae   : > { %6356 = vmatpush1.bf16.msra.mxu1 %v6355_v21  ;;  %v6732_v7 = vunpack.i.h.bf16 %v6730_v37  ;;  %v6731_v2 = vunpack.i.l.bf16 %v6730_v37  ;;  %v6093_v21 = vsel %vm2062_vm5, %v11435_v14, %v6711_v39 }
 0x5af   : > { %v6755_v25 = vpop.permute.xlu1 %6754  ;;  %v6102_v42 = vsel %vm2068_vm6, %v6093_v21, %v6721_v31  ;;  %v6746_v31 = vunpack.i.l.bf16 %v6745_v33 }
 0x5b0   : > { %v6111_v60 = vsel %vm2074_vm7, %v6102_v42, %v6731_v2  ;;  %v6112_v11 = vsel %vm2074_vm7, %v6103_v6, %v6732_v7  ;;  %v6757_v52 = vunpack.i.h.bf16 %v6755_v25  ;;  %v6756_v12 = vunpack.i.l.bf16 %v6755_v25 }
 0x5b1   : > { %v6735_v32 = vpop.permute.xlu0 %6734 }
 0x5b2   : > { %v6737_v0 = vunpack.i.h.bf16 %v6735_v32  ;;  %v6736_v3 = vunpack.i.l.bf16 %v6735_v32 }
 0x5b3   : > { %v6765_v5 = vpop.permute.xlu1 %6764 }
 0x5b4   : > { %v6048_v37 = vsel %vm2074_vm7, %v6039_v26, %v6736_v3  ;;  %v6049_v32 = vsel %vm2074_vm7, %v6040_v53, %v6737_v0  ;;  %v6767_v55 = vunpack.i.h.bf16 %v6765_v5  ;;  %v6766_v48 = vunpack.i.l.bf16 %v6765_v5 }
 0x5b5   : > { %v6740_v59 = vpop.permute.xlu0 %6739  ;;  %v6058_v25 = vsel %vm2080_vm8, %v6049_v32, %v6747_v29  ;;  %v11445_v53 = vcombine.low %v11387_v8, %v11386_v9 }
 0x5b6   : > { %v6742_v24 = vunpack.i.h.bf16 %v6740_v59  ;;  %v6741_v15 = vunpack.i.l.bf16 %v6740_v59  ;;  %v6067_v54 = vsel %vm2086_vm9, %v6058_v25, %v6767_v55 }
 0x5b7   : > { %v6775_v40 = vpop.permute.xlu1 %6774 }
 0x5b8   : > { %v6120_v63 = vsel %vm2080_vm8, %v6111_v60, %v6741_v15  ;;  %v6121_v51 = vsel %vm2080_vm8, %v6112_v11, %v6742_v24  ;;  %v6777_v49 = vunpack.i.h.bf16 %v6775_v40  ;;  %v6776_v39 = vunpack.i.l.bf16 %v6775_v40 }
 0x5b9   : > { %v6129_v7 = vsel %vm2086_vm9, %v6120_v63, %v6756_v12  ;;  %v6130_v2 = vsel %vm2086_vm9, %v6121_v51, %v6757_v52  ;;  %v10747_v59 = vpop.permute.xlu0 %6749  ;;  %v6057_v15 = vsel %vm2080_vm8, %v6048_v37, %v6746_v31 }
 0x5ba   : > { %v6138_v14 = vsel %vm2092_vm10, %v6129_v7, %v6776_v39  ;;  %v6139_v40 = vsel %vm2092_vm10, %v6130_v2, %v6777_v49  ;;  %v6066_v20 = vsel %vm2086_vm9, %v6057_v15, %v6766_v48  ;;  %v6752_v15 = vunpack.i.h.bf16 %v10747_v59 }
 0x5bb   : > { %v6785_v22 = vpop.permute.xlu1 %6784  ;;  %v6751_v25 = vunpack.i.l.bf16 %v10747_v59 }
 0x5bc   : > { %v6787_v33 = vunpack.i.h.bf16 %v6785_v22  ;;  %v6786_v21 = vunpack.i.l.bf16 %v6785_v22 }
 0x5be   : > { %v6075_v0 = vsel %vm2092_vm10, %v6066_v20, %v6786_v21  ;;  %v6076_v3 = vsel %vm2092_vm10, %v6067_v54, %v6787_v33 }
 0x5bf   : > { %v6795_v24 = vpop.permute.xlu1 %6794 }
 0x5c0   : > { %v6797_v10 = vunpack.i.h.bf16 %v6795_v24  ;;  %v6796_v56 = vunpack.i.l.bf16 %v6795_v24 }
 0x5c2   : > { %v6760_v35 = vpop.permute.xlu0 %6759  ;;  %v6147_v50 = vsel %vm2098_vm11, %v6138_v14, %v6796_v56  ;;  %v6148_v43 = vsel %vm2098_vm11, %v6139_v40, %v6797_v10 }
 0x5c3   : > { %v6805_v23 = vpop.permute.xlu1 %6804  ;;  %v6357_v5 = vpack.c.bf16 %v6148_v43, %v6147_v50  ;;  %v6762_v30 = vunpack.i.h.bf16 %v6760_v35  ;;  %v6761_v57 = vunpack.i.l.bf16 %v6760_v35 }
 0x5c4   : > { %v6807_v6 = vunpack.i.h.bf16 %v6805_v23  ;;  %v6806_v42 = vunpack.i.l.bf16 %v6805_v23 }
 0x5c5   : > { %6358 = vmatprep.subr.bf16.mxu1 %v6357_v5  ;;  %v6032_v52 = vsel %vm2062_vm5, %v11445_v53, %v6761_v57  ;;  %v6033_v12 = vsel %vm2062_vm5, %v4154_v58, %v6762_v30 }
 0x5c6   : > { %v6770_v60 = vpop.permute.xlu0 %6769  ;;  %v6084_v11 = vsel %vm2098_vm11, %v6075_v0, %v6806_v42  ;;  %v6085_v34 = vsel %vm2098_vm11, %v6076_v3, %v6807_v6  ;;  %v11446_v3 = vcombine.low %v11385_v16, %v11384_v13 }
 0x5c7   : > { %v6815_v28 = vpop.permute.xlu1 %6814  ;;  %v6359_v1 = vpack.c.bf16 %v6085_v34, %v6084_v11  ;;  %v6772_v50 = vunpack.i.h.bf16 %v6770_v60  ;;  %v6771_v43 = vunpack.i.l.bf16 %v6770_v60  ;;  %v6096_v60 = vsel %vm2062_vm5, %v5378_v4, %v6752_v15 }
 0x5c8   : > { %v6817_v39 = vunpack.i.h.bf16 %v6815_v28  ;;  %v6816_v29 = vunpack.i.l.bf16 %v6815_v28  ;;  %v6095_v11 = vsel %vm2062_vm5, %v11446_v3, %v6751_v25 }
 0x5c9   : > { %6360 = vmatpush1.bf16.msra.mxu1 %v6359_v1  ;;  %v6105_v1 = vsel %vm2068_vm6, %v6096_v60, %v6772_v50 }
 0x5ca   : > { %v6780_v17 = vpop.permute.xlu0 %6779 }
 0x5cb   : > { %v6825_v18 = vpop.permute.xlu1 %6824  ;;  %v6782_v51 = vunpack.i.h.bf16 %v6780_v17  ;;  %v6781_v22 = vunpack.i.l.bf16 %v6780_v17  ;;  %v6104_v17 = vsel %vm2068_vm6, %v6095_v11, %v6771_v43 }
 0x5cc   : > { %v6827_v2 = vunpack.i.h.bf16 %v6825_v18  ;;  %v6826_v55 = vunpack.i.l.bf16 %v6825_v18 }
 0x5cd   : > { %v6041_v31 = vsel %vm2068_vm6, %v6032_v52, %v6781_v22  ;;  %v6042_v7 = vsel %vm2068_vm6, %v6033_v12, %v6782_v51 }
 0x5cf   : > { %v6790_v62 = vpop.permute.xlu0 %6789  ;;  %v6835_v63 = vpop.permute.xlu1 %6834 }
 0x5d0   : > { %v6837_v48 = vunpack.i.h.bf16 %v6835_v63  ;;  %v6836_v24 = vunpack.i.l.bf16 %v6835_v63  ;;  %v6792_v23 = vunpack.i.h.bf16 %v6790_v62  ;;  %v6791_v5 = vunpack.i.l.bf16 %v6790_v62 }
 0x5d2   : > { %v6113_v18 = vsel %vm2074_vm7, %v6104_v17, %v6791_v5  ;;  %v6114_v62 = vsel %vm2074_vm7, %v6105_v1, %v6792_v23 }
 0x5d3   : > { %v6800_v26 = vpop.permute.xlu0 %6799 }
 0x5d4   : > { %v6802_v37 = vunpack.i.h.bf16 %v6800_v26  ;;  %v6801_v32 = vunpack.i.l.bf16 %v6800_v26 }
 0x5d5   : > { %v6840_v49 = vpop.permute.xlu1 %6839 }
 0x5d6   : > { %v6050_v9 = vsel %vm2074_vm7, %v6041_v31, %v6801_v32  ;;  %v6051_v8 = vsel %vm2074_vm7, %v6042_v7, %v6802_v37  ;;  %v6842_v47 = vunpack.i.h.bf16 %v6840_v49  ;;  %v6841_v44 = vunpack.i.l.bf16 %v6840_v49 }
 0x5d7   : > { %v6059_v27 = vsel %vm2080_vm8, %v6050_v9, %v6816_v29  ;;  %v6060_v46 = vsel %vm2080_vm8, %v6051_v8, %v6817_v39  ;;  %v6810_v58 = vpop.permute.xlu0 %6809 }
 0x5d8   : > { %v6068_v56 = vsel %vm2086_vm9, %v6059_v27, %v6826_v55  ;;  %v6069_v14 = vsel %vm2086_vm9, %v6060_v46, %v6827_v2  ;;  %v6812_v6 = vunpack.i.h.bf16 %v6810_v58  ;;  %v6811_v42 = vunpack.i.l.bf16 %v6810_v58 }
 0x5d9   : > { %v6845_v10 = vpop.permute.xlu1 %6844  ;;  %v6077_v21 = vsel %vm2092_vm10, %v6068_v56, %v6836_v24  ;;  %v6078_v35 = vsel %vm2092_vm10, %v6069_v14, %v6837_v48 }
 0x5da   : > { %v6847_v40 = vunpack.i.h.bf16 %v6845_v10  ;;  %v6846_v33 = vunpack.i.l.bf16 %v6845_v10  ;;  %v6122_v13 = vsel %vm2080_vm8, %v6113_v18, %v6811_v42  ;;  %v6123_v16 = vsel %vm2080_vm8, %v6114_v62, %v6812_v6 }
 0x5db   : > { %v6820_v20 = vpop.permute.xlu0 %6819 }
 0x5dc   : > { %v6086_v54 = vsel %vm2098_vm11, %v6077_v21, %v6846_v33  ;;  %v6087_v59 = vsel %vm2098_vm11, %v6078_v35, %v6847_v40  ;;  %v6822_v34 = vunpack.i.h.bf16 %v6820_v20  ;;  %v6821_v28 = vunpack.i.l.bf16 %v6820_v20  ;;  %v2648_v40 = vld [vmem:[%s10878_s3] sm:$0xff] }
 0x5dd   : > { %v6363_v0 = vpack.c.bf16 %v6087_v59, %v6086_v54 }
 0x5de   : > { %v6131_v4 = vsel %vm2086_vm9, %v6122_v13, %v6821_v28  ;;  %v6132_v51 = vsel %vm2086_vm9, %v6123_v16, %v6822_v34  ;;  %v5584_v22 = vpop.permute.xlu1 %5583 }
 0x5df   : > { %v6830_v30 = vpop.permute.xlu0 %6829 }
 0x5e0   : > { %v6832_v57 = vunpack.i.h.bf16 %v6830_v30  ;;  %v6831_v63 = vunpack.i.l.bf16 %v6830_v30 }
 0x5e2   : > { %v6140_v26 = vsel %vm2092_vm10, %v6131_v4, %v6831_v63  ;;  %v6141_v53 = vsel %vm2092_vm10, %v6132_v51, %v6832_v57  ;;  %v5620_v39 = vpop.permute.xlu1 %5619 }
 0x5e3   : > { %v5800_v52 = vpop.permute.xlu0 %5799  ;;  %v6149_v12 = vsel %vm2098_vm11, %v6140_v26, %v6841_v44  ;;  %v6150_v37 = vsel %vm2098_vm11, %v6141_v53, %v6842_v47 }
 0x5e4   : > { %v6361_v32 = vpack.c.bf16 %v6150_v37, %v6149_v12  ;;  %v6097_v27 = vsel %vm2062_vm5, %v5514_v19, %v5800_v52 }
 0x5e6   : > { %6362 = vmatprep.subr.bf16.mxu1 %v6361_v32  ;;  %v5656_v31 = vpop.permute.xlu1 %5655 }
 0x5e7   : > { %v5548_v29 = vpop.permute.xlu0 %5547  ;;  %6364 = vmatpush1.bf16.msra.mxu1 %v6363_v0 }
 0x5e8   : > { %v6034_v9 = vsel %vm2062_vm5, %v4290_v36, %v5548_v29 }
 0x5e9   : > { %v6043_v48 = vsel %vm2068_vm6, %v6034_v9, %v5584_v22 }
 0x5ea   : > { %v5692_v2 = vpop.permute.xlu1 %5691  ;;  %v6052_v46 = vsel %vm2074_vm7, %v6043_v48, %v5620_v39 }
 0x5eb   : > { %v5836_v49 = vpop.permute.xlu0 %5835  ;;  %v6061_v38 = vsel %vm2080_vm8, %v6052_v46, %v5656_v31 }
 0x5ec   : > { %v6106_v58 = vsel %vm2068_vm6, %v6097_v27, %v5836_v49  ;;  %v6070_v56 = vsel %vm2086_vm9, %v6061_v38, %v5692_v2 }
 0x5ee   : > { %v5728_v24 = vpop.permute.xlu1 %5727 }
 0x5ef   : > { %v5872_v7 = vpop.permute.xlu0 %5871  ;;  %v6079_v19 = vsel %vm2092_vm10, %v6070_v56, %v5728_v24 }
 0x5f0   : > { %v6115_v25 = vsel %vm2074_vm7, %v6106_v58, %v5872_v7 }
 0x5f2   : > { %v5764_v36 = vpop.permute.xlu1 %5763 }
 0x5f3   : > { %v5908_v55 = vpop.permute.xlu0 %5907  ;;  %v6088_v33 = vsel %vm2098_vm11, %v6079_v19, %v5764_v36 }
 0x5f4   : > { %v6124_v45 = vsel %vm2080_vm8, %v6115_v25, %v5908_v55 }
 0x5f7   : > { %v5944_v8 = vpop.permute.xlu0 %5943 }
 0x5f8   : > { %v6133_v10 = vsel %vm2086_vm9, %v6124_v45, %v5944_v8 }
 0x5fb   : > { %v5980_v15 = vpop.permute.xlu0 %5979 }
 0x5fc   : > { %v6142_v61 = vsel %vm2092_vm10, %v6133_v10, %v5980_v15 }
 0x5ff   : > { %v6016_v41 = vpop.permute.xlu0 %6015 }
 0x600   : > { %v6151_v14 = vsel %vm2098_vm11, %v6142_v61, %v6016_v41 }
 0x601   : > { %6177 = vmatprep.subr.mxu1 %v6151_v14 }
 0x602   : > { %6178 = vmatpush1.msra.mxu1 %v6088_v33 }
 0x603   : > { %6333 = vmatmul.mubr.msk.f32.vlgmr.msra.gmra.mrb[0].mxu1 %vm6157_vm14, %v2648_v40 }
 0x610   : > { %v6155_v21 = vpop.permute.xlu0 %6154 }
 0x6d6   : > { %v6227_v35 = vpop.f32.mrb[0].mxu1 }
 0x6d7   : > { %v6228_v50 = vadd.f32 %v6227_v35, %v6155_v21  ;;  %v6229_v43 = vpop.f32.mrb[1].mxu1 }
 0x6d8   : > { %v6230_v23 = vadd.f32 %v6229_v43, %v6155_v21 }
 0x6d9   : > { %v6232_v5 = vmax.f32 %v6228_v50, 0.0 }
 0x6da   : > { %v6233_v20 = vmax.f32 %v6230_v23, 0.0 }
 0x6db   : > { %6234 = vst [vmem:[%s242_s8] sm:$0xff] %v6232_v5 }
 0x6dc   : > { %6235 = vst [vmem:[%s242_s8 + $0x8] sm:$0xff] %v6233_v20 }
 0x6dd   : > { %6901 = shalt.err (!%p6898_p2)
}
 0x6de   : > { %s6902_s23 = scalar_lea.hbm %s10831_s11, 256  ;;  %s6906_s12 = scalar_lea.hbm %s10880_s5, 512 }
 0x6df   : > { %p6903_p4 = scmp.ne.s32.totalorder %s10831_s11, %s6902_s23  ;;  %p6907_p9 = scmp.lt.u32.totalorder %s10831_s11, %s10880_s5 }
 0x6e0   : > { %p6908_p1 = scmp.lt.u32.totalorder %s6906_s12, %s6902_s23  ;;  %p6910_p6 = scmp.lt.u32.totalorder %s6902_s23, %s10831_s11 }
 0x6e1   : > { %p6904_p5 = pnand %p6903_p4, %p11447_p11 }
 0x6e2   : > { %p6909_p3 = por %p6908_p1, %p6907_p9 }
 0x6e3   : > { %p6905_p7 = pneg %p6904_p5 }
 0x6e4   : > { %p6911_p12 = por %p6910_p6, %p6909_p3 }
 0x6e6   : > { %p6912_p13 = pnand %p6911_p12, %p6905_p7 }
 0x6e8   : > { %6915 = shalt.err (!%p6912_p13)
}
 0x6e9   : > { %6367 = dma.vmem_to_hbm [thread:$0]  (%p11447_p11), %s10833_s7, 256, %s10831_s11, %s6237_s13  }
 0x6ea PF: > { %s6263_s16 = sand.u32 1, %s6942_s18   ;;  %p11448_p8 = scmp.ne.s32.totalorder %s11080_s6, 0 }
 0x6eb   : > { %p11449_p10 = scmp.ge.s32.totalorder %s6954_s21, 2  ;;  %s6264_s8 = scalar_lea.sflag [#allocation6], %s6263_s16 }
 0x6ed   : > { %p6374_p0 = pnand %p11449_p10, %p11448_p8 }
 0x6ef   : > { %6937 = dma.done.wait (!%p6374_p0), %s6264_s8, 256  }
 0x6f0   : > { %6939 = vsyncadd (!%p6374_p0), %s6264_s8, 4294967040  ;;  %p18_p2 = scmp.ge.s32.totalorder %s7029_s24, 4   ;;  %s11450_s18 = smov %s6946_s19 }
 0x6f1   : > { %s11451_s19 = smov %s6950_s20  ;;  %s11452_s20 = smov %s7041_s27 }
 0x6f2   : > { %s11453_s21 = smov %s7029_s24  ;;  %20 = sbr.rel (!%p18_p2) target bundleno = 5 (0x5), region = 85 }
 0x6f9   :  { %6269 = vsyncpa [#allocation5], 1 }
 0x6fa   :  { %6271 = vsyncpa [#allocation5 + $0x1], 1 }
 0x6fb   :  { %6272 = vsyncpa [#allocation6], 1 }
 0x6fc   :  { %6274 = vsyncpa [#allocation6 + $0x1], 1 }

</bundles_post_ra>
